<compile_context>
chip_gen: v5e
topology: v5e:2x2
jax: 0.10.0
libtpu: 0.0.40
codegen_flags: <defaults>
</compile_context>

<pallas_src>
import functools

import jax
import jax.numpy as jnp
from jax.experimental import pallas as pl
from jax.experimental.pallas import tpu as pltpu


def _round_up(x, m):
    return ((x + m - 1) // m) * m


def _pick_nb(n, nb_max=8):
    """Largest divisor of n that is <= nb_max (images per grid step)."""
    best = 1
    for d in range(1, min(n, nb_max) + 1):
        if n % d == 0:
            best = d
    return best


def _vmem_limit_bytes(need_bytes):
    want = max(32 << 20, int(need_bytes))
    try:
        cap = pltpu.get_tpu_info().vmem_capacity_bytes // 2   # 64 MiB v5e/v6e, 32 MiB v7x
    except Exception:
        cap = 64 << 20
    return max(min(want, cap), 32 << 20)


def _fused_kernel(x_ref, dw_ref, b1_ref, w2_ref, b2_ref, m_ref, o_ref, xpad_ref,
                  *, H, W, K, data_off, Nb, C_in):
    # x_ref:  (Nb, C_in, H*W)     Nb batch elements, channels-first, flat spatial
    # dw_ref: (Nb*C_in, K*K)      depthwise filter, BN1 scale folded, tiled per image
    # b1_ref: (Nb*C_in, 1)        folded conv1-bias + BN1 bias, tiled per image
    # w2_ref: (C_out, C_in)       1x1 conv weight, BN2 scale folded, bf16
    # b2_ref: (C_out, 1)          folded conv2-bias + BN2 bias
    # m_ref:  (K, H*W)            per-tap-column validity masks (0/1 float)
    # o_ref:  (Nb, C_out, H*W)    lane-dense NCHW output block
    # xpad_ref: (Nb*C_in, padlen) VMEM scratch holding the zero-padded flat images
    P = (K - 1) // 2
    HW = H * W
    R = Nb * C_in
    padlen = xpad_ref.shape[1]

    # ---- refresh only the (lane-aligned) halo slabs; overwrite the data slab ----
    if data_off > 0:
        xpad_ref[:, :data_off] = jnp.zeros((R, data_off), jnp.float32)
    tail = padlen - (data_off + HW)
    if tail > 0:
        xpad_ref[:, data_off + HW:] = jnp.zeros((R, tail), jnp.float32)
    xpad_ref[:, data_off:data_off + HW] = (
        x_ref[...].reshape(R, HW).astype(jnp.float32))

    dw = dw_ref[...]                       # (R, K*K)
    base = data_off - (P * W + P)          # slice start for tap (i=0, j=0)

    # ---- depthwise KxK conv: lane-shifted taps, hoisted per-j masks ----
    accs = [jnp.zeros((R, HW), jnp.float32) for _ in range(4)]
    for j in range(K):
        parts = [None, None]
        for i in range(K):
            s = base + i * W + j
            tap = xpad_ref[:, s:s + HW]                        # (R, HW)
            coef = dw[:, i * K + j:i * K + j + 1]              # (R, 1)
            term = tap * coef
            k = i & 1
            parts[k] = term if parts[k] is None else parts[k] + term
        pj = parts[0] if parts[1] is None else parts[0] + parts[1]
        valid = m_ref[j:j + 1, :]                              # (1, HW) mask, once per j
        accs[j % 4] = accs[j % 4] + pj * valid
    acc = (accs[0] + accs[1]) + (accs[2] + accs[3])

    # ---- BN1 (scale already folded into dw) + ReLU ----
    y = jnp.maximum(acc + b1_ref[...], 0.0)                    # (R, HW) f32
    y_bf = y.astype(jnp.bfloat16)

    # ---- 1x1 conv on the MXU: bf16 operands, f32 accumulation, per-image ----
    w2 = w2_ref[...]                                           # (C_out, C_in) bf16
    b2 = b2_ref[...]                                           # (C_out, 1)    f32
    for b in range(Nb):
        yb = y_bf[b * C_in:(b + 1) * C_in, :]                  # (C_in, HW)
        zb = jnp.dot(w2, yb, preferred_element_type=jnp.float32)
        # ---- BN2 (scale already folded into w2) + ReLU ----
        o_ref[b] = jnp.maximum(zb + b2, 0.0).astype(o_ref.dtype)


def split_separable_conv2d(x_nchw, params, kernel_size=7, eps=1e-5, nb_max=8):
    """x_nchw: (N, C_in, H, W) float32.  Returns (N, C_out, H, W)."""
    K = kernel_size
    P = (K - 1) // 2
    N, C_in, H, W = x_nchw.shape
    HW = H * W

    dw_w = params["conv1_w"]          # (C_in, 1, K, K)  PyTorch layout
    dw_b = params["conv1_b"]          # (C_in,)
    g1, be1 = params["bn1_gamma"], params["bn1_beta"]
    m1, v1 = params["bn1_mean"], params["bn1_var"]
    pw_w = params["conv2_w"]          # (C_out, C_in, 1, 1)
    pw_b = params["conv2_b"]          # (C_out,)
    g2, be2 = params["bn2_gamma"], params["bn2_beta"]
    m2, v2 = params["bn2_mean"], params["bn2_var"]
    C_out = pw_w.shape[0]

    # ---- fold BN scales into the conv weights; keep only biases ----
    s1 = g1 / jnp.sqrt(v1 + eps)                                        # (C_in,)
    s2 = g2 / jnp.sqrt(v2 + eps)                                        # (C_out,)
    dw = (dw_w[:, 0, :, :] * s1[:, None, None]).reshape(C_in, K * K)
    dw = dw.astype(jnp.float32)
    w2 = (pw_w[:, :, 0, 0] * s2[:, None]).astype(jnp.float32)           # (C_out, C_in)
    b1 = ((dw_b - m1) * s1 + be1).reshape(C_in, 1).astype(jnp.float32)
    b2 = ((pw_b - m2) * s2 + be2).reshape(C_out, 1).astype(jnp.float32)

    # ---- batching: Nb images per grid step ----
    Nb = _pick_nb(N, nb_max)
    steps = N // Nb
    dw_t = jnp.tile(dw, (Nb, 1))                                        # (Nb*C_in, K*K)
    b1_t = jnp.tile(b1, (Nb, 1))                                        # (Nb*C_in, 1)
    w2_bf = w2.astype(jnp.bfloat16)                                     # bf16 MXU feed

    # ---- static per-j column masks for the implicit width halo ----
    w_idx = jnp.arange(HW, dtype=jnp.int32) % W                         # (HW,)
    js = jnp.arange(K, dtype=jnp.int32)[:, None]                        # (K, 1)
    masks = (((w_idx[None, :] + js) >= P) &
             ((w_idx[None, :] + js) < W + P)).astype(jnp.float32)       # (K, HW)

    # channels-first, flattened spatial: free reshapes, no transposes / HBM pads
    x_flat = x_nchw.reshape(N, C_in, HW).astype(jnp.float32)

    front = P * W + P                       # zeros needed ahead of the data slab
    data_off = _round_up(front, 128)        # keep per-step slab stores lane-aligned
    padlen = _round_up(data_off + HW + front, 128)

    kernel = functools.partial(_fused_kernel, H=H, W=W, K=K,
                               data_off=data_off, Nb=Nb, C_in=C_in)

    # VMEM footprint estimate: double-buffered x/o blocks + padded scratch +
    # in-kernel accumulator working set + headroom.
    need = (2 * (Nb * C_in * HW * 4 + Nb * C_out * HW * 4)
            + Nb * C_in * padlen * 4
            + 6 * Nb * C_in * HW * 4
            + (8 << 20))
    vmem_limit = _vmem_limit_bytes(need)

    out_flat = pl.pallas_call(
        kernel,
        out_shape=jax.ShapeDtypeStruct((N, C_out, HW), jnp.float32),
        grid_spec=pltpu.PrefetchScalarGridSpec(
            num_scalar_prefetch=0,
            grid=(steps,),
            in_specs=[
                pl.BlockSpec((Nb, C_in, HW),     lambda n: (n, 0, 0)),
                pl.BlockSpec((Nb * C_in, K * K), lambda n: (0, 0)),
                pl.BlockSpec((Nb * C_in, 1),     lambda n: (0, 0)),
                pl.BlockSpec((C_out, C_in),      lambda n: (0, 0)),
                pl.BlockSpec((C_out, 1),         lambda n: (0, 0)),
                pl.BlockSpec((K, HW),            lambda n: (0, 0)),
            ],
            out_specs=pl.BlockSpec((Nb, C_out, HW), lambda n: (n, 0, 0)),
            scratch_shapes=[pltpu.VMEM((Nb * C_in, padlen), jnp.float32)],
        ),
        compiler_params=pltpu.CompilerParams(
            dimension_semantics=("parallel",),
            vmem_limit_bytes=vmem_limit),
    )(x_flat, dw_t, b1_t, w2_bf, b2, masks)

    return out_flat.reshape(N, C_out, H, W)


def _reference(x_nchw, params, kernel_size=7, eps=1e-5):
    """Pure-JAX (XLA conv) reference, NCHW in/out, matching PyTorch semantics."""
    K = kernel_size
    N, C_in, H, W = x_nchw.shape

    x = jnp.transpose(x_nchw, (0, 2, 3, 1))                     # NHWC
    dw_hwio = jnp.transpose(params["conv1_w"], (2, 3, 1, 0))    # (K,K,1,C_in)
    y = jax.lax.conv_general_dilated(
        x, dw_hwio, window_strides=(1, 1), padding="SAME",
        dimension_numbers=("NHWC", "HWIO", "NHWC"),
        feature_group_count=C_in) + params["conv1_b"]
    s1 = params["bn1_gamma"] / jnp.sqrt(params["bn1_var"] + eps)
    y = (y - params["bn1_mean"]) * s1 + params["bn1_beta"]
    y = jnp.maximum(y, 0.0)

    w2 = jnp.transpose(params["conv2_w"][:, :, 0, 0], (1, 0))   # (C_in, C_out)
    z = jnp.einsum("nhwc,cd->nhwd", y, w2) + params["conv2_b"]
    s2 = params["bn2_gamma"] / jnp.sqrt(params["bn2_var"] + eps)
    z = (z - params["bn2_mean"]) * s2 + params["bn2_beta"]
    z = jnp.maximum(z, 0.0)
    return jnp.transpose(z, (0, 3, 1, 2))


def init_params(key, in_dim, out_dim, kernel_size=7):
    k = jax.random.split(key, 8)
    K = kernel_size
    # kaiming_normal_(mode='fan_out', nonlinearity='relu'):
    # conv1 (depthwise): fan_out = (out_ch / groups) * K*K = K*K
    std1 = (2.0 / (K * K)) ** 0.5
    # conv2 (1x1): fan_out = out_dim
    std2 = (2.0 / out_dim) ** 0.5
    return {
        "conv1_w":  std1 * jax.random.normal(k[0], (in_dim, 1, K, K), jnp.float32),
        "conv1_b":  0.1 * jax.random.normal(k[1], (in_dim,), jnp.float32),
        "bn1_gamma": 1.0 + 0.1 * jax.random.normal(k[2], (in_dim,), jnp.float32),
        "bn1_beta":  0.1 * jax.random.normal(k[3], (in_dim,), jnp.float32),
        "bn1_mean":  0.1 * jax.random.normal(k[4], (in_dim,), jnp.float32),
        "bn1_var":   jnp.abs(1.0 + 0.1 * jax.random.normal(k[5], (in_dim,), jnp.float32)),
        "conv2_w":  std2 * jax.random.normal(k[6], (out_dim, in_dim, 1, 1), jnp.float32),
        "conv2_b":  0.1 * jax.random.normal(k[7], (out_dim,), jnp.float32),
        "bn2_gamma": jnp.ones((out_dim,), jnp.float32),
        "bn2_beta":  jnp.zeros((out_dim,), jnp.float32),
        "bn2_mean":  jnp.zeros((out_dim,), jnp.float32),
        "bn2_var":   jnp.ones((out_dim,), jnp.float32),
    }
    # TODO(synk): SynchronizedBatchNorm2d training-mode (batch-stat) behavior is
    # not reproduced; inference-mode affine BN with running stats is used.


if __name__ == "__main__":
    key = jax.random.PRNGKey(0)
    kx, kp = jax.random.split(key)

    N, C_in, C_out, H, W, K = 2, 8, 16, 16, 16, 7
    x = jax.random.normal(kx, (N, C_in, H, W), jnp.float32)
    params = init_params(kp, C_in, C_out, K)

    out = split_separable_conv2d(x, params, kernel_size=K)
    out = jax.block_until_ready(out)

    ref = jax.block_until_ready(_reference(x, params, kernel_size=K))
    assert out.shape == (N, C_out, H, W)
    # bf16 MXU operands (f32 accumulation) -> looser bound than the f32-only 1e-4.
    err = float(jnp.max(jnp.abs(out - ref)))
    assert err < 5e-2, err

    print("KERNEL_OK")
</pallas_src>

<mosaic_0001>
module attributes {stable_mosaic.version = 11 : i64} {
  func.func @_fused_kernel(%arg0: i32, %arg1: memref<2x8x256xf32, #tpu.memory_space<vmem>>, %arg2: memref<16x49xf32, #tpu.memory_space<vmem>>, %arg3: memref<16x1xf32, #tpu.memory_space<vmem>>, %arg4: memref<16x8xbf16, #tpu.memory_space<vmem>>, %arg5: memref<16x1xf32, #tpu.memory_space<vmem>>, %arg6: memref<7x256xf32, #tpu.memory_space<vmem>>, %arg7: memref<2x16x256xf32, #tpu.memory_space<vmem>>, %arg8: memref<16x512xf32, #tpu.memory_space<vmem>>) attributes {dimension_semantics = [#tpu.dimension_semantics<parallel>], iteration_bounds = array<i64: 1>, scalar_prefetch = 0 : i64, scratch_operands = 1 : i64, tpu.core_type = #tpu.core_type<tc>, window_params = [{transform_indices = @transform_0, window_bounds = array<i64: 2, 8, 256>}, {pipeline_mode = #tpu.pipeline_mode<synchronous>, transform_indices = @transform_1, window_bounds = array<i64: 16, 49>}, {pipeline_mode = #tpu.pipeline_mode<synchronous>, transform_indices = @transform_2, window_bounds = array<i64: 16, 1>}, {pipeline_mode = #tpu.pipeline_mode<synchronous>, transform_indices = @transform_3, window_bounds = array<i64: 16, 8>}, {pipeline_mode = #tpu.pipeline_mode<synchronous>, transform_indices = @transform_4, window_bounds = array<i64: 16, 1>}, {pipeline_mode = #tpu.pipeline_mode<synchronous>, transform_indices = @transform_5, window_bounds = array<i64: 7, 256>}, {transform_indices = @transform_6, window_bounds = array<i64: 2, 16, 256>}]} {
    %cst = arith.constant 0.000000e+00 : f32
    %0 = vector.broadcast %cst : f32 to vector<16x128xf32>
    %c0 = arith.constant 0 : index
    %c0_0 = arith.constant 0 : index
    %1 = vector.load %arg8[%c0, %c0_0] : memref<16x512xf32, #tpu.memory_space<vmem>>, vector<16x128xf32>
    tpu.vector_store %arg8[%c0, %c0_0], %0 {strides = array<i32>} : memref<16x512xf32, #tpu.memory_space<vmem>>, vector<16x128xf32>,
    %cst_1 = arith.constant 0.000000e+00 : f32
    %2 = vector.broadcast %cst_1 : f32 to vector<16x128xf32>
    %c0_2 = arith.constant 0 : index
    %c384 = arith.constant 384 : index
    %3 = vector.load %arg8[%c0_2, %c384] : memref<16x512xf32, #tpu.memory_space<vmem>>, vector<16x128xf32>
    tpu.vector_store %arg8[%c0_2, %c384], %2 {strides = array<i32>} : memref<16x512xf32, #tpu.memory_space<vmem>>, vector<16x128xf32>,
    %c0_3 = arith.constant 0 : index
    %c0_4 = arith.constant 0 : index
    %c0_5 = arith.constant 0 : index
    %4 = vector.load %arg1[%c0_3, %c0_4, %c0_5] : memref<2x8x256xf32, #tpu.memory_space<vmem>>, vector<2x8x256xf32>
    %5 = vector.shape_cast %4 : vector<2x8x256xf32> to vector<16x256xf32>
    %c0_6 = arith.constant 0 : index
    %c128 = arith.constant 128 : index
    %6 = vector.load %arg8[%c0_6, %c128] : memref<16x512xf32, #tpu.memory_space<vmem>>, vector<16x256xf32>
    tpu.vector_store %arg8[%c0_6, %c128], %5 {strides = array<i32>} : memref<16x512xf32, #tpu.memory_space<vmem>>, vector<16x256xf32>,
    %c0_7 = arith.constant 0 : index
    %c0_8 = arith.constant 0 : index
    %7 = vector.load %arg2[%c0_7, %c0_8] : memref<16x49xf32, #tpu.memory_space<vmem>>, vector<16x49xf32>
    %cst_9 = arith.constant 0.000000e+00 : f32
    %8 = vector.broadcast %cst_9 : f32 to vector<16x256xf32>
    %cst_10 = arith.constant 0.000000e+00 : f32
    %9 = vector.broadcast %cst_10 : f32 to vector<16x256xf32>
    %cst_11 = arith.constant 0.000000e+00 : f32
    %10 = vector.broadcast %cst_11 : f32 to vector<16x256xf32>
    %cst_12 = arith.constant 0.000000e+00 : f32
    %11 = vector.broadcast %cst_12 : f32 to vector<16x256xf32>
    %c0_13 = arith.constant 0 : index
    %c77 = arith.constant 77 : index
    %12 = vector.load %arg8[%c0_13, %c77] : memref<16x512xf32, #tpu.memory_space<vmem>>, vector<16x256xf32>
    %13 = vector.extract_strided_slice %7 {offsets = [0, 0], sizes = [16, 1], strides = [1, 1]} : vector<16x49xf32> to vector<16x1xf32>
    %14 = vector.broadcast %13 : vector<16x1xf32> to vector<16x256xf32>
    %15 = arith.mulf %12, %14 : vector<16x256xf32>
    %c0_14 = arith.constant 0 : index
    %c93 = arith.constant 93 : index
    %16 = vector.load %arg8[%c0_14, %c93] : memref<16x512xf32, #tpu.memory_space<vmem>>, vector<16x256xf32>
    %17 = vector.extract_strided_slice %7 {offsets = [0, 7], sizes = [16, 1], strides = [1, 1]} : vector<16x49xf32> to vector<16x1xf32>
    %18 = vector.broadcast %17 : vector<16x1xf32> to vector<16x256xf32>
    %19 = arith.mulf %16, %18 : vector<16x256xf32>
    %c0_15 = arith.constant 0 : index
    %c109 = arith.constant 109 : index
    %20 = vector.load %arg8[%c0_15, %c109] : memref<16x512xf32, #tpu.memory_space<vmem>>, vector<16x256xf32>
    %21 = vector.extract_strided_slice %7 {offsets = [0, 14], sizes = [16, 1], strides = [1, 1]} : vector<16x49xf32> to vector<16x1xf32>
    %22 = vector.broadcast %21 : vector<16x1xf32> to vector<16x256xf32>
    %23 = arith.mulf %20, %22 : vector<16x256xf32>
    %24 = arith.addf %15, %23 : vector<16x256xf32>
    %c0_16 = arith.constant 0 : index
    %c125 = arith.constant 125 : index
    %25 = vector.load %arg8[%c0_16, %c125] : memref<16x512xf32, #tpu.memory_space<vmem>>, vector<16x256xf32>
    %26 = vector.extract_strided_slice %7 {offsets = [0, 21], sizes = [16, 1], strides = [1, 1]} : vector<16x49xf32> to vector<16x1xf32>
    %27 = vector.broadcast %26 : vector<16x1xf32> to vector<16x256xf32>
    %28 = arith.mulf %25, %27 : vector<16x256xf32>
    %29 = arith.addf %19, %28 : vector<16x256xf32>
    %c0_17 = arith.constant 0 : index
    %c141 = arith.constant 141 : index
    %30 = vector.load %arg8[%c0_17, %c141] : memref<16x512xf32, #tpu.memory_space<vmem>>, vector<16x256xf32>
    %31 = vector.extract_strided_slice %7 {offsets = [0, 28], sizes = [16, 1], strides = [1, 1]} : vector<16x49xf32> to vector<16x1xf32>
    %32 = vector.broadcast %31 : vector<16x1xf32> to vector<16x256xf32>
    %33 = arith.mulf %30, %32 : vector<16x256xf32>
    %34 = arith.addf %24, %33 : vector<16x256xf32>
    %c0_18 = arith.constant 0 : index
    %c157 = arith.constant 157 : index
    %35 = vector.load %arg8[%c0_18, %c157] : memref<16x512xf32, #tpu.memory_space<vmem>>, vector<16x256xf32>
    %36 = vector.extract_strided_slice %7 {offsets = [0, 35], sizes = [16, 1], strides = [1, 1]} : vector<16x49xf32> to vector<16x1xf32>
    %37 = vector.broadcast %36 : vector<16x1xf32> to vector<16x256xf32>
    %38 = arith.mulf %35, %37 : vector<16x256xf32>
    %39 = arith.addf %29, %38 : vector<16x256xf32>
    %c0_19 = arith.constant 0 : index
    %c173 = arith.constant 173 : index
    %40 = vector.load %arg8[%c0_19, %c173] : memref<16x512xf32, #tpu.memory_space<vmem>>, vector<16x256xf32>
    %41 = vector.extract_strided_slice %7 {offsets = [0, 42], sizes = [16, 1], strides = [1, 1]} : vector<16x49xf32> to vector<16x1xf32>
    %42 = vector.broadcast %41 : vector<16x1xf32> to vector<16x256xf32>
    %43 = arith.mulf %40, %42 : vector<16x256xf32>
    %44 = arith.addf %34, %43 : vector<16x256xf32>
    %45 = arith.addf %44, %39 : vector<16x256xf32>
    %c0_20 = arith.constant 0 : index
    %c0_21 = arith.constant 0 : index
    %46 = vector.load %arg6[%c0_20, %c0_21] : memref<7x256xf32, #tpu.memory_space<vmem>>, vector<1x256xf32>
    %47 = vector.broadcast %46 : vector<1x256xf32> to vector<16x256xf32>
    %48 = arith.mulf %45, %47 : vector<16x256xf32>
    %49 = arith.addf %8, %48 : vector<16x256xf32>
    %c0_22 = arith.constant 0 : index
    %c78 = arith.constant 78 : index
    %50 = vector.load %arg8[%c0_22, %c78] : memref<16x512xf32, #tpu.memory_space<vmem>>, vector<16x256xf32>
    %51 = vector.extract_strided_slice %7 {offsets = [0, 1], sizes = [16, 1], strides = [1, 1]} : vector<16x49xf32> to vector<16x1xf32>
    %52 = vector.broadcast %51 : vector<16x1xf32> to vector<16x256xf32>
    %53 = arith.mulf %50, %52 : vector<16x256xf32>
    %c0_23 = arith.constant 0 : index
    %c94 = arith.constant 94 : index
    %54 = vector.load %arg8[%c0_23, %c94] : memref<16x512xf32, #tpu.memory_space<vmem>>, vector<16x256xf32>
    %55 = vector.extract_strided_slice %7 {offsets = [0, 8], sizes = [16, 1], strides = [1, 1]} : vector<16x49xf32> to vector<16x1xf32>
    %56 = vector.broadcast %55 : vector<16x1xf32> to vector<16x256xf32>
    %57 = arith.mulf %54, %56 : vector<16x256xf32>
    %c0_24 = arith.constant 0 : index
    %c110 = arith.constant 110 : index
    %58 = vector.load %arg8[%c0_24, %c110] : memref<16x512xf32, #tpu.memory_space<vmem>>, vector<16x256xf32>
    %59 = vector.extract_strided_slice %7 {offsets = [0, 15], sizes = [16, 1], strides = [1, 1]} : vector<16x49xf32> to vector<16x1xf32>
    %60 = vector.broadcast %59 : vector<16x1xf32> to vector<16x256xf32>
    %61 = arith.mulf %58, %60 : vector<16x256xf32>
    %62 = arith.addf %53, %61 : vector<16x256xf32>
    %c0_25 = arith.constant 0 : index
    %c126 = arith.constant 126 : index
    %63 = vector.load %arg8[%c0_25, %c126] : memref<16x512xf32, #tpu.memory_space<vmem>>, vector<16x256xf32>
    %64 = vector.extract_strided_slice %7 {offsets = [0, 22], sizes = [16, 1], strides = [1, 1]} : vector<16x49xf32> to vector<16x1xf32>
    %65 = vector.broadcast %64 : vector<16x1xf32> to vector<16x256xf32>
    %66 = arith.mulf %63, %65 : vector<16x256xf32>
    %67 = arith.addf %57, %66 : vector<16x256xf32>
    %c0_26 = arith.constant 0 : index
    %c142 = arith.constant 142 : index
    %68 = vector.load %arg8[%c0_26, %c142] : memref<16x512xf32, #tpu.memory_space<vmem>>, vector<16x256xf32>
    %69 = vector.extract_strided_slice %7 {offsets = [0, 29], sizes = [16, 1], strides = [1, 1]} : vector<16x49xf32> to vector<16x1xf32>
    %70 = vector.broadcast %69 : vector<16x1xf32> to vector<16x256xf32>
    %71 = arith.mulf %68, %70 : vector<16x256xf32>
    %72 = arith.addf %62, %71 : vector<16x256xf32>
    %c0_27 = arith.constant 0 : index
    %c158 = arith.constant 158 : index
    %73 = vector.load %arg8[%c0_27, %c158] : memref<16x512xf32, #tpu.memory_space<vmem>>, vector<16x256xf32>
    %74 = vector.extract_strided_slice %7 {offsets = [0, 36], sizes = [16, 1], strides = [1, 1]} : vector<16x49xf32> to vector<16x1xf32>
    %75 = vector.broadcast %74 : vector<16x1xf32> to vector<16x256xf32>
    %76 = arith.mulf %73, %75 : vector<16x256xf32>
    %77 = arith.addf %67, %76 : vector<16x256xf32>
    %c0_28 = arith.constant 0 : index
    %c174 = arith.constant 174 : index
    %78 = vector.load %arg8[%c0_28, %c174] : memref<16x512xf32, #tpu.memory_space<vmem>>, vector<16x256xf32>
    %79 = vector.extract_strided_slice %7 {offsets = [0, 43], sizes = [16, 1], strides = [1, 1]} : vector<16x49xf32> to vector<16x1xf32>
    %80 = vector.broadcast %79 : vector<16x1xf32> to vector<16x256xf32>
    %81 = arith.mulf %78, %80 : vector<16x256xf32>
    %82 = arith.addf %72, %81 : vector<16x256xf32>
    %83 = arith.addf %82, %77 : vector<16x256xf32>
    %c1 = arith.constant 1 : index
    %c0_29 = arith.constant 0 : index
    %84 = vector.load %arg6[%c1, %c0_29] : memref<7x256xf32, #tpu.memory_space<vmem>>, vector<1x256xf32>
    %85 = vector.broadcast %84 : vector<1x256xf32> to vector<16x256xf32>
    %86 = arith.mulf %83, %85 : vector<16x256xf32>
    %87 = arith.addf %9, %86 : vector<16x256xf32>
    %c0_30 = arith.constant 0 : index
    %c79 = arith.constant 79 : index
    %88 = vector.load %arg8[%c0_30, %c79] : memref<16x512xf32, #tpu.memory_space<vmem>>, vector<16x256xf32>
    %89 = vector.extract_strided_slice %7 {offsets = [0, 2], sizes = [16, 1], strides = [1, 1]} : vector<16x49xf32> to vector<16x1xf32>
    %90 = vector.broadcast %89 : vector<16x1xf32> to vector<16x256xf32>
    %91 = arith.mulf %88, %90 : vector<16x256xf32>
    %c0_31 = arith.constant 0 : index
    %c95 = arith.constant 95 : index
    %92 = vector.load %arg8[%c0_31, %c95] : memref<16x512xf32, #tpu.memory_space<vmem>>, vector<16x256xf32>
    %93 = vector.extract_strided_slice %7 {offsets = [0, 9], sizes = [16, 1], strides = [1, 1]} : vector<16x49xf32> to vector<16x1xf32>
    %94 = vector.broadcast %93 : vector<16x1xf32> to vector<16x256xf32>
    %95 = arith.mulf %92, %94 : vector<16x256xf32>
    %c0_32 = arith.constant 0 : index
    %c111 = arith.constant 111 : index
    %96 = vector.load %arg8[%c0_32, %c111] : memref<16x512xf32, #tpu.memory_space<vmem>>, vector<16x256xf32>
    %97 = vector.extract_strided_slice %7 {offsets = [0, 16], sizes = [16, 1], strides = [1, 1]} : vector<16x49xf32> to vector<16x1xf32>
    %98 = vector.broadcast %97 : vector<16x1xf32> to vector<16x256xf32>
    %99 = arith.mulf %96, %98 : vector<16x256xf32>
    %100 = arith.addf %91, %99 : vector<16x256xf32>
    %c0_33 = arith.constant 0 : index
    %c127 = arith.constant 127 : index
    %101 = vector.load %arg8[%c0_33, %c127] : memref<16x512xf32, #tpu.memory_space<vmem>>, vector<16x256xf32>
    %102 = vector.extract_strided_slice %7 {offsets = [0, 23], sizes = [16, 1], strides = [1, 1]} : vector<16x49xf32> to vector<16x1xf32>
    %103 = vector.broadcast %102 : vector<16x1xf32> to vector<16x256xf32>
    %104 = arith.mulf %101, %103 : vector<16x256xf32>
    %105 = arith.addf %95, %104 : vector<16x256xf32>
    %c0_34 = arith.constant 0 : index
    %c143 = arith.constant 143 : index
    %106 = vector.load %arg8[%c0_34, %c143] : memref<16x512xf32, #tpu.memory_space<vmem>>, vector<16x256xf32>
    %107 = vector.extract_strided_slice %7 {offsets = [0, 30], sizes = [16, 1], strides = [1, 1]} : vector<16x49xf32> to vector<16x1xf32>
    %108 = vector.broadcast %107 : vector<16x1xf32> to vector<16x256xf32>
    %109 = arith.mulf %106, %108 : vector<16x256xf32>
    %110 = arith.addf %100, %109 : vector<16x256xf32>
    %c0_35 = arith.constant 0 : index
    %c159 = arith.constant 159 : index
    %111 = vector.load %arg8[%c0_35, %c159] : memref<16x512xf32, #tpu.memory_space<vmem>>, vector<16x256xf32>
    %112 = vector.extract_strided_slice %7 {offsets = [0, 37], sizes = [16, 1], strides = [1, 1]} : vector<16x49xf32> to vector<16x1xf32>
    %113 = vector.broadcast %112 : vector<16x1xf32> to vector<16x256xf32>
    %114 = arith.mulf %111, %113 : vector<16x256xf32>
    %115 = arith.addf %105, %114 : vector<16x256xf32>
    %c0_36 = arith.constant 0 : index
    %c175 = arith.constant 175 : index
    %116 = vector.load %arg8[%c0_36, %c175] : memref<16x512xf32, #tpu.memory_space<vmem>>, vector<16x256xf32>
    %117 = vector.extract_strided_slice %7 {offsets = [0, 44], sizes = [16, 1], strides = [1, 1]} : vector<16x49xf32> to vector<16x1xf32>
    %118 = vector.broadcast %117 : vector<16x1xf32> to vector<16x256xf32>
    %119 = arith.mulf %116, %118 : vector<16x256xf32>
    %120 = arith.addf %110, %119 : vector<16x256xf32>
    %121 = arith.addf %120, %115 : vector<16x256xf32>
    %c2 = arith.constant 2 : index
    %c0_37 = arith.constant 0 : index
    %122 = vector.load %arg6[%c2, %c0_37] : memref<7x256xf32, #tpu.memory_space<vmem>>, vector<1x256xf32>
    %123 = vector.broadcast %122 : vector<1x256xf32> to vector<16x256xf32>
    %124 = arith.mulf %121, %123 : vector<16x256xf32>
    %125 = arith.addf %10, %124 : vector<16x256xf32>
    %c0_38 = arith.constant 0 : index
    %c80 = arith.constant 80 : index
    %126 = vector.load %arg8[%c0_38, %c80] : memref<16x512xf32, #tpu.memory_space<vmem>>, vector<16x256xf32>
    %127 = vector.extract_strided_slice %7 {offsets = [0, 3], sizes = [16, 1], strides = [1, 1]} : vector<16x49xf32> to vector<16x1xf32>
    %128 = vector.broadcast %127 : vector<16x1xf32> to vector<16x256xf32>
    %129 = arith.mulf %126, %128 : vector<16x256xf32>
    %c0_39 = arith.constant 0 : index
    %c96 = arith.constant 96 : index
    %130 = vector.load %arg8[%c0_39, %c96] : memref<16x512xf32, #tpu.memory_space<vmem>>, vector<16x256xf32>
    %131 = vector.extract_strided_slice %7 {offsets = [0, 10], sizes = [16, 1], strides = [1, 1]} : vector<16x49xf32> to vector<16x1xf32>
    %132 = vector.broadcast %131 : vector<16x1xf32> to vector<16x256xf32>
    %133 = arith.mulf %130, %132 : vector<16x256xf32>
    %c0_40 = arith.constant 0 : index
    %c112 = arith.constant 112 : index
    %134 = vector.load %arg8[%c0_40, %c112] : memref<16x512xf32, #tpu.memory_space<vmem>>, vector<16x256xf32>
    %135 = vector.extract_strided_slice %7 {offsets = [0, 17], sizes = [16, 1], strides = [1, 1]} : vector<16x49xf32> to vector<16x1xf32>
    %136 = vector.broadcast %135 : vector<16x1xf32> to vector<16x256xf32>
    %137 = arith.mulf %134, %136 : vector<16x256xf32>
    %138 = arith.addf %129, %137 : vector<16x256xf32>
    %c0_41 = arith.constant 0 : index
    %c128_42 = arith.constant 128 : index
    %139 = vector.load %arg8[%c0_41, %c128_42] : memref<16x512xf32, #tpu.memory_space<vmem>>, vector<16x256xf32>
    %140 = vector.extract_strided_slice %7 {offsets = [0, 24], sizes = [16, 1], strides = [1, 1]} : vector<16x49xf32> to vector<16x1xf32>
    %141 = vector.broadcast %140 : vector<16x1xf32> to vector<16x256xf32>
    %142 = arith.mulf %139, %141 : vector<16x256xf32>
    %143 = arith.addf %133, %142 : vector<16x256xf32>
    %c0_43 = arith.constant 0 : index
    %c144 = arith.constant 144 : index
    %144 = vector.load %arg8[%c0_43, %c144] : memref<16x512xf32, #tpu.memory_space<vmem>>, vector<16x256xf32>
    %145 = vector.extract_strided_slice %7 {offsets = [0, 31], sizes = [16, 1], strides = [1, 1]} : vector<16x49xf32> to vector<16x1xf32>
    %146 = vector.broadcast %145 : vector<16x1xf32> to vector<16x256xf32>
    %147 = arith.mulf %144, %146 : vector<16x256xf32>
    %148 = arith.addf %138, %147 : vector<16x256xf32>
    %c0_44 = arith.constant 0 : index
    %c160 = arith.constant 160 : index
    %149 = vector.load %arg8[%c0_44, %c160] : memref<16x512xf32, #tpu.memory_space<vmem>>, vector<16x256xf32>
    %150 = vector.extract_strided_slice %7 {offsets = [0, 38], sizes = [16, 1], strides = [1, 1]} : vector<16x49xf32> to vector<16x1xf32>
    %151 = vector.broadcast %150 : vector<16x1xf32> to vector<16x256xf32>
    %152 = arith.mulf %149, %151 : vector<16x256xf32>
    %153 = arith.addf %143, %152 : vector<16x256xf32>
    %c0_45 = arith.constant 0 : index
    %c176 = arith.constant 176 : index
    %154 = vector.load %arg8[%c0_45, %c176] : memref<16x512xf32, #tpu.memory_space<vmem>>, vector<16x256xf32>
    %155 = vector.extract_strided_slice %7 {offsets = [0, 45], sizes = [16, 1], strides = [1, 1]} : vector<16x49xf32> to vector<16x1xf32>
    %156 = vector.broadcast %155 : vector<16x1xf32> to vector<16x256xf32>
    %157 = arith.mulf %154, %156 : vector<16x256xf32>
    %158 = arith.addf %148, %157 : vector<16x256xf32>
    %159 = arith.addf %158, %153 : vector<16x256xf32>
    %c3 = arith.constant 3 : index
    %c0_46 = arith.constant 0 : index
    %160 = vector.load %arg6[%c3, %c0_46] : memref<7x256xf32, #tpu.memory_space<vmem>>, vector<1x256xf32>
    %161 = vector.broadcast %160 : vector<1x256xf32> to vector<16x256xf32>
    %162 = arith.mulf %159, %161 : vector<16x256xf32>
    %163 = arith.addf %11, %162 : vector<16x256xf32>
    %c0_47 = arith.constant 0 : index
    %c81 = arith.constant 81 : index
    %164 = vector.load %arg8[%c0_47, %c81] : memref<16x512xf32, #tpu.memory_space<vmem>>, vector<16x256xf32>
    %165 = vector.extract_strided_slice %7 {offsets = [0, 4], sizes = [16, 1], strides = [1, 1]} : vector<16x49xf32> to vector<16x1xf32>
    %166 = vector.broadcast %165 : vector<16x1xf32> to vector<16x256xf32>
    %167 = arith.mulf %164, %166 : vector<16x256xf32>
    %c0_48 = arith.constant 0 : index
    %c97 = arith.constant 97 : index
    %168 = vector.load %arg8[%c0_48, %c97] : memref<16x512xf32, #tpu.memory_space<vmem>>, vector<16x256xf32>
    %169 = vector.extract_strided_slice %7 {offsets = [0, 11], sizes = [16, 1], strides = [1, 1]} : vector<16x49xf32> to vector<16x1xf32>
    %170 = vector.broadcast %169 : vector<16x1xf32> to vector<16x256xf32>
    %171 = arith.mulf %168, %170 : vector<16x256xf32>
    %c0_49 = arith.constant 0 : index
    %c113 = arith.constant 113 : index
    %172 = vector.load %arg8[%c0_49, %c113] : memref<16x512xf32, #tpu.memory_space<vmem>>, vector<16x256xf32>
    %173 = vector.extract_strided_slice %7 {offsets = [0, 18], sizes = [16, 1], strides = [1, 1]} : vector<16x49xf32> to vector<16x1xf32>
    %174 = vector.broadcast %173 : vector<16x1xf32> to vector<16x256xf32>
    %175 = arith.mulf %172, %174 : vector<16x256xf32>
    %176 = arith.addf %167, %175 : vector<16x256xf32>
    %c0_50 = arith.constant 0 : index
    %c129 = arith.constant 129 : index
    %177 = vector.load %arg8[%c0_50, %c129] : memref<16x512xf32, #tpu.memory_space<vmem>>, vector<16x256xf32>
    %178 = vector.extract_strided_slice %7 {offsets = [0, 25], sizes = [16, 1], strides = [1, 1]} : vector<16x49xf32> to vector<16x1xf32>
    %179 = vector.broadcast %178 : vector<16x1xf32> to vector<16x256xf32>
    %180 = arith.mulf %177, %179 : vector<16x256xf32>
    %181 = arith.addf %171, %180 : vector<16x256xf32>
    %c0_51 = arith.constant 0 : index
    %c145 = arith.constant 145 : index
    %182 = vector.load %arg8[%c0_51, %c145] : memref<16x512xf32, #tpu.memory_space<vmem>>, vector<16x256xf32>
    %183 = vector.extract_strided_slice %7 {offsets = [0, 32], sizes = [16, 1], strides = [1, 1]} : vector<16x49xf32> to vector<16x1xf32>
    %184 = vector.broadcast %183 : vector<16x1xf32> to vector<16x256xf32>
    %185 = arith.mulf %182, %184 : vector<16x256xf32>
    %186 = arith.addf %176, %185 : vector<16x256xf32>
    %c0_52 = arith.constant 0 : index
    %c161 = arith.constant 161 : index
    %187 = vector.load %arg8[%c0_52, %c161] : memref<16x512xf32, #tpu.memory_space<vmem>>, vector<16x256xf32>
    %188 = vector.extract_strided_slice %7 {offsets = [0, 39], sizes = [16, 1], strides = [1, 1]} : vector<16x49xf32> to vector<16x1xf32>
    %189 = vector.broadcast %188 : vector<16x1xf32> to vector<16x256xf32>
    %190 = arith.mulf %187, %189 : vector<16x256xf32>
    %191 = arith.addf %181, %190 : vector<16x256xf32>
    %c0_53 = arith.constant 0 : index
    %c177 = arith.constant 177 : index
    %192 = vector.load %arg8[%c0_53, %c177] : memref<16x512xf32, #tpu.memory_space<vmem>>, vector<16x256xf32>
    %193 = vector.extract_strided_slice %7 {offsets = [0, 46], sizes = [16, 1], strides = [1, 1]} : vector<16x49xf32> to vector<16x1xf32>
    %194 = vector.broadcast %193 : vector<16x1xf32> to vector<16x256xf32>
    %195 = arith.mulf %192, %194 : vector<16x256xf32>
    %196 = arith.addf %186, %195 : vector<16x256xf32>
    %197 = arith.addf %196, %191 : vector<16x256xf32>
    %c4 = arith.constant 4 : index
    %c0_54 = arith.constant 0 : index
    %198 = vector.load %arg6[%c4, %c0_54] : memref<7x256xf32, #tpu.memory_space<vmem>>, vector<1x256xf32>
    %199 = vector.broadcast %198 : vector<1x256xf32> to vector<16x256xf32>
    %200 = arith.mulf %197, %199 : vector<16x256xf32>
    %201 = arith.addf %49, %200 : vector<16x256xf32>
    %c0_55 = arith.constant 0 : index
    %c82 = arith.constant 82 : index
    %202 = vector.load %arg8[%c0_55, %c82] : memref<16x512xf32, #tpu.memory_space<vmem>>, vector<16x256xf32>
    %203 = vector.extract_strided_slice %7 {offsets = [0, 5], sizes = [16, 1], strides = [1, 1]} : vector<16x49xf32> to vector<16x1xf32>
    %204 = vector.broadcast %203 : vector<16x1xf32> to vector<16x256xf32>
    %205 = arith.mulf %202, %204 : vector<16x256xf32>
    %c0_56 = arith.constant 0 : index
    %c98 = arith.constant 98 : index
    %206 = vector.load %arg8[%c0_56, %c98] : memref<16x512xf32, #tpu.memory_space<vmem>>, vector<16x256xf32>
    %207 = vector.extract_strided_slice %7 {offsets = [0, 12], sizes = [16, 1], strides = [1, 1]} : vector<16x49xf32> to vector<16x1xf32>
    %208 = vector.broadcast %207 : vector<16x1xf32> to vector<16x256xf32>
    %209 = arith.mulf %206, %208 : vector<16x256xf32>
    %c0_57 = arith.constant 0 : index
    %c114 = arith.constant 114 : index
    %210 = vector.load %arg8[%c0_57, %c114] : memref<16x512xf32, #tpu.memory_space<vmem>>, vector<16x256xf32>
    %211 = vector.extract_strided_slice %7 {offsets = [0, 19], sizes = [16, 1], strides = [1, 1]} : vector<16x49xf32> to vector<16x1xf32>
    %212 = vector.broadcast %211 : vector<16x1xf32> to vector<16x256xf32>
    %213 = arith.mulf %210, %212 : vector<16x256xf32>
    %214 = arith.addf %205, %213 : vector<16x256xf32>
    %c0_58 = arith.constant 0 : index
    %c130 = arith.constant 130 : index
    %215 = vector.load %arg8[%c0_58, %c130] : memref<16x512xf32, #tpu.memory_space<vmem>>, vector<16x256xf32>
    %216 = vector.extract_strided_slice %7 {offsets = [0, 26], sizes = [16, 1], strides = [1, 1]} : vector<16x49xf32> to vector<16x1xf32>
    %217 = vector.broadcast %216 : vector<16x1xf32> to vector<16x256xf32>
    %218 = arith.mulf %215, %217 : vector<16x256xf32>
    %219 = arith.addf %209, %218 : vector<16x256xf32>
    %c0_59 = arith.constant 0 : index
    %c146 = arith.constant 146 : index
    %220 = vector.load %arg8[%c0_59, %c146] : memref<16x512xf32, #tpu.memory_space<vmem>>, vector<16x256xf32>
    %221 = vector.extract_strided_slice %7 {offsets = [0, 33], sizes = [16, 1], strides = [1, 1]} : vector<16x49xf32> to vector<16x1xf32>
    %222 = vector.broadcast %221 : vector<16x1xf32> to vector<16x256xf32>
    %223 = arith.mulf %220, %222 : vector<16x256xf32>
    %224 = arith.addf %214, %223 : vector<16x256xf32>
    %c0_60 = arith.constant 0 : index
    %c162 = arith.constant 162 : index
    %225 = vector.load %arg8[%c0_60, %c162] : memref<16x512xf32, #tpu.memory_space<vmem>>, vector<16x256xf32>
    %226 = vector.extract_strided_slice %7 {offsets = [0, 40], sizes = [16, 1], strides = [1, 1]} : vector<16x49xf32> to vector<16x1xf32>
    %227 = vector.broadcast %226 : vector<16x1xf32> to vector<16x256xf32>
    %228 = arith.mulf %225, %227 : vector<16x256xf32>
    %229 = arith.addf %219, %228 : vector<16x256xf32>
    %c0_61 = arith.constant 0 : index
    %c178 = arith.constant 178 : index
    %230 = vector.load %arg8[%c0_61, %c178] : memref<16x512xf32, #tpu.memory_space<vmem>>, vector<16x256xf32>
    %231 = vector.extract_strided_slice %7 {offsets = [0, 47], sizes = [16, 1], strides = [1, 1]} : vector<16x49xf32> to vector<16x1xf32>
    %232 = vector.broadcast %231 : vector<16x1xf32> to vector<16x256xf32>
    %233 = arith.mulf %230, %232 : vector<16x256xf32>
    %234 = arith.addf %224, %233 : vector<16x256xf32>
    %235 = arith.addf %234, %229 : vector<16x256xf32>
    %c5 = arith.constant 5 : index
    %c0_62 = arith.constant 0 : index
    %236 = vector.load %arg6[%c5, %c0_62] : memref<7x256xf32, #tpu.memory_space<vmem>>, vector<1x256xf32>
    %237 = vector.broadcast %236 : vector<1x256xf32> to vector<16x256xf32>
    %238 = arith.mulf %235, %237 : vector<16x256xf32>
    %239 = arith.addf %87, %238 : vector<16x256xf32>
    %c0_63 = arith.constant 0 : index
    %c83 = arith.constant 83 : index
    %240 = vector.load %arg8[%c0_63, %c83] : memref<16x512xf32, #tpu.memory_space<vmem>>, vector<16x256xf32>
    %241 = vector.extract_strided_slice %7 {offsets = [0, 6], sizes = [16, 1], strides = [1, 1]} : vector<16x49xf32> to vector<16x1xf32>
    %242 = vector.broadcast %241 : vector<16x1xf32> to vector<16x256xf32>
    %243 = arith.mulf %240, %242 : vector<16x256xf32>
    %c0_64 = arith.constant 0 : index
    %c99 = arith.constant 99 : index
    %244 = vector.load %arg8[%c0_64, %c99] : memref<16x512xf32, #tpu.memory_space<vmem>>, vector<16x256xf32>
    %245 = vector.extract_strided_slice %7 {offsets = [0, 13], sizes = [16, 1], strides = [1, 1]} : vector<16x49xf32> to vector<16x1xf32>
    %246 = vector.broadcast %245 : vector<16x1xf32> to vector<16x256xf32>
    %247 = arith.mulf %244, %246 : vector<16x256xf32>
    %c0_65 = arith.constant 0 : index
    %c115 = arith.constant 115 : index
    %248 = vector.load %arg8[%c0_65, %c115] : memref<16x512xf32, #tpu.memory_space<vmem>>, vector<16x256xf32>
    %249 = vector.extract_strided_slice %7 {offsets = [0, 20], sizes = [16, 1], strides = [1, 1]} : vector<16x49xf32> to vector<16x1xf32>
    %250 = vector.broadcast %249 : vector<16x1xf32> to vector<16x256xf32>
    %251 = arith.mulf %248, %250 : vector<16x256xf32>
    %252 = arith.addf %243, %251 : vector<16x256xf32>
    %c0_66 = arith.constant 0 : index
    %c131 = arith.constant 131 : index
    %253 = vector.load %arg8[%c0_66, %c131] : memref<16x512xf32, #tpu.memory_space<vmem>>, vector<16x256xf32>
    %254 = vector.extract_strided_slice %7 {offsets = [0, 27], sizes = [16, 1], strides = [1, 1]} : vector<16x49xf32> to vector<16x1xf32>
    %255 = vector.broadcast %254 : vector<16x1xf32> to vector<16x256xf32>
    %256 = arith.mulf %253, %255 : vector<16x256xf32>
    %257 = arith.addf %247, %256 : vector<16x256xf32>
    %c0_67 = arith.constant 0 : index
    %c147 = arith.constant 147 : index
    %258 = vector.load %arg8[%c0_67, %c147] : memref<16x512xf32, #tpu.memory_space<vmem>>, vector<16x256xf32>
    %259 = vector.extract_strided_slice %7 {offsets = [0, 34], sizes = [16, 1], strides = [1, 1]} : vector<16x49xf32> to vector<16x1xf32>
    %260 = vector.broadcast %259 : vector<16x1xf32> to vector<16x256xf32>
    %261 = arith.mulf %258, %260 : vector<16x256xf32>
    %262 = arith.addf %252, %261 : vector<16x256xf32>
    %c0_68 = arith.constant 0 : index
    %c163 = arith.constant 163 : index
    %263 = vector.load %arg8[%c0_68, %c163] : memref<16x512xf32, #tpu.memory_space<vmem>>, vector<16x256xf32>
    %264 = vector.extract_strided_slice %7 {offsets = [0, 41], sizes = [16, 1], strides = [1, 1]} : vector<16x49xf32> to vector<16x1xf32>
    %265 = vector.broadcast %264 : vector<16x1xf32> to vector<16x256xf32>
    %266 = arith.mulf %263, %265 : vector<16x256xf32>
    %267 = arith.addf %257, %266 : vector<16x256xf32>
    %c0_69 = arith.constant 0 : index
    %c179 = arith.constant 179 : index
    %268 = vector.load %arg8[%c0_69, %c179] : memref<16x512xf32, #tpu.memory_space<vmem>>, vector<16x256xf32>
    %269 = vector.extract_strided_slice %7 {offsets = [0, 48], sizes = [16, 1], strides = [1, 1]} : vector<16x49xf32> to vector<16x1xf32>
    %270 = vector.broadcast %269 : vector<16x1xf32> to vector<16x256xf32>
    %271 = arith.mulf %268, %270 : vector<16x256xf32>
    %272 = arith.addf %262, %271 : vector<16x256xf32>
    %273 = arith.addf %272, %267 : vector<16x256xf32>
    %c6 = arith.constant 6 : index
    %c0_70 = arith.constant 0 : index
    %274 = vector.load %arg6[%c6, %c0_70] : memref<7x256xf32, #tpu.memory_space<vmem>>, vector<1x256xf32>
    %275 = vector.broadcast %274 : vector<1x256xf32> to vector<16x256xf32>
    %276 = arith.mulf %273, %275 : vector<16x256xf32>
    %277 = arith.addf %125, %276 : vector<16x256xf32>
    %278 = arith.addf %201, %239 : vector<16x256xf32>
    %279 = arith.addf %277, %163 : vector<16x256xf32>
    %280 = arith.addf %278, %279 : vector<16x256xf32>
    %c0_71 = arith.constant 0 : index
    %c0_72 = arith.constant 0 : index
    %281 = vector.load %arg3[%c0_71, %c0_72] : memref<16x1xf32, #tpu.memory_space<vmem>>, vector<16x1xf32>
    %282 = vector.broadcast %281 : vector<16x1xf32> to vector<16x256xf32>
    %283 = arith.addf %280, %282 : vector<16x256xf32>
    %cst_73 = arith.constant 0.000000e+00 : f32
    %284 = vector.broadcast %cst_73 : f32 to vector<16x256xf32>
    %285 = arith.maximumf %283, %284 : vector<16x256xf32>
    %286 = arith.truncf %285 : vector<16x256xf32> to vector<16x256xbf16>
    %c0_74 = arith.constant 0 : index
    %c0_75 = arith.constant 0 : index
    %287 = vector.load %arg4[%c0_74, %c0_75] : memref<16x8xbf16, #tpu.memory_space<vmem>>, vector<16x8xbf16>
    %c0_76 = arith.constant 0 : index
    %c0_77 = arith.constant 0 : index
    %288 = vector.load %arg5[%c0_76, %c0_77] : memref<16x1xf32, #tpu.memory_space<vmem>>, vector<16x1xf32>
    %289 = vector.extract_strided_slice %286 {offsets = [0, 0], sizes = [8, 256], strides = [1, 1]} : vector<16x256xbf16> to vector<8x256xbf16>
    %cst_78 = arith.constant dense<0.000000e+00> : vector<16x256xf32>
    %290 = tpu.matmul %287, %289, %cst_78 {dimension_numbers = #tpu.dot_dimension_numbers<[1], [0], [0], [1], [0, 0, 1, 1], [], []>} : vector<16x8xbf16>, vector<8x256xbf16>, vector<16x256xf32> -> vector<16x256xf32>
    %291 = vector.broadcast %288 : vector<16x1xf32> to vector<16x256xf32>
    %292 = arith.addf %290, %291 : vector<16x256xf32>
    %cst_79 = arith.constant 0.000000e+00 : f32
    %293 = vector.broadcast %cst_79 : f32 to vector<16x256xf32>
    %294 = arith.maximumf %292, %293 : vector<16x256xf32>
    %c0_80 = arith.constant 0 : index
    %c0_81 = arith.constant 0 : index
    %c0_82 = arith.constant 0 : index
    %295 = vector.load %arg7[%c0_80, %c0_81, %c0_82] : memref<2x16x256xf32, #tpu.memory_space<vmem>>, vector<1x16x256xf32>
    %296 = vector.shape_cast %295 : vector<1x16x256xf32> to vector<16x256xf32>
    %297 = vector.shape_cast %294 : vector<16x256xf32> to vector<1x16x256xf32>
    tpu.vector_store %arg7[%c0_80, %c0_81, %c0_82], %297 {strides = array<i32>} : memref<2x16x256xf32, #tpu.memory_space<vmem>>, vector<1x16x256xf32>,
    %298 = vector.extract_strided_slice %286 {offsets = [8, 0], sizes = [8, 256], strides = [1, 1]} : vector<16x256xbf16> to vector<8x256xbf16>
    %cst_83 = arith.constant dense<0.000000e+00> : vector<16x256xf32>
    %299 = tpu.matmul %287, %298, %cst_83 {dimension_numbers = #tpu.dot_dimension_numbers<[1], [0], [0], [1], [0, 0, 1, 1], [], []>} : vector<16x8xbf16>, vector<8x256xbf16>, vector<16x256xf32> -> vector<16x256xf32>
    %300 = vector.broadcast %288 : vector<16x1xf32> to vector<16x256xf32>
    %301 = arith.addf %299, %300 : vector<16x256xf32>
    %cst_84 = arith.constant 0.000000e+00 : f32
    %302 = vector.broadcast %cst_84 : f32 to vector<16x256xf32>
    %303 = arith.maximumf %301, %302 : vector<16x256xf32>
    %c1_85 = arith.constant 1 : index
    %c0_86 = arith.constant 0 : index
    %c0_87 = arith.constant 0 : index
    %304 = vector.load %arg7[%c1_85, %c0_86, %c0_87] : memref<2x16x256xf32, #tpu.memory_space<vmem>>, vector<1x16x256xf32>
    %305 = vector.shape_cast %304 : vector<1x16x256xf32> to vector<16x256xf32>
    %306 = vector.shape_cast %303 : vector<16x256xf32> to vector<1x16x256xf32>
    tpu.vector_store %arg7[%c1_85, %c0_86, %c0_87], %306 {strides = array<i32>} : memref<2x16x256xf32, #tpu.memory_space<vmem>>, vector<1x16x256xf32>,
    return
  }
  func.func @transform_0(%arg0: i32) -> (i32, i32, i32) {
    %c0_i32 = arith.constant 0 : i32
    %c0_i32_0 = arith.constant 0 : i32
    %c0_i32_1 = arith.constant 0 : i32
    return %arg0, %c0_i32, %c0_i32_0 : i32, i32, i32
  }
  func.func @transform_1(%arg0: i32) -> (i32, i32) {
    %c0_i32 = arith.constant 0 : i32
    %c0_i32_0 = arith.constant 0 : i32
    %c0_i32_1 = arith.constant 0 : i32
    return %c0_i32, %c0_i32_0 : i32, i32
  }
  func.func @transform_2(%arg0: i32) -> (i32, i32) {
    %c0_i32 = arith.constant 0 : i32
    %c0_i32_0 = arith.constant 0 : i32
    %c0_i32_1 = arith.constant 0 : i32
    return %c0_i32, %c0_i32_0 : i32, i32
  }
  func.func @transform_3(%arg0: i32) -> (i32, i32) {
    %c0_i32 = arith.constant 0 : i32
    %c0_i32_0 = arith.constant 0 : i32
    %c0_i32_1 = arith.constant 0 : i32
    return %c0_i32, %c0_i32_0 : i32, i32
  }
  func.func @transform_4(%arg0: i32) -> (i32, i32) {
    %c0_i32 = arith.constant 0 : i32
    %c0_i32_0 = arith.constant 0 : i32
    %c0_i32_1 = arith.constant 0 : i32
    return %c0_i32, %c0_i32_0 : i32, i32
  }
  func.func @transform_5(%arg0: i32) -> (i32, i32) {
    %c0_i32 = arith.constant 0 : i32
    %c0_i32_0 = arith.constant 0 : i32
    %c0_i32_1 = arith.constant 0 : i32
    return %c0_i32, %c0_i32_0 : i32, i32
  }
  func.func @transform_6(%arg0: i32) -> (i32, i32, i32) {
    %c0_i32 = arith.constant 0 : i32
    %c0_i32_0 = arith.constant 0 : i32
    %c0_i32_1 = arith.constant 0 : i32
    return %arg0, %c0_i32, %c0_i32_0 : i32, i32, i32
  }
}

</mosaic_0001>

<bundles_post_ra>
// kernel: tpu_custom_call.1
= control target key start
LH: loop header
LB: loop body
LE: loop exit
PB: predicated region body
PF: predicated region fallthrough
CT: control target
= control target key end

     0   :  { %11 = vsyncpa [#allocation4], 0  ;;  %s4947_s0 = inlined_call_operand.vmem [shape: f32[2,8,256], index: 0, kind: input, shape index: {}]   ;;  %s4948_s1 = inlined_call_operand.hbm [shape: f32[16,49], index: 1, kind: input, shape index: {}]   ;;  %s4949_s2 = inlined_call_operand.vmem [shape: f32[16,1], index: 2, kind: input, shape index: {}]   ;;  %s4950_s3 = inlined_call_operand.vmem [shape: bf16[16,8], index: 3, kind: input, shape index: {}]   ;;  %s4951_s4 = inlined_call_operand.vmem [shape: f32[16,1], index: 4, kind: input, shape index: {}]   ;;  %s4952_s5 = inlined_call_operand.hbm [shape: f32[7,256], index: 5, kind: input, shape index: {}]   ;;  %s4953_s6 = inlined_call_operand.hbm [shape: f32[2,16,256], index: 6, kind: output, shape index: {}]  }
   0x1   :  { %12 = vsyncpa [#allocation7], 0 }
   0x2   :  { %13 = vsyncpa [#allocation5], 0  ;;  %s20_s23 = sshll.u32 %s4948_s1, 4  ;;  %s3021_s24 = smov [#allocation3]   ;;  %s21_s23 = int_to_ptr.hbm [resolvable:$true] %s20_s23 }
   0x3   :  { %s22_s25 = sshll.u32 %s3021_s24, 4  ;;  %s40_s28 = sshll.u32 %s4952_s5, 4  ;;  %s23_s25 = int_to_ptr.vmem [resolvable:$true] %s22_s25  ;;  %s41_s28 = int_to_ptr.hbm [resolvable:$true] %s40_s28 }
   0x4   :  { %s3022_s29 = smov 128   ;;  %s3023_s30 = smov 8  }
   0x5   :  { %28 = dma.hbm_to_vmem [thread:$0]  %s21_s23, 256, %s23_s25, [#allocation4], %s3022_s29, %s3022_s29, %s3023_s30  }
   0x6   :  { %s3024_s7 = smov [#allocation6]  }
   0x7   :  { %s42_s8 = sshll.u32 %s3024_s7, 4  ;;  %s43_s8 = int_to_ptr.vmem [resolvable:$true] %s42_s8 }
   0x8   :  { %45 = dma.hbm_to_vmem [thread:$0]  %s41_s28, 256, %s43_s8, [#allocation7]  }
   0x9   :  { %3015 = dma.done.wait [#allocation4], 256  }
   0xa   :  { %3016 = vsyncadd [#allocation4], 4294967040 }
   0xb   :  { %3017 = dma.done.wait [#allocation7], 256  }
   0xc   :  { %3018 = vsyncadd [#allocation7], 4294967040  ;;  %v3025_v0 = vmov 21   ;;  %v3026_v1 = vmov 14   ;;  %v3027_v2 = vmov 7   ;;  %v3133_v3 = vld [vmem:[#allocation3] sm:$0xff] }
   0xd   :  { %2833 = vset.pattern.permute.xlu0 %v3025_v0  ;;  %2832 = vset.pattern.permute.xlu2 %v3026_v1  ;;  %v3138_v4 = vld [vmem:[#allocation3 + $0x8] sm:$0xff]  ;;  %v3028_v5 = vmov 28   ;;  %v3029_v6 = vmov 35   ;;  %v3030_v7 = vmov 42   ;;  %s3031_s1 = smov 77   ;;  %v3156_v10 = vld [vmem:[%s4947_s0] sm:$0xff] }
   0xe   :  { %2831 = vset.pattern.permute.xlu1 %v3027_v2  ;;  %155 = vperm.xlu0 %2833, %v3133_v3   ;;  %v3149_v8 = vld [vmem:[#allocation6] ss:$8 sm:$0x3]  ;;  %v3161_v11 = vld [vmem:[%s4947_s0 + $0x8] sm:$0xff]  ;;  %s3032_s12 = smov 96   ;;  %s3033_s17 = smov 64  }
   0xf   :  { %106 = vperm.xlu2 %2832, %v3133_v3   ;;  %92 = vperm.xlu1 %2831, %v3133_v3   ;;  %v391_v9 = vperm.slane %v3149_v8, 0  ;;  %v3171_v16 = vld [vmem:[%s4947_s0 + $0x10] sm:$0xff]  ;;  %v3176_v17 = vld [vmem:[%s4947_s0 + $0x18] sm:$0xff]  ;;  %v3034_v46 = vmov 8   ;;  %s3035_s18 = smov 32   ;;  %v3036_v54 = vmov 1  }
  0x10   :  { %v392_v56 = vperm.slane %v3149_v8, 1  ;;  %v3037_v62 = vmov 15   ;;  %vm137_vm0 = vcmask 785408   ;;  %vm240_vm1 = vcmask 523264   ;;  %s3042_s19 = smov 112   ;;  %s3045_s20 = smov 78  }
  0x11   :  { %s3053_s21 = smov 79   ;;  %s3061_s30 = smov 80   ;;  %vm337_vm2 = vcmask 261120   ;;  %vm372_vm3 = vcmask 916480   ;;  %vm1699_vm4 = vcmask 662528   ;;  %vm397_vm5 = vcmask 629760  }
  0x12   :  { %s3067_s7 = smov 81   ;;  %s3070_s8 = smov 124   ;;  %vm1728_vm6 = vcmask 1014784   ;;  %vm2056_vm7 = vcmask 670720   ;;  %vm2412_vm8 = vcmask 678912   ;;  %vm1371_vm9 = vcmask 654336  }
  0x13   :  { %s3084_s16 = smov 82   ;;  %vm725_vm10 = vcmask 637952   ;;  %vm1053_vm11 = vcmask 646144   ;;  %vm2475_vm12 = vcmask 1039360   ;;  %vm2544_vm13 = vcmask 1031168   ;;  %s2737_s13 = sshll.u32 %s4953_s6, 4  ;;  %s2738_s13 = int_to_ptr.hbm [resolvable:$true] %s2737_s13 }
  0x14   :  { %vm2622_vm14 = vcmask 416768   ;;  %vm2629_vm15 = vcmask 1043456   ;;  %s3090_s14 = smov 256   ;;  %s3091_s15 = smov 16  }
  0x16   :  { %2835 = vset.pattern.permute.xlu0 %v3028_v5 }
  0x17   :  { %110 = vperm.xlu2 %2832, %v3138_v4   ;;  %96 = vperm.xlu1 %2831, %v3138_v4  }
  0x18   :  { %209 = vperm.xlu0 %2835, %v3133_v3  }
  0x1f   :  { %2834 = vset.pattern.permute.xlu1 %v3025_v0  ;;  %2841 = vset.pattern.permute.xlu2 %v3036_v54 }
  0x20   :  { %2837 = vset.pattern.permute.xlu0 %v3029_v6  ;;  %159 = vperm.xlu1 %2834, %v3138_v4  }
  0x21   :  { %258 = vperm.xlu0 %2837, %v3133_v3  }
  0x28   :  { %2836 = vset.pattern.permute.xlu1 %v3028_v5 }
  0x29   :  { %2839 = vset.pattern.permute.xlu0 %v3030_v7  ;;  %213 = vperm.xlu1 %2836, %v3138_v4  }
  0x2a   :  { %306 = vperm.xlu0 %2839, %v3133_v3  }
  0x31   :  { %2838 = vset.pattern.permute.xlu1 %v3029_v6 }
  0x32   :  { %262 = vperm.xlu1 %2838, %v3138_v4   ;;  %393 = vrot.lane.b32.xlu0 %v391_v9, %s3031_s1 }
  0x33   :  { %2842 = vset.pattern.permute.xlu0 %v3036_v54 }
  0x3a   :  { %2840 = vset.pattern.permute.xlu1 %v3030_v7 }
  0x3b   :  { %310 = vperm.xlu1 %2840, %v3138_v4  }
  0x43   :  { %2843 = vset.pattern.permute.xlu1 %v3034_v46 }
  0x69   :  { %v107_v12 = vpop.permute.xlu2 %106 }
  0x6a   :  { %v114_v13 = vmul.f32 %v107_v12, %v3156_v10  ;;  %v113_v14 = vmul.f32 0.0, %v107_v12  ;;  %v115_v15 = vmul.f32 %v107_v12, %v3161_v11 }
  0x6c   :  { %127 = vrot.lane.b32.xlu1 %v114_v13, %s3032_s12  ;;  %125 = vrot.lane.b32.xlu0 %v113_v14, %s3032_s12 }
  0x6d   :  { %129 = vrot.lane.b32.xlu2 %v115_v15, %s3032_s12 }
  0x71   :  { %v111_v18 = vpop.permute.xlu2 %110 }
  0x72   :  { %v117_v19 = vmul.f32 %v111_v18, %v3171_v16  ;;  %v116_v20 = vmul.f32 0.0, %v111_v18  ;;  %v118_v21 = vmul.f32 %v111_v18, %v3176_v17 }
  0x74   :  { %133 = vrot.lane.b32.xlu1 %v117_v19, %s3032_s12  ;;  %131 = vrot.lane.b32.xlu0 %v116_v20, %s3032_s12 }
  0x75   :  { %135 = vrot.lane.b32.xlu2 %v118_v21, %s3032_s12 }
  0x80   :  { %v156_v22 = vpop.permute.xlu0 %155 }
  0x81   :  { %v3183_v23 = vpop.permute.xlu1 %92  ;;  %v162_v24 = vmul.f32 0.0, %v156_v22  ;;  %v163_v25 = vmul.f32 %v156_v22, %v3156_v10  ;;  %v164_v26 = vmul.f32 %v156_v22, %v3161_v11 }
  0x83   :  { %174 = vrot.lane.b32.xlu2 %v162_v24, %s3032_s12  ;;  %176 = vrot.lane.b32.xlu1 %v163_v25, %s3032_s12 }
  0x89   :  { %v3189_v27 = vpop.permute.xlu1 %96 }
  0x8a   :  { %v210_v32 = vpop.permute.xlu0 %209 }
  0x8b   :  { %178 = vrot.lane.b32.xlu2 %v164_v26, %s3032_s12  ;;  %v216_v33 = vmul.f32 %v210_v32, %v3156_v10  ;;  %v217_v34 = vmul.f32 %v210_v32, %v3161_v11  ;;  %v218_v38 = vmul.f32 0.0, %v210_v32 }
  0x92   :  { %v160_v28 = vpop.permute.xlu1 %159 }
  0x93   :  { %v165_v29 = vmul.f32 0.0, %v160_v28  ;;  %v167_v30 = vmul.f32 %v160_v28, %v3176_v17  ;;  %v166_v31 = vmul.f32 %v160_v28, %v3171_v16  ;;  %v259_v41 = vpop.permute.xlu0 %258  ;;  %v3038_v28 = vmov 22  }
  0x94   :  { %v266_v42 = vmul.f32 %v259_v41, %v3161_v11  ;;  %v265_v48 = vmul.f32 %v259_v41, %v3156_v10  ;;  %v267_v51 = vmul.f32 0.0, %v259_v41 }
  0x95   :  { %180 = vrot.lane.b32.xlu0 %v165_v29, %s3032_s12  ;;  %184 = vrot.lane.b32.xlu2 %v167_v30, %s3032_s12 }
  0x96   :  { %182 = vrot.lane.b32.xlu1 %v166_v31, %s3032_s12 }
  0x9b   :  { %v214_v35 = vpop.permute.xlu1 %213 }
  0x9c   :  { %v219_v36 = vmul.f32 %v214_v35, %v3171_v16  ;;  %v220_v37 = vmul.f32 %v214_v35, %v3176_v17  ;;  %v221_v43 = vmul.f32 0.0, %v214_v35  ;;  %v307_v49 = vpop.permute.xlu0 %306 }
  0x9d   :  { %228 = vrot.lane.b32.xlu2 %v216_v33, %s3033_s17  ;;  %v314_v50 = vmul.f32 %v307_v49, %v3161_v11  ;;  %v313_v57 = vmul.f32 %v307_v49, %v3156_v10  ;;  %v315_v58 = vmul.f32 0.0, %v307_v49 }
  0x9e   :  { %230 = vrot.lane.b32.xlu1 %v217_v34, %s3033_s17  ;;  %234 = vrot.lane.b32.xlu0 %v219_v36, %s3033_s17 }
  0xa4   :  { %v263_v39 = vpop.permute.xlu1 %262  ;;  %v3303_v41 = vpop.permute.xlu0 %393 }
  0xa5   :  { %232 = vrot.lane.b32.xlu2 %v218_v38, %s3033_s17  ;;  %v268_v40 = vmul.f32 %v263_v39, %v3171_v16  ;;  %v269_v47 = vmul.f32 %v263_v39, %v3176_v17  ;;  %v270_v53 = vmul.f32 0.0, %v263_v39 }
  0xa6   :  { %236 = vrot.lane.b32.xlu1 %v220_v37, %s3033_s17 }
  0xa7   :  { %283 = vrot.lane.b32.xlu0 %v268_v40, %s3033_s17 }
  0xad   :  { %238 = vrot.lane.b32.xlu2 %v221_v43, %s3033_s17  ;;  %v311_v44 = vpop.permute.xlu1 %310 }
  0xae   :  { %279 = vrot.lane.b32.xlu1 %v266_v42, %s3033_s17  ;;  %v316_v45 = vmul.f32 %v311_v44, %v3171_v16  ;;  %v317_v52 = vmul.f32 %v311_v44, %v3176_v17  ;;  %v318_v60 = vmul.f32 0.0, %v311_v44 }
  0xb0   :  { %331 = vrot.lane.b32.xlu0 %v316_v45, %s3035_s18 }
  0xb5   :  { %277 = vrot.lane.b32.xlu2 %v265_v48, %s3033_s17  ;;  %v3039_v48 = vmov 29  }
  0xb6   :  { %285 = vrot.lane.b32.xlu1 %v269_v47, %s3033_s17 }
  0xb8   :  { %419 = vperm.xlu0 %2842, %v3138_v4  }
  0xbd   :  { %281 = vrot.lane.b32.xlu2 %v267_v51, %s3033_s17 }
  0xbe   :  { %327 = vrot.lane.b32.xlu1 %v314_v50, %s3035_s18 }
  0xc0   :  { %2847 = vset.pattern.permute.xlu0 %v3038_v28 }
  0xc5   :  { %287 = vrot.lane.b32.xlu2 %v270_v53, %s3033_s17 }
  0xc6   :  { %333 = vrot.lane.b32.xlu1 %v317_v52, %s3035_s18 }
  0xc7   :  { %v3224_v55 = vpop.permute.xlu2 %129 }
  0xcd   :  { %325 = vrot.lane.b32.xlu2 %v313_v57, %s3035_s18 }
  0xce   :  { %395 = vrot.lane.b32.xlu1 %v392_v56, %s3031_s1 }
  0xcf   :  { %v3230_v59 = vpop.permute.xlu2 %135 }
  0xd0   :  { %5019 = vst [vmem:[#allocation12_spill] sm:$0xff] %v3230_v59 }
  0xd5   :  { %329 = vrot.lane.b32.xlu2 %v315_v58, %s3035_s18 }
  0xd6   :  { %429 = vperm.xlu1 %2843, %v3133_v3  }
  0xdd   :  { %335 = vrot.lane.b32.xlu2 %v318_v60, %s3035_s18  ;;  %v3235_v61 = vpop.permute.xlu2 %174 }
  0xde   :  { %2845 = vset.pattern.permute.xlu1 %v3037_v62  ;;  %v3241_v0 = vpop.permute.xlu1 %127  ;;  %v3305_v42 = vpop.permute.xlu0 %125 }
  0xdf   :  { %443 = vperm.xlu1 %2845, %v3133_v3  }
  0xe5   :  { %v3238_v63 = vpop.permute.xlu2 %178  ;;  %415 = vperm.xlu2 %2841, %v3133_v3  }
  0xe6   :  { %v3249_v5 = vpop.permute.xlu1 %133  ;;  %v3307_v43 = vpop.permute.xlu0 %131 }
  0xe7   :  { %5020 = vst [vmem:[#allocation13_spill] sm:$0xff] %v3249_v5  ;;  %2848 = vset.pattern.permute.xlu1 %v3038_v28 }
  0xe8   :  { %5028 = vst [vmem:[#allocation21_spill] sm:$0xff] %v3307_v43 }
  0xed   :  { %2844 = vset.pattern.permute.xlu2 %v3034_v46 }
  0xee   :  { %433 = vperm.xlu2 %2844, %v3138_v4  }
  0xef   :  { %v3244_v1 = vpop.permute.xlu2 %184 }
  0xf5   :  { %v3253_v7 = vpop.permute.xlu1 %176 }
  0xf6   :  { %2846 = vset.pattern.permute.xlu2 %v3037_v62 }
  0xf7   :  { %v3246_v2 = vpop.permute.xlu2 %228  ;;  %447 = vperm.xlu2 %2846, %v3138_v4  }
  0xff   :  { %v3251_v6 = vpop.permute.xlu2 %232 }
 0x100   :  { %5021 = vst [vmem:[#allocation14_spill] sm:$0xff] %v3251_v6 }
 0x107   :  { %v3255_v8 = vpop.permute.xlu2 %238  ;;  %v3309_v44 = vpop.permute.xlu0 %180 }
 0x108   :  { %5022 = vst [vmem:[#allocation15_spill] sm:$0xff] %v3255_v8  ;;  %v3257_v9 = vpop.permute.xlu1 %182 }
 0x10f   :  { %v3259_v12 = vpop.permute.xlu2 %277 }
 0x110   :  { %v3261_v13 = vpop.permute.xlu1 %230  ;;  %v3311_v45 = vpop.permute.xlu0 %234 }
 0x111   :  { %5029 = vst [vmem:[#allocation22_spill] sm:$0xff] %v3311_v45 }
 0x117   :  { %v3263_v14 = vpop.permute.xlu2 %281 }
 0x118   :  { %v3265_v15 = vpop.permute.xlu1 %236 }
 0x119   :  { %5023 = vst [vmem:[#allocation16_spill] sm:$0xff] %v3265_v15  ;;  %v3313_v46 = vpop.permute.xlu0 %283 }
 0x11f   :  { %v3267_v18 = vpop.permute.xlu2 %287 }
 0x120   :  { %v3269_v19 = vpop.permute.xlu1 %279 }
 0x122   :  { %v3315_v47 = vpop.permute.xlu0 %331 }
 0x123   :  { %5030 = vst [vmem:[#allocation23_spill] sm:$0xff] %v3315_v47 }
 0x127   :  { %v3271_v20 = vpop.permute.xlu2 %325 }
 0x128   :  { %v3273_v21 = vpop.permute.xlu1 %285 }
 0x12a   :  { %v3317_v49 = vpop.permute.xlu0 %419 }
 0x12b   :  { %5031 = vst [vmem:[#allocation24_spill] sm:$0xff] %v3317_v49 }
 0x12f   :  { %v3275_v22 = vpop.permute.xlu2 %329 }
 0x130   :  { %5024 = vst [vmem:[#allocation17_spill] sm:$0xff] %v3275_v22  ;;  %v3277_v24 = vpop.permute.xlu1 %327 }
 0x137   :  { %v3281_v26 = vpop.permute.xlu2 %335 }
 0x138   :  { %v3279_v25 = vpop.permute.xlu1 %333  ;;  %5026 = vst [vmem:[#allocation19_spill] sm:$0xff] %v3281_v26 }
 0x139   :  { %5025 = vst [vmem:[#allocation18_spill] sm:$0xff] %v3279_v25 }
 0x13f   :  { %v3285_v30 = vpop.permute.xlu2 %415 }
 0x140   :  { %v3283_v29 = vpop.permute.xlu1 %395  ;;  %5027 = vst [vmem:[#allocation20_spill] sm:$0xff] %v3285_v30 }
 0x148   :  { %v3287_v31 = vpop.permute.xlu1 %429  ;;  %v3289_v32 = vpop.permute.xlu2 %433 }
 0x151   :  { %v444_v33 = vpop.permute.xlu1 %443  ;;  %v448_v37 = vpop.permute.xlu2 %447 }
 0x152   :  { %v452_v34 = vmul.f32 %v444_v33, %v3161_v11  ;;  %v451_v35 = vmul.f32 %v444_v33, %v3156_v10  ;;  %v450_v36 = vmul.f32 0.0, %v444_v33  ;;  %v455_v38 = vmul.f32 %v448_v37, %v3176_v17 }
 0x153   :  { %v454_v39 = vmul.f32 %v448_v37, %v3171_v16  ;;  %v453_v40 = vmul.f32 0.0, %v448_v37 }
 0x154   :  { %466 = vrot.lane.b32.xlu2 %v452_v34, %s3032_s12  ;;  %464 = vrot.lane.b32.xlu1 %v451_v35, %s3032_s12  ;;  %v3040_v34 = vmov 36  }
 0x155   :  { %462 = vrot.lane.b32.xlu0 %v450_v36, %s3032_s12 }
 0x15c   :  { %472 = vrot.lane.b32.xlu2 %v455_v38, %s3032_s12  ;;  %470 = vrot.lane.b32.xlu1 %v454_v39, %s3032_s12 }
 0x15d   :  { %468 = vrot.lane.b32.xlu0 %v453_v40, %s3032_s12 }
 0x164   :  { %495 = vperm.xlu1 %2848, %v3138_v4  }
 0x165   :  { %491 = vperm.xlu0 %2847, %v3133_v3  }
 0x16c   :  { %2850 = vset.pattern.permute.xlu1 %v3039_v48 }
 0x16d   :  { %2849 = vset.pattern.permute.xlu0 %v3039_v48 }
 0x1c6   :  { %v3319_v50 = vpop.permute.xlu1 %464 }
 0x1c7   :  { %5032 = vst [vmem:[#allocation25_spill] sm:$0xff] %v3319_v50  ;;  %v3321_v51 = vpop.permute.xlu0 %462 }
 0x1c8   :  { %5033 = vst [vmem:[#allocation26_spill] sm:$0xff] %v3321_v51 }
 0x1ce   :  { %v3323_v52 = vpop.permute.xlu1 %470 }
 0x1cf   :  { %5034 = vst [vmem:[#allocation27_spill] sm:$0xff] %v3323_v52  ;;  %v3325_v53 = vpop.permute.xlu0 %468 }
 0x1d0   :  { %5035 = vst [vmem:[#allocation28_spill] sm:$0xff] %v3325_v53 }
 0x1d6   :  { %v496_v54 = vpop.permute.xlu1 %495 }
 0x1d7   :  { %v492_v56 = vpop.permute.xlu0 %491  ;;  %v501_v57 = vmul.f32 0.0, %v496_v54  ;;  %v502_v62 = vmul.f32 %v496_v54, %v3171_v16  ;;  %v503_v33 = vmul.f32 %v496_v54, %v3176_v17 }
 0x1d8   :  { %v499_v58 = vmul.f32 %v492_v56, %v3156_v10  ;;  %v498_v60 = vmul.f32 0.0, %v492_v56  ;;  %v500_v28 = vmul.f32 %v492_v56, %v3161_v11 }
 0x1d9   :  { %516 = vrot.lane.b32.xlu0 %v501_v57, %s3032_s12 }
 0x1da   :  { %512 = vrot.lane.b32.xlu1 %v499_v58, %s3032_s12  ;;  %510 = vrot.lane.b32.xlu2 %v498_v60, %s3032_s12 }
 0x1e1   :  { %539 = vperm.xlu0 %2849, %v3133_v3  }
 0x1e2   :  { %518 = vrot.lane.b32.xlu1 %v502_v62, %s3032_s12  ;;  %514 = vrot.lane.b32.xlu2 %v500_v28, %s3032_s12  ;;  %v3041_v62 = vmov 43  }
 0x1e9   :  { %2851 = vset.pattern.permute.xlu0 %v3040_v34 }
 0x1ea   :  { %543 = vperm.xlu1 %2850, %v3138_v4   ;;  %520 = vrot.lane.b32.xlu2 %v503_v33, %s3032_s12 }
 0x1f2   :  { %2852 = vset.pattern.permute.xlu1 %v3040_v34 }
 0x24b   :  { %v3339_v35 = vpop.permute.xlu0 %516 }
 0x24c   :  { %v3341_v36 = vpop.permute.xlu1 %512 }
 0x253   :  { %v540_v37 = vpop.permute.xlu0 %539 }
 0x254   :  { %v3343_v38 = vpop.permute.xlu1 %518  ;;  %v547_v39 = vmul.f32 %v540_v37, %v3161_v11  ;;  %v546_v40 = vmul.f32 %v540_v37, %v3156_v10  ;;  %v548_v54 = vmul.f32 0.0, %v540_v37 }
 0x256   :  { %560 = vrot.lane.b32.xlu1 %v547_v39, %s3033_s17  ;;  %558 = vrot.lane.b32.xlu2 %v546_v40, %s3033_s17 }
 0x25c   :  { %v544_v48 = vpop.permute.xlu1 %543 }
 0x25d   :  { %v549_v56 = vmul.f32 %v544_v48, %v3171_v16  ;;  %v550_v57 = vmul.f32 %v544_v48, %v3176_v17  ;;  %v551_v58 = vmul.f32 0.0, %v544_v48 }
 0x25e   :  { %562 = vrot.lane.b32.xlu2 %v548_v54, %s3033_s17  ;;  %v186_v54 = vsel %vm137_vm0, %v3235_v61, %v3253_v7 }
 0x25f   :  { %564 = vrot.lane.b32.xlu0 %v549_v56, %s3033_s17  ;;  %566 = vrot.lane.b32.xlu1 %v550_v57, %s3033_s17  ;;  %v187_v56 = vsel %vm137_vm0, %v3253_v7, %v3238_v63  ;;  %v99_v57 = vmul.f32 0.0, %v3183_v23  ;;  %v188_v7 = vsel %vm137_vm0, %v3309_v44, %v3257_v9 }
 0x266   :  { %568 = vrot.lane.b32.xlu2 %v551_v58, %s3033_s17  ;;  %v100_v58 = vmul.f32 %v3183_v23, %v3156_v10 }
 0x267   :  { %587 = vperm.xlu0 %2851, %v3133_v3   ;;  %591 = vperm.xlu1 %2852, %v3138_v4  }
 0x26f   :  { %2853 = vset.pattern.permute.xlu0 %v3041_v62  ;;  %2854 = vset.pattern.permute.xlu1 %v3041_v62  ;;  %v289_v62 = vsel %vm240_vm1, %v3259_v12, %v3269_v19 }
 0x2c8   :  { %v3357_v60 = vpop.permute.xlu1 %560 }
 0x2c9   :  { %5036 = vst [vmem:[#allocation29_spill] sm:$0xff] %v3357_v60 }
 0x2d1   :  { %v3359_v28 = vpop.permute.xlu1 %566  ;;  %v3361_v33 = vpop.permute.xlu0 %564 }
 0x2d2   :  { %5037 = vst [vmem:[#allocation30_spill] sm:$0xff] %v3359_v28 }
 0x2d3   :  { %5038 = vst [vmem:[#allocation31_spill] sm:$0xff] %v3361_v33 }
 0x2d9   :  { %v592_v34 = vpop.permute.xlu1 %591  ;;  %v588_v37 = vpop.permute.xlu0 %587 }
 0x2da   :  { %v597_v39 = vmul.f32 %v592_v34, %v3171_v16  ;;  %v595_v40 = vmul.f32 %v588_v37, %v3161_v11  ;;  %v594_v48 = vmul.f32 %v588_v37, %v3156_v10  ;;  %v596_v6 = vmul.f32 0.0, %v588_v37 }
 0x2db   :  { %v101_v37 = vmul.f32 %v3183_v23, %v3161_v11  ;;  %v104_v23 = vmul.f32 %v3189_v27, %v3176_v17 }
 0x2dc   :  { %612 = vrot.lane.b32.xlu0 %v597_v39, %s3033_s17  ;;  %608 = vrot.lane.b32.xlu1 %v595_v40, %s3033_s17  ;;  %v196_v39 = vadd.f32 %v186_v54, %v99_v57  ;;  %v197_v40 = vadd.f32 %v187_v56, %v100_v58  ;;  %v102_v54 = vmul.f32 0.0, %v3189_v27 }
 0x2dd   :  { %606 = vrot.lane.b32.xlu2 %v594_v48, %s3033_s17  ;;  %v189_v48 = vsel %vm137_vm0, %v3257_v9, %v3244_v1  ;;  %v290_v9 = vsel %vm240_vm1, %v3269_v19, %v3263_v14  ;;  %v201_v14 = vadd.f32 %v3244_v1, %v104_v23  ;;  %v3043_v23 = vmov 9  }
 0x2de   :  { %v299_v61 = vadd.f32 %v3259_v12, %v196_v39  ;;  %v300_v22 = vadd.f32 %v289_v62, %v197_v40  ;;  %v103_v12 = vmul.f32 %v3189_v27, %v3171_v16  ;;  %v199_v56 = vadd.f32 %v188_v7, %v102_v54  ;;  %v3419_v27 = vpop.permute.xlu2 %466 }
 0x2df   :  { %v292_v39 = vsel %vm240_vm1, %v3273_v21, %v3267_v18  ;;  %5039 = vst [vmem:[#allocation32_spill] sm:$0xff] %v3419_v27 }
 0x2e0   :  { %v200_v44 = vadd.f32 %v189_v48, %v103_v12  ;;  %v302_v57 = vadd.f32 %v3313_v46, %v199_v56  ;;  %v304_v19 = vadd.f32 %v292_v39, %v201_v14 }
 0x2e4   :  { %360 = vrot.lane.b32.xlu0 %v299_v61, %s3042_s19  ;;  %362 = vrot.lane.b32.xlu1 %v300_v22, %s3042_s19  ;;  %v291_v22 = vsel %vm240_vm1, %v3313_v46, %v3273_v21  ;;  %v599_v46 = vmul.f32 0.0, %v592_v34 }
 0x2e5   :  { %610 = vrot.lane.b32.xlu2 %v596_v6, %s3033_s17  ;;  %v198_v6 = vadd.f32 %v3238_v63, %v101_v37  ;;  %v303_v58 = vadd.f32 %v291_v22, %v200_v44  ;;  %v598_v63 = vmul.f32 %v592_v34, %v3176_v17 }
 0x2e6   :  { %v3421_v40 = vpop.permute.xlu2 %472 }
 0x2e7   :  { %v301_v62 = vadd.f32 %v290_v9, %v198_v6  ;;  %5040 = vst [vmem:[#allocation33_spill] sm:$0xff] %v3421_v40 }
 0x2ec   :  { %366 = vrot.lane.b32.xlu0 %v302_v57, %s3042_s19  ;;  %368 = vrot.lane.b32.xlu1 %v303_v58, %s3042_s19 }
 0x2ed   :  { %364 = vrot.lane.b32.xlu2 %v301_v62, %s3042_s19 }
 0x2ee   :  { %v511_v18 = vpop.permute.xlu2 %510 }
 0x2f4   :  { %635 = vperm.xlu0 %2853, %v3133_v3   ;;  %614 = vrot.lane.b32.xlu1 %v598_v63, %s3033_s17 }
 0x2f5   :  { %370 = vrot.lane.b32.xlu2 %v304_v19, %s3042_s19 }
 0x2f6   :  { %v515_v1 = vpop.permute.xlu2 %514 }
 0x2fc   :  { %639 = vperm.xlu1 %2854, %v3138_v4  }
 0x2fd   :  { %616 = vrot.lane.b32.xlu2 %v599_v46, %s3033_s17 }
 0x2fe   :  { %v3423_v21 = vpop.permute.xlu2 %520 }
 0x304   :  { %2857 = vset.pattern.permute.xlu1 %v3043_v23 }
 0x306   :  { %v3425_v61 = vpop.permute.xlu2 %558 }
 0x307   :  { %5041 = vst [vmem:[#allocation34_spill] sm:$0xff] %v3425_v61 }
 0x30e   :  { %v3427_v7 = vpop.permute.xlu2 %562 }
 0x30f   :  { %5042 = vst [vmem:[#allocation35_spill] sm:$0xff] %v3427_v7 }
 0x316   :  { %v3429_v12 = vpop.permute.xlu2 %568 }
 0x317   :  { %5043 = vst [vmem:[#allocation36_spill] sm:$0xff] %v3429_v12  ;;  %v3065_v12 = vmov 39  }
 0x337   :  { %v607_v22 = vpop.permute.xlu2 %606 }
 0x33f   :  { %v611_v9 = vpop.permute.xlu2 %610 }
 0x347   :  { %v3443_v14 = vpop.permute.xlu2 %364 }
 0x34e   :  { %v609_v48 = vpop.permute.xlu1 %608  ;;  %v613_v54 = vpop.permute.xlu0 %612 }
 0x34f   :  { %v3458_v8 = vpop.permute.xlu2 %370 }
 0x350   :  { %5046 = vst [vmem:[#allocation39_spill] sm:$0xff] %v3458_v8 }
 0x356   :  { %v3431_v34 = vpop.permute.xlu0 %360  ;;  %v3433_v37 = vpop.permute.xlu1 %362 }
 0x35e   :  { %v3435_v56 = vpop.permute.xlu0 %366  ;;  %v3437_v44 = vpop.permute.xlu1 %368 }
 0x35f   :  { %5044 = vst [vmem:[#allocation37_spill] sm:$0xff] %v3435_v56  ;;  %v523_v56 = vsel %vm137_vm0, %v3341_v36, %v515_v1 }
 0x360   :  { %5045 = vst [vmem:[#allocation38_spill] sm:$0xff] %v3437_v44  ;;  %v618_v44 = vsel %vm240_vm1, %v607_v22, %v609_v48 }
 0x366   :  { %v636_v6 = vpop.permute.xlu0 %635  ;;  %v615_v57 = vpop.permute.xlu1 %614 }
 0x367   :  { %v642_v58 = vmul.f32 %v636_v6, %v3156_v10  ;;  %v643_v62 = vmul.f32 %v636_v6, %v3161_v11  ;;  %v644_v63 = vmul.f32 0.0, %v636_v6  ;;  %v436_v6 = vmul.f32 0.0, %v3287_v31 }
 0x369   :  { %654 = vrot.lane.b32.xlu2 %v642_v58, %s3035_s18  ;;  %656 = vrot.lane.b32.xlu1 %v643_v62, %s3035_s18  ;;  %v437_v58 = vmul.f32 %v3287_v31, %v3156_v10  ;;  %v522_v62 = vsel %vm137_vm0, %v511_v18, %v3341_v36  ;;  %v440_v36 = vmul.f32 %v3289_v32, %v3171_v16  ;;  %v3044_v18 = vmov 2  }
 0x36a   :  { %v532_v47 = vadd.f32 %v522_v62, %v436_v6  ;;  %2855 = vset.pattern.permute.xlu2 %v3044_v18  ;;  %2856 = vset.pattern.permute.xlu0 %v3044_v18 }
 0x36b   :  { %v533_v26 = vadd.f32 %v523_v56, %v437_v58  ;;  %v620_v56 = vsel %vm240_vm1, %v613_v54, %v615_v57 }
 0x36e   :  { %v640_v39 = vpop.permute.xlu1 %639 }
 0x36f   :  { %v646_v19 = vmul.f32 %v640_v39, %v3176_v17  ;;  %v645_v46 = vmul.f32 %v640_v39, %v3171_v16  ;;  %v647_v25 = vmul.f32 0.0, %v640_v39 }
 0x371   :  { %658 = vrot.lane.b32.xlu2 %v644_v63, %s3035_s18  ;;  %662 = vrot.lane.b32.xlu1 %v646_v19, %s3035_s18  ;;  %v629_v63 = vadd.f32 %v618_v44, %v533_v26  ;;  %v628_v19 = vadd.f32 %v607_v22, %v532_v47  ;;  %v438_v26 = vmul.f32 %v3287_v31, %v3161_v11  ;;  %v717_v31 = vld [vmem:[#allocation6 + $0x1] ss:$8 sm:$0x3] }
 0x372   :  { %660 = vrot.lane.b32.xlu0 %v645_v46, %s3035_s18  ;;  %v525_v46 = vsel %vm137_vm0, %v3343_v38, %v3423_v21  ;;  %v524_v47 = vsel %vm137_vm0, %v3339_v35, %v3343_v38  ;;  %v619_v22 = vsel %vm240_vm1, %v609_v48, %v611_v9  ;;  %v441_v35 = vmul.f32 %v3289_v32, %v3176_v17  ;;  %v617_v38 = vpop.permute.xlu2 %616 }
 0x373   :  { %v534_v44 = vadd.f32 %v515_v1, %v438_v26  ;;  %v536_v39 = vadd.f32 %v525_v46, %v440_v36  ;;  %v621_v48 = vsel %vm240_vm1, %v615_v57, %v617_v38  ;;  %v720_v9 = vperm.slane %v717_v31, 1 }
 0x374   :  { %v537_v1 = vadd.f32 %v3423_v21, %v441_v35 }
 0x375   :  { %v632_v62 = vadd.f32 %v620_v56, %v536_v39  ;;  %v630_v6 = vadd.f32 %v619_v22, %v534_v44  ;;  %v3047_v22 = vmov 23  }
 0x376   :  { %v633_v46 = vadd.f32 %v621_v48, %v537_v1 }
 0x379   :  { %690 = vrot.lane.b32.xlu1 %v629_v63, %s3042_s19  ;;  %664 = vrot.lane.b32.xlu2 %v647_v25, %s3035_s18  ;;  %v439_v25 = vmul.f32 0.0, %v3289_v32  ;;  %v3046_v32 = vmov 16  }
 0x37a   :  { %688 = vrot.lane.b32.xlu0 %v628_v19, %s3042_s19  ;;  %v719_v19 = vperm.slane %v717_v31, 0 }
 0x37b   :  { %v535_v58 = vadd.f32 %v524_v47, %v439_v25 }
 0x37d   :  { %v631_v63 = vadd.f32 %v613_v54, %v535_v58 }
 0x381   :  { %696 = vrot.lane.b32.xlu1 %v632_v62, %s3042_s19  ;;  %692 = vrot.lane.b32.xlu2 %v630_v6, %s3042_s19 }
 0x382   :  { %694 = vrot.lane.b32.xlu0 %v631_v63, %s3042_s19 }
 0x389   :  { %723 = vrot.lane.b32.xlu1 %v720_v9, %s3045_s20  ;;  %698 = vrot.lane.b32.xlu2 %v633_v46, %s3042_s19 }
 0x38a   :  { %721 = vrot.lane.b32.xlu0 %v719_v19, %s3045_s20 }
 0x391   :  { %757 = vperm.xlu1 %2857, %v3133_v3   ;;  %743 = vperm.xlu2 %2855, %v3133_v3  }
 0x392   :  { %747 = vperm.xlu0 %2856, %v3138_v4  }
 0x399   :  { %2859 = vset.pattern.permute.xlu1 %v3046_v32  ;;  %2858 = vset.pattern.permute.xlu2 %v3043_v23 }
 0x39a   :  { %771 = vperm.xlu1 %2859, %v3133_v3   ;;  %761 = vperm.xlu2 %2858, %v3138_v4  }
 0x39b   :  { %2861 = vset.pattern.permute.xlu0 %v3047_v22 }
 0x3a2   :  { %2860 = vset.pattern.permute.xlu2 %v3046_v32  ;;  %2862 = vset.pattern.permute.xlu1 %v3047_v22  ;;  %v3048_v22 = vmov 30  }
 0x3a3   :  { %775 = vperm.xlu2 %2860, %v3138_v4  }
 0x3c3   :  { %v3490_v21 = vpop.permute.xlu2 %654 }
 0x3c4   :  { %5047 = vst [vmem:[#allocation40_spill] sm:$0xff] %v3490_v21 }
 0x3cb   :  { %v3492_v54 = vpop.permute.xlu2 %658 }
 0x3cc   :  { %5048 = vst [vmem:[#allocation41_spill] sm:$0xff] %v3492_v54 }
 0x3d3   :  { %v3496_v36 = vpop.permute.xlu2 %664 }
 0x3d4   :  { %5050 = vst [vmem:[#allocation43_spill] sm:$0xff] %v3496_v36 }
 0x3db   :  { %v3494_v57 = vpop.permute.xlu1 %656  ;;  %v3500_v47 = vpop.permute.xlu2 %692 }
 0x3dc   :  { %5049 = vst [vmem:[#allocation42_spill] sm:$0xff] %v3494_v57 }
 0x3dd   :  { %5052 = vst [vmem:[#allocation45_spill] sm:$0xff] %v3500_v47 }
 0x3e3   :  { %v3498_v26 = vpop.permute.xlu1 %662  ;;  %v3506_v25 = vpop.permute.xlu2 %698 }
 0x3e4   :  { %5051 = vst [vmem:[#allocation44_spill] sm:$0xff] %v3498_v26  ;;  %v3528_v9 = vpop.permute.xlu0 %660 }
 0x3e5   :  { %5055 = vst [vmem:[#allocation48_spill] sm:$0xff] %v3506_v25 }
 0x3e6   :  { %5058 = vst [vmem:[#allocation51_spill] sm:$0xff] %v3528_v9 }
 0x3eb   :  { %v3502_v23 = vpop.permute.xlu1 %690  ;;  %v3510_v44 = vpop.permute.xlu2 %743 }
 0x3ec   :  { %5053 = vst [vmem:[#allocation46_spill] sm:$0xff] %v3502_v23  ;;  %v3530_v19 = vpop.permute.xlu0 %688 }
 0x3ed   :  { %5057 = vst [vmem:[#allocation50_spill] sm:$0xff] %v3510_v44 }
 0x3ee   :  { %5059 = vst [vmem:[#allocation52_spill] sm:$0xff] %v3530_v19 }
 0x3f3   :  { %v3504_v18 = vpop.permute.xlu1 %696 }
 0x3f4   :  { %5054 = vst [vmem:[#allocation47_spill] sm:$0xff] %v3504_v18  ;;  %v3514_v58 = vpop.permute.xlu2 %761  ;;  %v3532_v46 = vpop.permute.xlu0 %694 }
 0x3f5   :  { %5060 = vst [vmem:[#allocation53_spill] sm:$0xff] %v3532_v46 }
 0x3fb   :  { %v3508_v56 = vpop.permute.xlu1 %723 }
 0x3fc   :  { %5056 = vst [vmem:[#allocation49_spill] sm:$0xff] %v3508_v56  ;;  %v3534_v32 = vpop.permute.xlu0 %721 }
 0x3fd   :  { %v776_v35 = vpop.permute.xlu2 %775  ;;  %5061 = vst [vmem:[#allocation54_spill] sm:$0xff] %v3534_v32 }
 0x3fe   :  { %v783_v38 = vmul.f32 %v776_v35, %v3176_v17  ;;  %v782_v48 = vmul.f32 %v776_v35, %v3171_v16  ;;  %v781_v1 = vmul.f32 0.0, %v776_v35 }
 0x403   :  { %v3512_v39 = vpop.permute.xlu1 %757 }
 0x404   :  { %v765_v61 = vmul.f32 %v3512_v39, %v3156_v10 }
 0x40c   :  { %v772_v62 = vpop.permute.xlu1 %771 }
 0x40d   :  { %v780_v6 = vmul.f32 %v772_v62, %v3161_v11  ;;  %v779_v63 = vmul.f32 %v772_v62, %v3156_v10  ;;  %v778_v31 = vmul.f32 0.0, %v772_v62  ;;  %v3536_v62 = vpop.permute.xlu0 %747 }
 0x40e   :  { %5062 = vst [vmem:[#allocation55_spill] sm:$0xff] %v3536_v62 }
 0x40f   :  { %794 = vrot.lane.b32.xlu2 %v780_v6, %s3032_s12  ;;  %792 = vrot.lane.b32.xlu1 %v779_v63, %s3032_s12 }
 0x410   :  { %790 = vrot.lane.b32.xlu0 %v778_v31, %s3032_s12 }
 0x417   :  { %800 = vrot.lane.b32.xlu2 %v783_v38, %s3032_s12  ;;  %798 = vrot.lane.b32.xlu1 %v782_v48, %s3032_s12 }
 0x418   :  { %796 = vrot.lane.b32.xlu0 %v781_v1, %s3032_s12 }
 0x41f   :  { %823 = vperm.xlu1 %2862, %v3138_v4  }
 0x420   :  { %819 = vperm.xlu0 %2861, %v3133_v3  }
 0x427   :  { %2864 = vset.pattern.permute.xlu1 %v3048_v22 }
 0x428   :  { %2863 = vset.pattern.permute.xlu0 %v3048_v22 }
 0x469   :  { %v3594_v44 = vpop.permute.xlu2 %794 }
 0x46a   :  { %5070 = vst [vmem:[#allocation63_spill] sm:$0xff] %v3594_v44  ;;  %v3051_v44 = vmov 10  }
 0x481   :  { %v3538_v6 = vpop.permute.xlu1 %792 }
 0x482   :  { %5063 = vst [vmem:[#allocation56_spill] sm:$0xff] %v3538_v6  ;;  %v3540_v63 = vpop.permute.xlu0 %790 }
 0x483   :  { %5064 = vst [vmem:[#allocation57_spill] sm:$0xff] %v3540_v63 }
 0x489   :  { %v3542_v31 = vpop.permute.xlu1 %798 }
 0x48a   :  { %5065 = vst [vmem:[#allocation58_spill] sm:$0xff] %v3542_v31  ;;  %v3544_v35 = vpop.permute.xlu0 %796 }
 0x48b   :  { %5066 = vst [vmem:[#allocation59_spill] sm:$0xff] %v3544_v35 }
 0x491   :  { %v824_v38 = vpop.permute.xlu1 %823 }
 0x492   :  { %v820_v48 = vpop.permute.xlu0 %819  ;;  %v829_v1 = vmul.f32 0.0, %v824_v38  ;;  %v830_v22 = vmul.f32 %v824_v38, %v3171_v16  ;;  %v831_v43 = vmul.f32 %v824_v38, %v3176_v17 }
 0x493   :  { %v827_v8 = vmul.f32 %v820_v48, %v3156_v10  ;;  %v826_v45 = vmul.f32 0.0, %v820_v48  ;;  %v828_v15 = vmul.f32 %v820_v48, %v3161_v11 }
 0x494   :  { %844 = vrot.lane.b32.xlu0 %v829_v1, %s3032_s12  ;;  %v3049_v1 = vmov 37  }
 0x495   :  { %840 = vrot.lane.b32.xlu1 %v827_v8, %s3032_s12  ;;  %838 = vrot.lane.b32.xlu2 %v826_v45, %s3032_s12 }
 0x49c   :  { %867 = vperm.xlu0 %2863, %v3133_v3  }
 0x49d   :  { %846 = vrot.lane.b32.xlu1 %v830_v22, %s3032_s12  ;;  %842 = vrot.lane.b32.xlu2 %v828_v15, %s3032_s12 }
 0x4a4   :  { %2865 = vset.pattern.permute.xlu0 %v3049_v1 }
 0x4a5   :  { %871 = vperm.xlu1 %2864, %v3138_v4   ;;  %848 = vrot.lane.b32.xlu2 %v831_v43, %s3032_s12 }
 0x4ad   :  { %2866 = vset.pattern.permute.xlu1 %v3049_v1 }
 0x506   :  { %v3558_v8 = vpop.permute.xlu0 %844 }
 0x507   :  { %v3560_v45 = vpop.permute.xlu1 %840 }
 0x50e   :  { %v868_v48 = vpop.permute.xlu0 %867 }
 0x50f   :  { %v3562_v5 = vpop.permute.xlu1 %846  ;;  %v875_v22 = vmul.f32 %v868_v48, %v3161_v11  ;;  %v874_v15 = vmul.f32 %v868_v48, %v3156_v10  ;;  %v876_v43 = vmul.f32 0.0, %v868_v48 }
 0x511   :  { %888 = vrot.lane.b32.xlu1 %v875_v22, %s3033_s17  ;;  %886 = vrot.lane.b32.xlu2 %v874_v15, %s3033_s17  ;;  %v3050_v22 = vmov 44  }
 0x517   :  { %v872_v38 = vpop.permute.xlu1 %871 }
 0x518   :  { %v877_v59 = vmul.f32 %v872_v38, %v3171_v16  ;;  %v878_v1 = vmul.f32 %v872_v38, %v3176_v17  ;;  %v879_v63 = vmul.f32 0.0, %v872_v38 }
 0x519   :  { %890 = vrot.lane.b32.xlu2 %v876_v43, %s3033_s17 }
 0x51a   :  { %892 = vrot.lane.b32.xlu0 %v877_v59, %s3033_s17  ;;  %894 = vrot.lane.b32.xlu1 %v878_v1, %s3033_s17 }
 0x521   :  { %896 = vrot.lane.b32.xlu2 %v879_v63, %s3033_s17 }
 0x522   :  { %915 = vperm.xlu0 %2865, %v3133_v3   ;;  %919 = vperm.xlu1 %2866, %v3138_v4  }
 0x52a   :  { %2867 = vset.pattern.permute.xlu0 %v3050_v22  ;;  %2868 = vset.pattern.permute.xlu1 %v3050_v22 }
 0x583   :  { %v3576_v48 = vpop.permute.xlu1 %888 }
 0x584   :  { %5067 = vst [vmem:[#allocation60_spill] sm:$0xff] %v3576_v48 }
 0x58c   :  { %v3578_v15 = vpop.permute.xlu1 %894  ;;  %v3580_v54 = vpop.permute.xlu0 %892 }
 0x58d   :  { %5068 = vst [vmem:[#allocation61_spill] sm:$0xff] %v3578_v15 }
 0x58e   :  { %5069 = vst [vmem:[#allocation62_spill] sm:$0xff] %v3580_v54 }
 0x594   :  { %v920_v43 = vpop.permute.xlu1 %919  ;;  %v916_v59 = vpop.permute.xlu0 %915 }
 0x595   :  { %v923_v1 = vmul.f32 %v916_v59, %v3161_v11  ;;  %v925_v38 = vmul.f32 %v920_v43, %v3171_v16  ;;  %v922_v63 = vmul.f32 %v916_v59, %v3156_v10  ;;  %v926_v22 = vmul.f32 %v920_v43, %v3176_v17 }
 0x596   :  { %v924_v7 = vmul.f32 0.0, %v916_v59  ;;  %v927_v48 = vmul.f32 0.0, %v920_v43 }
 0x597   :  { %936 = vrot.lane.b32.xlu1 %v923_v1, %s3033_s17  ;;  %940 = vrot.lane.b32.xlu0 %v925_v38, %s3033_s17  ;;  %v3596_v1 = vpop.permute.xlu2 %800 }
 0x598   :  { %934 = vrot.lane.b32.xlu2 %v922_v63, %s3033_s17  ;;  %5071 = vst [vmem:[#allocation64_spill] sm:$0xff] %v3596_v1 }
 0x59f   :  { %942 = vrot.lane.b32.xlu1 %v926_v22, %s3033_s17  ;;  %963 = vperm.xlu0 %2867, %v3133_v3   ;;  %v839_v38 = vpop.permute.xlu2 %838 }
 0x5a0   :  { %938 = vrot.lane.b32.xlu2 %v924_v7, %s3033_s17  ;;  %v850_v57 = vsel %vm137_vm0, %v839_v38, %v3560_v45 }
 0x5a7   :  { %967 = vperm.xlu1 %2868, %v3138_v4   ;;  %v843_v63 = vpop.permute.xlu2 %842 }
 0x5a8   :  { %944 = vrot.lane.b32.xlu2 %v927_v48, %s3033_s17 }
 0x5af   :  { %v849_v19 = vpop.permute.xlu2 %848  ;;  %2871 = vset.pattern.permute.xlu1 %v3051_v44 }
 0x5b7   :  { %v3598_v6 = vpop.permute.xlu2 %886 }
 0x5b8   :  { %5072 = vst [vmem:[#allocation65_spill] sm:$0xff] %v3598_v6 }
 0x5bf   :  { %v3600_v59 = vpop.permute.xlu2 %890 }
 0x5c0   :  { %5073 = vst [vmem:[#allocation66_spill] sm:$0xff] %v3600_v59 }
 0x5c7   :  { %v3602_v43 = vpop.permute.xlu2 %896 }
 0x5c8   :  { %5074 = vst [vmem:[#allocation67_spill] sm:$0xff] %v3602_v43 }
 0x5f2   :  { %v935_v47 = vpop.permute.xlu2 %934 }
 0x609   :  { %v937_v22 = vpop.permute.xlu1 %936  ;;  %v941_v3 = vpop.permute.xlu0 %940 }
 0x611   :  { %v943_v51 = vpop.permute.xlu1 %942  ;;  %v964_v7 = vpop.permute.xlu0 %963 }
 0x612   :  { %v970_v4 = vmul.f32 %v964_v7, %v3156_v10  ;;  %v971_v48 = vmul.f32 %v964_v7, %v3161_v11  ;;  %v972_v21 = vmul.f32 0.0, %v964_v7  ;;  %v946_v7 = vsel %vm240_vm1, %v935_v47, %v937_v22 }
 0x613   :  { %v767_v10 = vmul.f32 0.0, %v3514_v58 }
 0x614   :  { %984 = vrot.lane.b32.xlu1 %v971_v48, %s3035_s18  ;;  %982 = vrot.lane.b32.xlu2 %v970_v4, %s3035_s18  ;;  %v764_v4 = vmul.f32 0.0, %v3512_v39  ;;  %v851_v48 = vsel %vm137_vm0, %v3560_v45, %v843_v63 }
 0x615   :  { %v861_v30 = vadd.f32 %v851_v48, %v765_v61  ;;  %v3052_v61 = vmov 3  }
 0x616   :  { %v860_v60 = vadd.f32 %v850_v57, %v764_v4  ;;  %v853_v57 = vsel %vm137_vm0, %v3562_v5, %v849_v19  ;;  %2869 = vset.pattern.permute.xlu2 %v3052_v61  ;;  %2870 = vset.pattern.permute.xlu0 %v3052_v61 }
 0x617   :  { %v957_v50 = vadd.f32 %v946_v7, %v861_v30  ;;  %v768_v30 = vmul.f32 %v3514_v58, %v3171_v16 }
 0x619   :  { %v968_v23 = vpop.permute.xlu1 %967 }
 0x61a   :  { %v974_v6 = vmul.f32 %v968_v23, %v3176_v17  ;;  %v973_v59 = vmul.f32 %v968_v23, %v3171_v16  ;;  %v975_v27 = vmul.f32 0.0, %v968_v23  ;;  %v769_v16 = vmul.f32 %v3514_v58, %v3176_v17 }
 0x61b   :  { %v3054_v17 = vmov 17  }
 0x61c   :  { %988 = vrot.lane.b32.xlu0 %v973_v59, %s3035_s18  ;;  %990 = vrot.lane.b32.xlu1 %v974_v6, %s3035_s18  ;;  %v956_v59 = vadd.f32 %v935_v47, %v860_v60  ;;  %v939_v6 = vpop.permute.xlu2 %938  ;;  %v766_v60 = vmul.f32 %v3512_v39, %v3161_v11  ;;  %v1045_v11 = vld [vmem:[#allocation6 + $0x2] ss:$8 sm:$0x3]  ;;  %v865_v48 = vadd.f32 %v849_v19, %v769_v16 }
 0x61d   :  { %986 = vrot.lane.b32.xlu2 %v972_v21, %s3035_s18  ;;  %v852_v21 = vsel %vm137_vm0, %v3558_v8, %v3562_v5  ;;  %v947_v23 = vsel %vm240_vm1, %v937_v22, %v939_v6  ;;  %v864_v8 = vadd.f32 %v853_v57, %v768_v30  ;;  %v1047_v22 = vperm.slane %v1045_v11, 0 }
 0x61e   :  { %v863_v47 = vadd.f32 %v852_v21, %v767_v10 }
 0x620   :  { %v959_v45 = vadd.f32 %v941_v3, %v863_v47 }
 0x624   :  { %1016 = vrot.lane.b32.xlu0 %v956_v59, %s3042_s19  ;;  %1018 = vrot.lane.b32.xlu1 %v957_v50, %s3042_s19  ;;  %v948_v50 = vsel %vm240_vm1, %v941_v3, %v943_v51  ;;  %v945_v5 = vpop.permute.xlu2 %944  ;;  %v3643_v3 = vld [vmem:[#allocation3 + $0x8] sm:$0xff]  ;;  %v3646_v59 = vld [vmem:[#allocation3] sm:$0xff] }
 0x625   :  { %992 = vrot.lane.b32.xlu2 %v975_v27, %s3035_s18  ;;  %v862_v27 = vadd.f32 %v843_v63, %v766_v60  ;;  %v960_v4 = vadd.f32 %v948_v50, %v864_v8  ;;  %v949_v39 = vsel %vm240_vm1, %v943_v51, %v945_v5  ;;  %v1048_v63 = vperm.slane %v1045_v11, 1  ;;  %v3682_v8 = vld [vmem:[%s4947_s0] sm:$0xff]  ;;  %v3697_v5 = vld [vmem:[%s4947_s0 + $0x10] sm:$0xff] }
 0x626   :  { %v961_v7 = vadd.f32 %v949_v39, %v865_v48  ;;  %v3055_v60 = vmov 24   ;;  %v3703_v48 = vld [vmem:[%s4947_s0 + $0x18] sm:$0xff] }
 0x627   :  { %v958_v38 = vadd.f32 %v947_v23, %v862_v27 }
 0x62c   :  { %1022 = vrot.lane.b32.xlu0 %v959_v45, %s3042_s19  ;;  %1024 = vrot.lane.b32.xlu1 %v960_v4, %s3042_s19 }
 0x62d   :  { %1020 = vrot.lane.b32.xlu2 %v958_v38, %s3042_s19  ;;  %v3688_v38 = vld [vmem:[%s4947_s0 + $0x8] sm:$0xff] }
 0x634   :  { %1049 = vrot.lane.b32.xlu0 %v1047_v22, %s3053_s21  ;;  %1051 = vrot.lane.b32.xlu1 %v1048_v63, %s3053_s21 }
 0x635   :  { %1026 = vrot.lane.b32.xlu2 %v961_v7, %s3042_s19 }
 0x63c   :  { %1075 = vperm.xlu0 %2870, %v3643_v3   ;;  %1085 = vperm.xlu1 %2871, %v3646_v59  }
 0x63d   :  { %1071 = vperm.xlu2 %2869, %v3646_v59  }
 0x644   :  { %2873 = vset.pattern.permute.xlu1 %v3054_v17  ;;  %2875 = vset.pattern.permute.xlu0 %v3055_v60 }
 0x645   :  { %2872 = vset.pattern.permute.xlu2 %v3051_v44  ;;  %1099 = vperm.xlu1 %2873, %v3646_v59  }
 0x646   :  { %1089 = vperm.xlu2 %2872, %v3643_v3  }
 0x64d   :  { %2876 = vset.pattern.permute.xlu1 %v3055_v60 }
 0x64e   :  { %2874 = vset.pattern.permute.xlu2 %v3054_v17 }
 0x64f   :  { %1103 = vperm.xlu2 %2874, %v3643_v3  }
 0x66e   :  { %v3653_v51 = vpop.permute.xlu2 %982 }
 0x66f   :  { %5075 = vst [vmem:[#allocation68_spill] sm:$0xff] %v3653_v51 }
 0x677   :  { %v3655_v58 = vpop.permute.xlu2 %986 }
 0x678   :  { %5076 = vst [vmem:[#allocation69_spill] sm:$0xff] %v3655_v58 }
 0x67f   :  { %v3659_v21 = vpop.permute.xlu2 %992 }
 0x680   :  { %5078 = vst [vmem:[#allocation71_spill] sm:$0xff] %v3659_v21 }
 0x686   :  { %v3657_v19 = vpop.permute.xlu1 %984 }
 0x687   :  { %5077 = vst [vmem:[#allocation70_spill] sm:$0xff] %v3657_v19  ;;  %v3663_v10 = vpop.permute.xlu2 %1020 }
 0x688   :  { %5080 = vst [vmem:[#allocation73_spill] sm:$0xff] %v3663_v10 }
 0x68e   :  { %v3661_v6 = vpop.permute.xlu1 %990  ;;  %v3711_v7 = vpop.permute.xlu0 %988 }
 0x68f   :  { %5079 = vst [vmem:[#allocation72_spill] sm:$0xff] %v3661_v6  ;;  %v3669_v30 = vpop.permute.xlu2 %1026 }
 0x690   :  { %5083 = vst [vmem:[#allocation76_spill] sm:$0xff] %v3669_v30 }
 0x691   :  { %5086 = vst [vmem:[#allocation79_spill] sm:$0xff] %v3711_v7 }
 0x696   :  { %v3665_v44 = vpop.permute.xlu1 %1018  ;;  %v3713_v17 = vpop.permute.xlu0 %1016 }
 0x697   :  { %5081 = vst [vmem:[#allocation74_spill] sm:$0xff] %v3665_v44  ;;  %v3673_v47 = vpop.permute.xlu2 %1071 }
 0x698   :  { %5085 = vst [vmem:[#allocation78_spill] sm:$0xff] %v3673_v47 }
 0x699   :  { %5087 = vst [vmem:[#allocation80_spill] sm:$0xff] %v3713_v17 }
 0x69e   :  { %v3667_v57 = vpop.permute.xlu1 %1024  ;;  %v3715_v60 = vpop.permute.xlu0 %1022 }
 0x69f   :  { %5082 = vst [vmem:[#allocation75_spill] sm:$0xff] %v3667_v57 }
 0x6a0   :  { %v3677_v50 = vpop.permute.xlu2 %1089  ;;  %5088 = vst [vmem:[#allocation81_spill] sm:$0xff] %v3715_v60 }
 0x6a6   :  { %v3671_v61 = vpop.permute.xlu1 %1051 }
 0x6a7   :  { %5084 = vst [vmem:[#allocation77_spill] sm:$0xff] %v3671_v61 }
 0x6a9   :  { %v1104_v16 = vpop.permute.xlu2 %1103 }
 0x6aa   :  { %v1110_v39 = vmul.f32 %v3697_v5, %v1104_v16  ;;  %v1109_v22 = vmul.f32 0.0, %v1104_v16  ;;  %v1111_v63 = vmul.f32 %v3703_v48, %v1104_v16 }
 0x6ae   :  { %v3675_v23 = vpop.permute.xlu1 %1085 }
 0x6b7   :  { %v1100_v27 = vpop.permute.xlu1 %1099 }
 0x6b8   :  { %v1107_v45 = vmul.f32 %v3682_v8, %v1100_v27  ;;  %v1108_v4 = vmul.f32 %v3688_v38, %v1100_v27  ;;  %v1106_v11 = vmul.f32 0.0, %v1100_v27  ;;  %v3717_v27 = vpop.permute.xlu0 %1049 }
 0x6b9   :  { %5089 = vst [vmem:[#allocation82_spill] sm:$0xff] %v3717_v27  ;;  %v3057_v27 = vmov 38  }
 0x6ba   :  { %1120 = vrot.lane.b32.xlu1 %v1107_v45, %s3032_s12  ;;  %1118 = vrot.lane.b32.xlu0 %v1106_v11, %s3032_s12  ;;  %v3056_v45 = vmov 31  }
 0x6bb   :  { %1122 = vrot.lane.b32.xlu2 %v1108_v4, %s3032_s12 }
 0x6bc   :  { %2878 = vset.pattern.permute.xlu2 %v3056_v45 }
 0x6c0   :  { %v3719_v4 = vpop.permute.xlu0 %1075 }
 0x6c2   :  { %1126 = vrot.lane.b32.xlu1 %v1110_v39, %s3032_s12  ;;  %1124 = vrot.lane.b32.xlu0 %v1109_v22, %s3032_s12 }
 0x6c3   :  { %1128 = vrot.lane.b32.xlu2 %v1111_v63, %s3032_s12 }
 0x6ca   :  { %1151 = vperm.xlu1 %2876, %v3643_v3   ;;  %1147 = vperm.xlu0 %2875, %v3646_v59  }
 0x6d2   :  { %2877 = vset.pattern.permute.xlu1 %v3056_v45  ;;  %2879 = vset.pattern.permute.xlu0 %v3057_v27 }
 0x715   :  { %v3739_v51 = vpop.permute.xlu2 %1122 }
 0x716   :  { %5092 = vst [vmem:[#allocation85_spill] sm:$0xff] %v3739_v51 }
 0x71d   :  { %v3741_v19 = vpop.permute.xlu2 %1128 }
 0x71e   :  { %5093 = vst [vmem:[#allocation86_spill] sm:$0xff] %v3741_v19 }
 0x72c   :  { %v3721_v11 = vpop.permute.xlu1 %1120  ;;  %v3723_v16 = vpop.permute.xlu0 %1118 }
 0x72d   :  { %5090 = vst [vmem:[#allocation83_spill] sm:$0xff] %v3721_v11 }
 0x72e   :  { %5091 = vst [vmem:[#allocation84_spill] sm:$0xff] %v3723_v16 }
 0x734   :  { %v3725_v39 = vpop.permute.xlu1 %1126  ;;  %v3727_v22 = vpop.permute.xlu0 %1124 }
 0x73c   :  { %v1152_v63 = vpop.permute.xlu1 %1151  ;;  %v1148_v58 = vpop.permute.xlu0 %1147 }
 0x73d   :  { %v1157_v17 = vmul.f32 %v3703_v48, %v1152_v63  ;;  %v1154_v44 = vmul.f32 %v3682_v8, %v1148_v58  ;;  %v1155_v10 = vmul.f32 %v3688_v38, %v1148_v58  ;;  %v1156_v45 = vmul.f32 %v3697_v5, %v1152_v63 }
 0x73f   :  { %1168 = vrot.lane.b32.xlu0 %v1157_v17, %s3032_s12  ;;  %1164 = vrot.lane.b32.xlu1 %v1155_v10, %s3032_s12 }
 0x740   :  { %1162 = vrot.lane.b32.xlu2 %v1154_v44, %s3032_s12 }
 0x747   :  { %1185 = vperm.xlu1 %2877, %v3646_v59  }
 0x748   :  { %1166 = vrot.lane.b32.xlu2 %v1156_v45, %s3032_s12 }
 0x74f   :  { %2880 = vset.pattern.permute.xlu1 %v3057_v27 }
 0x750   :  { %1189 = vperm.xlu2 %2878, %v3643_v3  }
 0x79a   :  { %v3743_v58 = vpop.permute.xlu2 %1162 }
 0x7a2   :  { %v3747_v44 = vpop.permute.xlu2 %1166 }
 0x7aa   :  { %v1190_v57 = vpop.permute.xlu2 %1189 }
 0x7ab   :  { %v1196_v27 = vmul.f32 %v3703_v48, %v1190_v57  ;;  %v1195_v7 = vmul.f32 %v3697_v5, %v1190_v57  ;;  %v1197_v54 = vmul.f32 0.0, %v1190_v57 }
 0x7b1   :  { %v3745_v10 = vpop.permute.xlu1 %1164 }
 0x7b9   :  { %v1186_v17 = vpop.permute.xlu1 %1185 }
 0x7ba   :  { %v1193_v63 = vmul.f32 %v3688_v38, %v1186_v17  ;;  %v1194_v60 = vmul.f32 0.0, %v1186_v17  ;;  %v1192_v45 = vmul.f32 %v3682_v8, %v1186_v17  ;;  %v3058_v17 = vmov 45  }
 0x7bc   :  { %1206 = vrot.lane.b32.xlu1 %v1193_v63, %s3033_s17  ;;  %1204 = vrot.lane.b32.xlu0 %v1192_v45, %s3033_s17 }
 0x7bd   :  { %1208 = vrot.lane.b32.xlu2 %v1194_v60, %s3033_s17  ;;  %v3761_v60 = vpop.permute.xlu0 %1168 }
 0x7be   :  { %v1171_v56 = vsel %vm137_vm0, %v3747_v44, %v3761_v60 }
 0x7c4   :  { %1212 = vrot.lane.b32.xlu1 %v1196_v27, %s3033_s17  ;;  %1210 = vrot.lane.b32.xlu0 %v1195_v7, %s3033_s17 }
 0x7c5   :  { %1214 = vrot.lane.b32.xlu2 %v1197_v54, %s3033_s17 }
 0x7cc   :  { %1237 = vperm.xlu1 %2880, %v3643_v3   ;;  %1233 = vperm.xlu0 %2879, %v3646_v59  }
 0x7d4   :  { %2881 = vset.pattern.permute.xlu0 %v3058_v17  ;;  %2882 = vset.pattern.permute.xlu1 %v3058_v17 }
 0x817   :  { %v3783_v9 = vpop.permute.xlu2 %1208 }
 0x818   :  { %5097 = vst [vmem:[#allocation90_spill] sm:$0xff] %v3783_v9 }
 0x82e   :  { %v3763_v63 = vpop.permute.xlu1 %1206  ;;  %v3765_v45 = vpop.permute.xlu0 %1204 }
 0x82f   :  { %5094 = vst [vmem:[#allocation87_spill] sm:$0xff] %v3763_v63 }
 0x830   :  { %5095 = vst [vmem:[#allocation88_spill] sm:$0xff] %v3765_v45 }
 0x836   :  { %v3767_v57 = vpop.permute.xlu1 %1212  ;;  %v3769_v27 = vpop.permute.xlu0 %1210 }
 0x837   :  { %5096 = vst [vmem:[#allocation89_spill] sm:$0xff] %v3767_v57 }
 0x83e   :  { %v1238_v7 = vpop.permute.xlu1 %1237  ;;  %v1234_v35 = vpop.permute.xlu0 %1233 }
 0x83f   :  { %v1243_v54 = vmul.f32 %v3697_v5, %v1238_v7  ;;  %v1240_v31 = vmul.f32 %v3682_v8, %v1234_v35  ;;  %v1241_v32 = vmul.f32 %v3688_v38, %v1234_v35  ;;  %v1242_v17 = vmul.f32 0.0, %v1234_v35 }
 0x840   :  { %v1244_v46 = vmul.f32 %v3703_v48, %v1238_v7  ;;  %v1245_v18 = vmul.f32 0.0, %v1238_v7 }
 0x841   :  { %1258 = vrot.lane.b32.xlu0 %v1243_v54, %s3033_s17  ;;  %1252 = vrot.lane.b32.xlu2 %v1240_v31, %s3033_s17 }
 0x842   :  { %1254 = vrot.lane.b32.xlu1 %v1241_v32, %s3033_s17  ;;  %v3785_v32 = vpop.permute.xlu2 %1214 }
 0x843   :  { %5098 = vst [vmem:[#allocation91_spill] sm:$0xff] %v3785_v32 }
 0x849   :  { %1281 = vperm.xlu0 %2881, %v3646_v59   ;;  %1256 = vrot.lane.b32.xlu2 %v1242_v17, %s3033_s17 }
 0x84a   :  { %1260 = vrot.lane.b32.xlu1 %v1244_v46, %s3033_s17  ;;  %v3059_v46 = vmov 11  }
 0x851   :  { %1262 = vrot.lane.b32.xlu2 %v1245_v18, %s3033_s17 }
 0x852   :  { %1285 = vperm.xlu1 %2882, %v3643_v3  }
 0x85a   :  { %2885 = vset.pattern.permute.xlu1 %v3059_v46 }
 0x89b   :  { %v1253_v18 = vpop.permute.xlu2 %1252 }
 0x8b3   :  { %v1259_v54 = vpop.permute.xlu0 %1258 }
 0x8b4   :  { %v1255_v31 = vpop.permute.xlu1 %1254 }
 0x8b5   :  { %v1264_v6 = vsel %vm240_vm1, %v1253_v18, %v1255_v31 }
 0x8bb   :  { %v1282_v33 = vpop.permute.xlu0 %1281 }
 0x8bc   :  { %v1261_v35 = vpop.permute.xlu1 %1260  ;;  %v1288_v53 = vmul.f32 %v3682_v8, %v1282_v33  ;;  %v1289_v52 = vmul.f32 %v3688_v38, %v1282_v33  ;;  %v1290_v7 = vmul.f32 0.0, %v1282_v33  ;;  %v1092_v33 = vmul.f32 0.0, %v3675_v23 }
 0x8be   :  { %1302 = vrot.lane.b32.xlu1 %v1289_v52, %s3035_s18  ;;  %1300 = vrot.lane.b32.xlu2 %v1288_v53, %s3035_s18  ;;  %v1170_v52 = vsel %vm137_vm0, %v3743_v58, %v3745_v10  ;;  %v1093_v53 = vmul.f32 %v3682_v8, %v3675_v23  ;;  %v1178_v21 = vadd.f32 %v3743_v58, %v1092_v33 }
 0x8bf   :  { %v1096_v58 = vmul.f32 %v3697_v5, %v3677_v50 }
 0x8c0   :  { %v1179_v1 = vadd.f32 %v1170_v52, %v1093_v53 }
 0x8c2   :  { %v1275_v43 = vadd.f32 %v1264_v6, %v1179_v1  ;;  %v3060_v6 = vmov 4  }
 0x8c3   :  { %2883 = vset.pattern.permute.xlu2 %v3060_v6  ;;  %2884 = vset.pattern.permute.xlu0 %v3060_v6 }
 0x8c4   :  { %v1286_v17 = vpop.permute.xlu1 %1285 }
 0x8c5   :  { %v1291_v61 = vmul.f32 %v3697_v5, %v1286_v17  ;;  %v1292_v30 = vmul.f32 %v3703_v48, %v1286_v17  ;;  %v1293_v15 = vmul.f32 0.0, %v1286_v17 }
 0x8c6   :  { %1304 = vrot.lane.b32.xlu2 %v1290_v7, %s3035_s18  ;;  %v1274_v7 = vadd.f32 %v1253_v18, %v1178_v21  ;;  %v1095_v21 = vmul.f32 0.0, %v3677_v50  ;;  %v1182_v18 = vadd.f32 %v1171_v56, %v1096_v58 }
 0x8c7   :  { %1306 = vrot.lane.b32.xlu0 %v1291_v61, %s3035_s18  ;;  %1308 = vrot.lane.b32.xlu1 %v1292_v30, %s3035_s18  ;;  %v1257_v61 = vpop.permute.xlu2 %1256  ;;  %v1094_v30 = vmul.f32 %v3688_v38, %v3675_v23 }
 0x8c8   :  { %v1265_v1 = vsel %vm240_vm1, %v1255_v31, %v1257_v61  ;;  %v1181_v23 = vadd.f32 %v3747_v44, %v1095_v21  ;;  %v1097_v31 = vmul.f32 %v3703_v48, %v3677_v50  ;;  %v3062_v50 = vmov 18  }
 0x8ca   :  { %v1277_v52 = vadd.f32 %v1259_v54, %v1181_v23  ;;  %v1183_v61 = vadd.f32 %v3761_v60, %v1097_v31 }
 0x8ce   :  { %1310 = vrot.lane.b32.xlu2 %v1293_v15, %s3035_s18  ;;  %v1180_v15 = vadd.f32 %v3745_v10, %v1094_v30 }
 0x8cf   :  { %1334 = vrot.lane.b32.xlu0 %v1274_v7, %s3042_s19  ;;  %1336 = vrot.lane.b32.xlu1 %v1275_v43, %s3042_s19  ;;  %v1266_v43 = vsel %vm240_vm1, %v1259_v54, %v1261_v35  ;;  %v1263_v33 = vpop.permute.xlu2 %1262  ;;  %v1363_v7 = vld [vmem:[#allocation6 + $0x3] ss:$8 sm:$0x3] }
 0x8d0   :  { %v1276_v17 = vadd.f32 %v1265_v1, %v1180_v15  ;;  %v1278_v53 = vadd.f32 %v1266_v43, %v1182_v18  ;;  %v1267_v10 = vsel %vm240_vm1, %v1261_v35, %v1263_v33  ;;  %v1365_v44 = vperm.slane %v1363_v7, 0 }
 0x8d1   :  { %v1366_v56 = vperm.slane %v1363_v7, 1  ;;  %v1279_v30 = vadd.f32 %v1267_v10, %v1183_v61  ;;  %v3063_v43 = vmov 25  }
 0x8d6   :  { %1338 = vrot.lane.b32.xlu2 %v1276_v17, %s3042_s19 }
 0x8d7   :  { %1340 = vrot.lane.b32.xlu0 %v1277_v52, %s3042_s19  ;;  %1342 = vrot.lane.b32.xlu1 %v1278_v53, %s3042_s19 }
 0x8de   :  { %1344 = vrot.lane.b32.xlu2 %v1279_v30, %s3042_s19 }
 0x8df   :  { %1367 = vrot.lane.b32.xlu0 %v1365_v44, %s3061_s30  ;;  %1369 = vrot.lane.b32.xlu1 %v1366_v56, %s3061_s30 }
 0x8e6   :  { %1389 = vperm.xlu2 %2883, %v3646_v59  }
 0x8e7   :  { %1403 = vperm.xlu1 %2885, %v3646_v59   ;;  %1393 = vperm.xlu0 %2884, %v3643_v3  }
 0x8ee   :  { %2886 = vset.pattern.permute.xlu2 %v3059_v46 }
 0x8ef   :  { %2887 = vset.pattern.permute.xlu1 %v3062_v50  ;;  %1407 = vperm.xlu2 %2886, %v3643_v3  }
 0x8f0   :  { %1417 = vperm.xlu1 %2887, %v3646_v59   ;;  %2889 = vset.pattern.permute.xlu0 %v3063_v43 }
 0x8f7   :  { %2888 = vset.pattern.permute.xlu2 %v3062_v50 }
 0x8f8   :  { %1421 = vperm.xlu2 %2888, %v3643_v3   ;;  %2890 = vset.pattern.permute.xlu1 %v3063_v43 }
 0x918   :  { %v3833_v60 = vpop.permute.xlu2 %1300 }
 0x919   :  { %5099 = vst [vmem:[#allocation92_spill] sm:$0xff] %v3833_v60 }
 0x920   :  { %v3835_v54 = vpop.permute.xlu2 %1304 }
 0x921   :  { %5100 = vst [vmem:[#allocation93_spill] sm:$0xff] %v3835_v54 }
 0x928   :  { %v3839_v58 = vpop.permute.xlu2 %1310 }
 0x929   :  { %5102 = vst [vmem:[#allocation95_spill] sm:$0xff] %v3839_v58 }
 0x930   :  { %v3837_v35 = vpop.permute.xlu1 %1302  ;;  %v3843_v46 = vpop.permute.xlu2 %1338 }
 0x931   :  { %5101 = vst [vmem:[#allocation94_spill] sm:$0xff] %v3837_v35 }
 0x932   :  { %5104 = vst [vmem:[#allocation97_spill] sm:$0xff] %v3843_v46 }
 0x938   :  { %v3849_v15 = vpop.permute.xlu2 %1344 }
 0x939   :  { %v3841_v21 = vpop.permute.xlu1 %1308  ;;  %5106 = vst [vmem:[#allocation99_spill] sm:$0xff] %v3849_v15  ;;  %v3871_v30 = vpop.permute.xlu0 %1306 }
 0x93a   :  { %5103 = vst [vmem:[#allocation96_spill] sm:$0xff] %v3841_v21 }
 0x940   :  { %v3853_v18 = vpop.permute.xlu2 %1389 }
 0x941   :  { %v3845_v1 = vpop.permute.xlu1 %1336  ;;  %v3873_v50 = vpop.permute.xlu0 %1334 }
 0x942   :  { %5105 = vst [vmem:[#allocation98_spill] sm:$0xff] %v3845_v1 }
 0x943   :  { %5108 = vst [vmem:[#allocation101_spill] sm:$0xff] %v3873_v50 }
 0x949   :  { %v3847_v6 = vpop.permute.xlu1 %1342  ;;  %v3857_v52 = vpop.permute.xlu2 %1407 }
 0x94a   :  { %v3875_v43 = vpop.permute.xlu0 %1340 }
 0x951   :  { %v3851_v23 = vpop.permute.xlu1 %1369 }
 0x952   :  { %5107 = vst [vmem:[#allocation100_spill] sm:$0xff] %v3851_v23  ;;  %v1422_v10 = vpop.permute.xlu2 %1421 }
 0x953   :  { %v1427_v61 = vmul.f32 0.0, %v1422_v10  ;;  %v1428_v44 = vmul.f32 %v3697_v5, %v1422_v10  ;;  %v1429_v56 = vmul.f32 %v3703_v48, %v1422_v10 }
 0x959   :  { %v3855_v17 = vpop.permute.xlu1 %1403 }
 0x962   :  { %v1418_v53 = vpop.permute.xlu1 %1417 }
 0x963   :  { %v1424_v31 = vmul.f32 0.0, %v1418_v53  ;;  %v1425_v33 = vmul.f32 %v3682_v8, %v1418_v53  ;;  %v1426_v7 = vmul.f32 %v3688_v38, %v1418_v53  ;;  %v3877_v53 = vpop.permute.xlu0 %1367 }
 0x964   :  { %5109 = vst [vmem:[#allocation102_spill] sm:$0xff] %v3877_v53 }
 0x965   :  { %1438 = vrot.lane.b32.xlu1 %v1425_v33, %s3032_s12  ;;  %1436 = vrot.lane.b32.xlu0 %v1424_v31, %s3032_s12  ;;  %v3064_v31 = vmov 32  }
 0x966   :  { %1440 = vrot.lane.b32.xlu2 %v1426_v7, %s3032_s12 }
 0x96b   :  { %v3879_v33 = vpop.permute.xlu0 %1393 }
 0x96d   :  { %1444 = vrot.lane.b32.xlu1 %v1428_v44, %s3032_s12  ;;  %1442 = vrot.lane.b32.xlu0 %v1427_v61, %s3032_s12 }
 0x96e   :  { %1446 = vrot.lane.b32.xlu2 %v1429_v56, %s3032_s12 }
 0x975   :  { %1469 = vperm.xlu1 %2890, %v3643_v3   ;;  %1465 = vperm.xlu0 %2889, %v3646_v59  }
 0x97d   :  { %2891 = vset.pattern.permute.xlu0 %v3064_v31  ;;  %2892 = vset.pattern.permute.xlu1 %v3064_v31 }
 0x9c0   :  { %v3937_v60 = vpop.permute.xlu2 %1440 }
 0x9d7   :  { %v3881_v7 = vpop.permute.xlu1 %1438  ;;  %v3883_v10 = vpop.permute.xlu0 %1436 }
 0x9df   :  { %v3885_v61 = vpop.permute.xlu1 %1444  ;;  %v3887_v44 = vpop.permute.xlu0 %1442 }
 0x9e7   :  { %v1470_v56 = vpop.permute.xlu1 %1469  ;;  %v1466_v62 = vpop.permute.xlu0 %1465 }
 0x9e8   :  { %v1475_v25 = vmul.f32 %v3697_v5, %v1470_v56  ;;  %v1472_v26 = vmul.f32 %v3682_v8, %v1466_v62  ;;  %v1473_v36 = vmul.f32 %v3688_v38, %v1466_v62  ;;  %v1474_v31 = vmul.f32 0.0, %v1466_v62 }
 0x9e9   :  { %v1476_v40 = vmul.f32 %v3703_v48, %v1470_v56  ;;  %v1477_v28 = vmul.f32 0.0, %v1470_v56 }
 0x9ea   :  { %1490 = vrot.lane.b32.xlu0 %v1475_v25, %s3032_s12  ;;  %1484 = vrot.lane.b32.xlu2 %v1472_v26, %s3032_s12 }
 0x9eb   :  { %1486 = vrot.lane.b32.xlu1 %v1473_v36, %s3032_s12 }
 0x9f2   :  { %1513 = vperm.xlu0 %2891, %v3646_v59   ;;  %1488 = vrot.lane.b32.xlu2 %v1474_v31, %s3032_s12 }
 0x9f3   :  { %1492 = vrot.lane.b32.xlu1 %v1476_v40, %s3032_s12 }
 0x9fa   :  { %1494 = vrot.lane.b32.xlu2 %v1477_v28, %s3032_s12  ;;  %2893 = vset.pattern.permute.xlu0 %v3065_v12 }
 0x9fb   :  { %1517 = vperm.xlu1 %2892, %v3643_v3  }
 0xa03   :  { %2894 = vset.pattern.permute.xlu1 %v3065_v12 }
 0xa5c   :  { %v3901_v26 = vpop.permute.xlu0 %1490 }
 0xa5d   :  { %v3903_v36 = vpop.permute.xlu1 %1486 }
 0xa64   :  { %v1514_v25 = vpop.permute.xlu0 %1513 }
 0xa65   :  { %v3905_v62 = vpop.permute.xlu1 %1492  ;;  %v1520_v49 = vmul.f32 %v3682_v8, %v1514_v25  ;;  %v1521_v31 = vmul.f32 %v3688_v38, %v1514_v25  ;;  %v1522_v28 = vmul.f32 0.0, %v1514_v25 }
 0xa67   :  { %1534 = vrot.lane.b32.xlu1 %v1521_v31, %s3033_s17  ;;  %1532 = vrot.lane.b32.xlu2 %v1520_v49, %s3033_s17  ;;  %v3066_v49 = vmov 46  }
 0xa6d   :  { %v1518_v40 = vpop.permute.xlu1 %1517 }
 0xa6e   :  { %v1523_v56 = vmul.f32 %v3697_v5, %v1518_v40  ;;  %v1524_v12 = vmul.f32 %v3703_v48, %v1518_v40  ;;  %v1525_v50 = vmul.f32 0.0, %v1518_v40 }
 0xa6f   :  { %1536 = vrot.lane.b32.xlu2 %v1522_v28, %s3033_s17 }
 0xa70   :  { %1538 = vrot.lane.b32.xlu0 %v1523_v56, %s3033_s17  ;;  %1540 = vrot.lane.b32.xlu1 %v1524_v12, %s3033_s17 }
 0xa77   :  { %1542 = vrot.lane.b32.xlu2 %v1525_v50, %s3033_s17 }
 0xa78   :  { %1561 = vperm.xlu0 %2893, %v3646_v59   ;;  %1565 = vperm.xlu1 %2894, %v3643_v3  }
 0xa80   :  { %2895 = vset.pattern.permute.xlu0 %v3066_v49  ;;  %2896 = vset.pattern.permute.xlu1 %v3066_v49 }
 0xad9   :  { %v3919_v25 = vpop.permute.xlu1 %1534 }
 0xae2   :  { %v3921_v31 = vpop.permute.xlu1 %1540  ;;  %v3923_v16 = vpop.permute.xlu0 %1538 }
 0xaea   :  { %v1566_v28 = vpop.permute.xlu1 %1565  ;;  %v1562_v56 = vpop.permute.xlu0 %1561 }
 0xaeb   :  { %v1571_v12 = vmul.f32 %v3697_v5, %v1566_v28  ;;  %v1568_v40 = vmul.f32 %v3682_v8, %v1562_v56  ;;  %v1569_v50 = vmul.f32 %v3688_v38, %v1562_v56  ;;  %v1570_v49 = vmul.f32 0.0, %v1562_v56 }
 0xaec   :  { %v1572_v1 = vmul.f32 %v3703_v48, %v1566_v28  ;;  %v1573_v46 = vmul.f32 0.0, %v1566_v28 }
 0xaed   :  { %1586 = vrot.lane.b32.xlu0 %v1571_v12, %s3033_s17  ;;  %1580 = vrot.lane.b32.xlu2 %v1568_v40, %s3033_s17  ;;  %v3939_v12 = vpop.permute.xlu2 %1446 }
 0xaee   :  { %1582 = vrot.lane.b32.xlu1 %v1569_v50, %s3033_s17 }
 0xaf5   :  { %1609 = vperm.xlu0 %2895, %v3646_v59   ;;  %1584 = vrot.lane.b32.xlu2 %v1570_v49, %s3033_s17  ;;  %v1485_v40 = vpop.permute.xlu2 %1484 }
 0xaf6   :  { %1588 = vrot.lane.b32.xlu1 %v1572_v1, %s3033_s17  ;;  %v1496_v53 = vsel %vm137_vm0, %v1485_v40, %v3903_v36 }
 0xafd   :  { %1590 = vrot.lane.b32.xlu2 %v1573_v46, %s3033_s17  ;;  %v1489_v50 = vpop.permute.xlu2 %1488 }
 0xafe   :  { %1613 = vperm.xlu1 %2896, %v3643_v3  }
 0xb05   :  { %v1495_v56 = vpop.permute.xlu2 %1494 }
 0xb0d   :  { %v3941_v45 = vpop.permute.xlu2 %1532 }
 0xb15   :  { %v3943_v35 = vpop.permute.xlu2 %1536 }
 0xb1d   :  { %v3945_v1 = vpop.permute.xlu2 %1542 }
 0xb47   :  { %v1581_v63 = vpop.permute.xlu2 %1580 }
 0xb5f   :  { %v1587_v54 = vpop.permute.xlu0 %1586 }
 0xb60   :  { %v1583_v49 = vpop.permute.xlu1 %1582 }
 0xb67   :  { %v1610_v11 = vpop.permute.xlu0 %1609 }
 0xb68   :  { %v1589_v28 = vpop.permute.xlu1 %1588  ;;  %v1616_v46 = vmul.f32 %v3682_v8, %v1610_v11  ;;  %v1617_v51 = vmul.f32 %v3688_v38, %v1610_v11  ;;  %v1618_v9 = vmul.f32 0.0, %v1610_v11  ;;  %v1592_v11 = vsel %vm240_vm1, %v1581_v63, %v1583_v49 }
 0xb6a   :  { %1630 = vrot.lane.b32.xlu1 %v1617_v51, %s3035_s18  ;;  %1628 = vrot.lane.b32.xlu2 %v1616_v46, %s3035_s18  ;;  %v1411_v51 = vmul.f32 %v3682_v8, %v3855_v17  ;;  %v1410_v46 = vmul.f32 0.0, %v3855_v17 }
 0xb6c   :  { %v1506_v21 = vadd.f32 %v1485_v40, %v1410_v46  ;;  %v1507_v58 = vadd.f32 %v1496_v53, %v1411_v51  ;;  %v1498_v53 = vsel %vm137_vm0, %v3901_v26, %v3905_v62  ;;  %v1691_v46 = vld [vmem:[#allocation6 + $0x4] ss:$8 sm:$0x3] }
 0xb6e   :  { %v1602_v57 = vadd.f32 %v1581_v63, %v1506_v21  ;;  %v1603_v32 = vadd.f32 %v1592_v11, %v1507_v58  ;;  %v1413_v63 = vmul.f32 0.0, %v3857_v52  ;;  %v1594_v21 = vsel %vm240_vm1, %v1587_v54, %v1589_v28 }
 0xb70   :  { %v1614_v47 = vpop.permute.xlu1 %1613 }
 0xb71   :  { %v1619_v23 = vmul.f32 %v3697_v5, %v1614_v47  ;;  %v1620_v15 = vmul.f32 %v3703_v48, %v1614_v47  ;;  %v1621_v19 = vmul.f32 0.0, %v1614_v47  ;;  %v1414_v47 = vmul.f32 %v3697_v5, %v3857_v52 }
 0xb72   :  { %1632 = vrot.lane.b32.xlu2 %v1618_v9, %s3035_s18  ;;  %v1585_v9 = vpop.permute.xlu2 %1584 }
 0xb73   :  { %1634 = vrot.lane.b32.xlu0 %v1619_v23, %s3035_s18  ;;  %1636 = vrot.lane.b32.xlu1 %v1620_v15, %s3035_s18  ;;  %v1497_v15 = vsel %vm137_vm0, %v3903_v36, %v1489_v50  ;;  %v1412_v23 = vmul.f32 %v3688_v38, %v3855_v17  ;;  %v1499_v50 = vsel %vm137_vm0, %v3905_v62, %v1495_v56 }
 0xb75   :  { %v1508_v58 = vadd.f32 %v1497_v15, %v1412_v23 }
 0xb7a   :  { %1638 = vrot.lane.b32.xlu2 %v1621_v19, %s3035_s18  ;;  %v1593_v19 = vsel %vm240_vm1, %v1583_v49, %v1585_v9  ;;  %v1415_v49 = vmul.f32 %v3703_v48, %v3857_v52  ;;  %v1591_v51 = vpop.permute.xlu2 %1590  ;;  %v1693_v9 = vperm.slane %v1691_v46, 0  ;;  %v3068_v52 = vmov 12  }
 0xb7b   :  { %1662 = vrot.lane.b32.xlu0 %v1602_v57, %s3042_s19  ;;  %1664 = vrot.lane.b32.xlu1 %v1603_v32, %s3042_s19  ;;  %v1509_v57 = vadd.f32 %v3901_v26, %v1413_v63  ;;  %v1510_v32 = vadd.f32 %v1498_v53, %v1414_v47  ;;  %v1604_v36 = vadd.f32 %v1593_v19, %v1508_v58 }
 0xb7c   :  { %v1595_v26 = vsel %vm240_vm1, %v1589_v28, %v1591_v51  ;;  %v1511_v11 = vadd.f32 %v1499_v50, %v1415_v49  ;;  %2899 = vset.pattern.permute.xlu1 %v3068_v52  ;;  %v1398_v58 = vmul.f32 %v3688_v38, %v3853_v18 }
 0xb7d   :  { %v1605_v40 = vadd.f32 %v1587_v54, %v1509_v57  ;;  %v1606_v17 = vadd.f32 %v1594_v21, %v1510_v32  ;;  %v1694_v54 = vperm.slane %v1691_v46, 1  ;;  %v1448_v21 = vsel %vm137_vm0, %v3883_v10, %v3881_v7 }
 0xb7e   :  { %v1607_v15 = vadd.f32 %v1595_v26, %v1511_v11  ;;  %v1545_v57 = vsel %vm240_vm1, %v3919_v25, %v3943_v35  ;;  %v1460_v32 = vadd.f32 %v3937_v60, %v1398_v58  ;;  %v1544_v35 = vsel %vm240_vm1, %v3941_v45, %v3919_v25 }
 0xb7f   :  { %v1450_v25 = vsel %vm137_vm0, %v3887_v44, %v3885_v61  ;;  %v1451_v44 = vsel %vm137_vm0, %v3885_v61, %v3939_v12 }
 0xb80   :  { %v1556_v46 = vadd.f32 %v1545_v57, %v1460_v32  ;;  %v3069_v57 = vmov 5  }
 0xb81   :  { %2897 = vset.pattern.permute.xlu2 %v3069_v57  ;;  %2898 = vset.pattern.permute.xlu0 %v3069_v57 }
 0xb82   :  { %1666 = vrot.lane.b32.xlu2 %v1604_v36, %s3042_s19  ;;  %v1449_v36 = vsel %vm137_vm0, %v3881_v7, %v3937_v60  ;;  %v1401_v60 = vmul.f32 %v3703_v48, %v3879_v33 }
 0xb83   :  { %1668 = vrot.lane.b32.xlu0 %v1605_v40, %s3042_s19  ;;  %1670 = vrot.lane.b32.xlu1 %v1606_v17, %s3042_s19  ;;  %v1396_v40 = vmul.f32 0.0, %v3853_v18  ;;  %v1397_v17 = vmul.f32 %v3682_v8, %v3853_v18 }
 0xb85   :  { %v1458_v51 = vadd.f32 %v1448_v21, %v1396_v40  ;;  %v1459_v26 = vadd.f32 %v1449_v36, %v1397_v17  ;;  %v1546_v40 = vsel %vm240_vm1, %v3923_v16, %v3921_v31 }
 0xb87   :  { %v1554_v7 = vadd.f32 %v3941_v45, %v1458_v51  ;;  %v1399_v45 = vmul.f32 0.0, %v3879_v33 }
 0xb8a   :  { %1672 = vrot.lane.b32.xlu2 %v1607_v15, %s3042_s19  ;;  %v1555_v15 = vadd.f32 %v1544_v35, %v1459_v26 }
 0xb8b   :  { %1695 = vrot.lane.b32.xlu0 %v1693_v9, %s3067_s7  ;;  %1697 = vrot.lane.b32.xlu1 %v1694_v54, %s3067_s7  ;;  %v1400_v54 = vmul.f32 %v3697_v5, %v3879_v33 }
 0xbc4   :  { %v1629_v62 = vpop.permute.xlu2 %1628 }
 0xbc5   :  { %v1650_v58 = vadd.f32 %v1629_v62, %v1554_v7 }
 0xbcc   :  { %v1633_v23 = vpop.permute.xlu2 %1632 }
 0xbd4   :  { %v1639_v63 = vpop.permute.xlu2 %1638 }
 0xbdc   :  { %v1631_v56 = vpop.permute.xlu1 %1630  ;;  %v1667_v11 = vpop.permute.xlu2 %1666 }
 0xbdd   :  { %v1641_v50 = vsel %vm337_vm2, %v1631_v56, %v1633_v23  ;;  %v1640_v18 = vsel %vm337_vm2, %v1629_v62, %v1631_v56  ;;  %v1547_v56 = vsel %vm240_vm1, %v3921_v31, %v3945_v1 }
 0xbde   :  { %v1652_v9 = vadd.f32 %v1641_v50, %v1556_v46  ;;  %v1651_v32 = vadd.f32 %v1640_v18, %v1555_v15 }
 0xbe0   :  { %v1686_v62 = vadd.f32 %v1667_v11, %v1652_v9 }
 0xbe5   :  { %v1637_v53 = vpop.permute.xlu1 %1636  ;;  %v3987_v47 = vpop.permute.xlu0 %1634 }
 0xbe6   :  { %v1643_v33 = vsel %vm337_vm2, %v1637_v53, %v1639_v63  ;;  %v1673_v63 = vpop.permute.xlu2 %1672 }
 0xbed   :  { %v1665_v28 = vpop.permute.xlu1 %1664  ;;  %v1663_v19 = vpop.permute.xlu0 %1662 }
 0xbee   :  { %v1674_v23 = vsel %vm372_vm3, %v1663_v19, %v1665_v28  ;;  %v1675_v21 = vsel %vm372_vm3, %v1665_v28, %v1667_v11  ;;  %v1463_v19 = vadd.f32 %v3939_v12, %v1401_v60  ;;  %v1461_v28 = vadd.f32 %v1450_v25, %v1399_v45 }
 0xbef   :  { %v1684_v36 = vadd.f32 %v1674_v23, %v1650_v58  ;;  %v1685_v17 = vadd.f32 %v1675_v21, %v1651_v32  ;;  %v1462_v60 = vadd.f32 %v1451_v44, %v1400_v54  ;;  %v1642_v11 = vsel %vm337_vm2, %v3987_v47, %v1637_v53 }
 0xbf0   :  { %v1559_v51 = vadd.f32 %v1547_v56, %v1463_v19  ;;  %v1557_v61 = vadd.f32 %v3923_v16, %v1461_v28  ;;  %v3072_v45 = vmov 26  }
 0xbf1   :  { %v1558_v31 = vadd.f32 %v1546_v40, %v1462_v60 }
 0xbf2   :  { %v1655_v12 = vadd.f32 %v1643_v33, %v1559_v51  ;;  %v1653_v9 = vadd.f32 %v3987_v47, %v1557_v61  ;;  %v3071_v47 = vmov 19  }
 0xbf3   :  { %v1654_v16 = vadd.f32 %v1642_v11, %v1558_v31 }
 0xbf4   :  { %v1689_v15 = vadd.f32 %v1673_v63, %v1655_v12 }
 0xbf5   :  { %v1671_v49 = vpop.permute.xlu1 %1670  ;;  %v1669_v10 = vpop.permute.xlu0 %1668 }
 0xbf6   :  { %v1676_v18 = vsel %vm372_vm3, %v1669_v10, %v1671_v49  ;;  %v1677_v54 = vsel %vm372_vm3, %v1671_v49, %v1673_v63 }
 0xbf7   :  { %v1687_v23 = vadd.f32 %v1676_v18, %v1653_v9  ;;  %v1688_v25 = vadd.f32 %v1677_v54, %v1654_v16 }
 0xbfd   :  { %v1698_v50 = vpop.permute.xlu1 %1697  ;;  %v1696_v1 = vpop.permute.xlu0 %1695 }
 0xbfe   :  { %v1706_v35 = vmul.f32 %v1698_v50, %v1686_v62  ;;  %v1700_v46 = vsel %vm1699_vm4, %v1696_v1, %v1698_v50  ;;  %v1704_v26 = vmul.f32 %v1696_v1, %v1684_v36  ;;  %v1709_v53 = vmul.f32 %v1698_v50, %v1689_v15 }
 0xbff   :  { %v1705_v7 = vmul.f32 %v1700_v46, %v1685_v17  ;;  %v1707_v58 = vmul.f32 %v1696_v1, %v1687_v23  ;;  %v1708_v21 = vmul.f32 %v1700_v46, %v1688_v25 }
 0xc00   :  { %1720 = vrot.lane.b32.xlu1 %v1706_v35, %s3070_s8  ;;  %1716 = vrot.lane.b32.xlu2 %v1704_v26, %s3070_s8  ;;  %v3073_v35 = vmov 33  }
 0xc01   :  { %1718 = vrot.lane.b32.xlu0 %v1705_v7, %s3070_s8 }
 0xc08   :  { %1726 = vrot.lane.b32.xlu1 %v1709_v53, %s3070_s8  ;;  %1722 = vrot.lane.b32.xlu2 %v1707_v58, %s3070_s8 }
 0xc09   :  { %1724 = vrot.lane.b32.xlu0 %v1708_v21, %s3070_s8 }
 0xc10   :  { %1760 = vperm.xlu1 %2899, %v3646_v59   ;;  %1746 = vperm.xlu2 %2897, %v3646_v59  }
 0xc11   :  { %1750 = vperm.xlu0 %2898, %v3643_v3  }
 0xc18   :  { %2901 = vset.pattern.permute.xlu1 %v3071_v47  ;;  %2900 = vset.pattern.permute.xlu2 %v3068_v52 }
 0xc19   :  { %1774 = vperm.xlu1 %2901, %v3646_v59   ;;  %1764 = vperm.xlu2 %2900, %v3643_v3  }
 0xc1a   :  { %2903 = vset.pattern.permute.xlu0 %v3072_v45 }
 0xc21   :  { %2902 = vset.pattern.permute.xlu2 %v3071_v47  ;;  %2904 = vset.pattern.permute.xlu1 %v3072_v45 }
 0xc22   :  { %1778 = vperm.xlu2 %2902, %v3643_v3  }
 0xc5a   :  { %v4051_v49 = vpop.permute.xlu2 %1716 }
 0xc62   :  { %v4055_v57 = vpop.permute.xlu2 %1722 }
 0xc63   :  { %5110 = vst [vmem:[#allocation103_spill] sm:$0xff] %v4055_v57 }
 0xc6a   :  { %v4059_v32 = vpop.permute.xlu2 %1746 }
 0xc72   :  { %v4053_v10 = vpop.permute.xlu1 %1720 }
 0xc73   :  { %v4063_v19 = vpop.permute.xlu2 %1764  ;;  %v4077_v1 = vpop.permute.xlu0 %1718 }
 0xc7a   :  { %v4057_v56 = vpop.permute.xlu1 %1726 }
 0xc7b   :  { %5111 = vst [vmem:[#allocation104_spill] sm:$0xff] %v4057_v56  ;;  %v4079_v51 = vpop.permute.xlu0 %1724 }
 0xc7c   :  { %v1779_v40 = vpop.permute.xlu2 %1778  ;;  %5112 = vst [vmem:[#allocation105_spill] sm:$0xff] %v4079_v51 }
 0xc7d   :  { %v1785_v33 = vmul.f32 %v3697_v5, %v1779_v40  ;;  %v1786_v17 = vmul.f32 %v3703_v48, %v1779_v40  ;;  %v1784_v50 = vmul.f32 0.0, %v1779_v40  ;;  %v3075_v40 = vmov 41  }
 0xc7e   :  { %2909 = vset.pattern.permute.xlu2 %v3075_v40 }
 0xc82   :  { %v4061_v52 = vpop.permute.xlu1 %1760 }
 0xc83   :  { %v4081_v46 = vpop.permute.xlu0 %1750 }
 0xc84   :  { %v1757_v11 = vmul.f32 %v3697_v5, %v4081_v46  ;;  %v1756_v18 = vmul.f32 0.0, %v4081_v46 }
 0xc8b   :  { %v1775_v44 = vpop.permute.xlu1 %1774 }
 0xc8c   :  { %v1781_v62 = vmul.f32 0.0, %v1775_v44  ;;  %v1782_v36 = vmul.f32 %v3682_v8, %v1775_v44  ;;  %v1783_v28 = vmul.f32 %v3688_v38, %v1775_v44 }
 0xc8e   :  { %1795 = vrot.lane.b32.xlu1 %v1782_v36, %s3032_s12  ;;  %1797 = vrot.lane.b32.xlu2 %v1783_v28, %s3032_s12  ;;  %v3074_v36 = vmov 27  }
 0xc8f   :  { %1793 = vrot.lane.b32.xlu0 %v1781_v62, %s3032_s12 }
 0xc96   :  { %1803 = vrot.lane.b32.xlu2 %v1786_v17, %s3032_s12  ;;  %1801 = vrot.lane.b32.xlu1 %v1785_v33, %s3032_s12  ;;  %v3076_v33 = vmov 40  }
 0xc97   :  { %1799 = vrot.lane.b32.xlu0 %v1784_v50, %s3032_s12 }
 0xc9e   :  { %1826 = vperm.xlu1 %2904, %v3643_v3  }
 0xc9f   :  { %1822 = vperm.xlu0 %2903, %v3646_v59  }
 0xca6   :  { %2906 = vset.pattern.permute.xlu1 %v3073_v35 }
 0xca7   :  { %2905 = vset.pattern.permute.xlu0 %v3073_v35 }
 0xce8   :  { %v4083_v26 = vpop.permute.xlu2 %1797 }
 0xcf0   :  { %v4094_v31 = vpop.permute.xlu2 %1803 }
 0xd00   :  { %v1796_v60 = vpop.permute.xlu1 %1795 }
 0xd01   :  { %v4087_v7 = vsel %vm137_vm0, %v1796_v60, %v4083_v26  ;;  %v1794_v61 = vpop.permute.xlu0 %1793 }
 0xd02   :  { %v4090_v12 = vsel %vm137_vm0, %v1794_v61, %v1796_v60 }
 0xd08   :  { %v1802_v63 = vpop.permute.xlu1 %1801 }
 0xd09   :  { %v1808_v9 = vsel %vm137_vm0, %v1802_v63, %v4094_v31  ;;  %v1800_v54 = vpop.permute.xlu0 %1799 }
 0xd0a   :  { %v4099_v16 = vadd.f32 %v1808_v9, %v1757_v11  ;;  %v1807_v15 = vsel %vm137_vm0, %v1800_v54, %v1802_v63 }
 0xd0b   :  { %v4102_v23 = vadd.f32 %v1807_v15, %v1756_v18 }
 0xd10   :  { %v1827_v25 = vpop.permute.xlu1 %1826 }
 0xd11   :  { %v1832_v53 = vmul.f32 %v3697_v5, %v1827_v25  ;;  %v1823_v58 = vpop.permute.xlu0 %1822  ;;  %v1833_v45 = vmul.f32 %v3703_v48, %v1827_v25  ;;  %v1834_v62 = vmul.f32 0.0, %v1827_v25 }
 0xd12   :  { %v1829_v21 = vmul.f32 %v3682_v8, %v1823_v58  ;;  %v1830_v47 = vmul.f32 %v3688_v38, %v1823_v58  ;;  %v1831_v44 = vmul.f32 0.0, %v1823_v58  ;;  %v1753_v58 = vmul.f32 0.0, %v4059_v32 }
 0xd13   :  { %1847 = vrot.lane.b32.xlu0 %v1832_v53, %s3032_s12  ;;  %v3077_v53 = vmov 20  }
 0xd14   :  { %1843 = vrot.lane.b32.xlu1 %v1830_v47, %s3032_s12  ;;  %1841 = vrot.lane.b32.xlu2 %v1829_v21, %s3032_s12  ;;  %v1815_v21 = vadd.f32 %v4090_v12, %v1753_v58 }
 0xd1b   :  { %1870 = vperm.xlu0 %2905, %v3646_v59  }
 0xd1c   :  { %1849 = vrot.lane.b32.xlu1 %v1833_v45, %s3032_s12  ;;  %1845 = vrot.lane.b32.xlu2 %v1831_v44, %s3032_s12  ;;  %v3078_v44 = vmov 34  }
 0xd23   :  { %2907 = vset.pattern.permute.xlu0 %v3074_v36 }
 0xd24   :  { %1874 = vperm.xlu1 %2906, %v3643_v3   ;;  %1851 = vrot.lane.b32.xlu2 %v1834_v62, %s3032_s12 }
 0xd2c   :  { %2908 = vset.pattern.permute.xlu1 %v3076_v33 }
 0xd6e   :  { %v4116_v28 = vpop.permute.xlu2 %1841 }
 0xd76   :  { %v1846_v59 = vpop.permute.xlu2 %1845 }
 0xd85   :  { %v4118_v17 = vpop.permute.xlu0 %1847 }
 0xd86   :  { %v1844_v50 = vpop.permute.xlu1 %1843 }
 0xd87   :  { %v4122_v35 = vsel %vm137_vm0, %v4116_v28, %v1844_v50  ;;  %v4125_v3 = vsel %vm137_vm0, %v1844_v50, %v1846_v59  ;;  %v4166_v59 = vld [vmem:[%s4947_s0 + $0x8] sm:$0xff]  ;;  %v4173_v50 = vld [vmem:[%s4947_s0] sm:$0xff] }
 0xd88   :  { %v1755_v12 = vmul.f32 %v4166_v59, %v4059_v32 }
 0xd8d   :  { %v1871_v60 = vpop.permute.xlu0 %1870 }
 0xd8e   :  { %v4127_v61 = vpop.permute.xlu1 %1849  ;;  %v1877_v11 = vmul.f32 %v3682_v8, %v1871_v60  ;;  %v1878_v63 = vmul.f32 %v3688_v38, %v1871_v60  ;;  %v1879_v9 = vmul.f32 0.0, %v1871_v60  ;;  %v4144_v38 = vld [vmem:[#allocation3 + $0x8] sm:$0xff]  ;;  %v1754_v60 = vmul.f32 %v4173_v50, %v4059_v32 }
 0xd8f   :  { %v4134_v18 = vsel %vm137_vm0, %v4118_v17, %v4127_v61 }
 0xd90   :  { %1891 = vrot.lane.b32.xlu1 %v1878_v63, %s3033_s17  ;;  %1889 = vrot.lane.b32.xlu2 %v1877_v11, %s3033_s17  ;;  %v1817_v11 = vadd.f32 %v4083_v26, %v1755_v12  ;;  %v1816_v63 = vadd.f32 %v4087_v7, %v1754_v60 }
 0xd96   :  { %v1875_v54 = vpop.permute.xlu1 %1874 }
 0xd97   :  { %v1880_v15 = vmul.f32 %v3697_v5, %v1875_v54  ;;  %v1881_v25 = vmul.f32 %v3703_v48, %v1875_v54  ;;  %v1882_v8 = vmul.f32 0.0, %v1875_v54  ;;  %v4149_v5 = vld [vmem:[#allocation3] sm:$0xff]  ;;  %v4154_v48 = vpop.permute.xlu2 %1851 }
 0xd98   :  { %1893 = vrot.lane.b32.xlu2 %v1879_v9, %s3033_s17 }
 0xd99   :  { %1895 = vrot.lane.b32.xlu0 %v1880_v15, %s3033_s17  ;;  %1897 = vrot.lane.b32.xlu1 %v1881_v25, %s3033_s17 }
 0xda0   :  { %1899 = vrot.lane.b32.xlu2 %v1882_v8, %s3033_s17 }
 0xda1   :  { %2182 = vperm.xlu0 %2907, %v4144_v38   ;;  %1922 = vperm.xlu1 %2908, %v4144_v38  }
 0xda8   :  { %2278 = vperm.xlu2 %2909, %v4144_v38  }
 0xda9   :  { %2910 = vset.pattern.permute.xlu1 %v3074_v36  ;;  %2912 = vset.pattern.permute.xlu0 %v3075_v40  ;;  %v3079_v36 = vmov 13   ;;  %v3080_v40 = vmov 47  }
 0xdaa   :  { %2178 = vperm.xlu1 %2910, %v4149_v5   ;;  %2274 = vperm.xlu0 %2912, %v4149_v5  }
 0xdb0   :  { %2911 = vset.pattern.permute.xlu2 %v3076_v33 }
 0xdb1   :  { %1918 = vperm.xlu2 %2911, %v4149_v5  }
 0xdb2   :  { %2914 = vset.pattern.permute.xlu1 %v3079_v36  ;;  %2916 = vset.pattern.permute.xlu0 %v3080_v40 }
 0xdb9   :  { %2913 = vset.pattern.permute.xlu2 %v3077_v53 }
 0xdba   :  { %2134 = vperm.xlu2 %2913, %v4144_v38  }
 0xdc2   :  { %2915 = vset.pattern.permute.xlu2 %v3078_v44 }
 0xdc3   :  { %2230 = vperm.xlu2 %2915, %v4144_v38  }
 0xdea   :  { %v1890_v47 = vpop.permute.xlu2 %1889 }
 0xdeb   :  { %v4159_v45 = vadd.f32 %v1890_v47, %v1815_v21  ;;  %v4188_v21 = vld [vmem:[%s4947_s0 + $0x18] sm:$0xff] }
 0xdec   :  { %v1758_v32 = vmul.f32 %v4188_v21, %v4081_v46 }
 0xded   :  { %5113 = vst [vmem:[#allocation106_spill] sm:$0xff] %v4159_v45 }
 0xdee   :  { %v1820_v26 = vadd.f32 %v4094_v31, %v1758_v32  ;;  %v4208_v31 = vld [vmem:[%s4947_s0 + $0x10] sm:$0xff]  ;;  %v3081_v32 = vmov 48  }
 0xdf2   :  { %v1894_v62 = vpop.permute.xlu2 %1893 }
 0xdfa   :  { %v1900_v33 = vpop.permute.xlu2 %1899 }
 0xe02   :  { %v1892_v9 = vpop.permute.xlu1 %1891  ;;  %v2279_v54 = vpop.permute.xlu2 %2278 }
 0xe03   :  { %v1901_v15 = vsel %vm240_vm1, %v1890_v47, %v1892_v9  ;;  %v1902_v25 = vsel %vm240_vm1, %v1892_v9, %v1894_v62 }
 0xe04   :  { %v4181_v8 = vadd.f32 %v1901_v15, %v1816_v63  ;;  %v4183_v58 = vadd.f32 %v1902_v25, %v1817_v11 }
 0xe06   :  { %5114 = vst [vmem:[#allocation107_spill] sm:$0xff] %v4181_v8 }
 0xe07   :  { %5115 = vst [vmem:[#allocation108_spill] sm:$0xff] %v4183_v58 }
 0xe0b   :  { %v1898_v7 = vpop.permute.xlu1 %1897  ;;  %v1896_v44 = vpop.permute.xlu0 %1895 }
 0xe0c   :  { %v1904_v47 = vsel %vm240_vm1, %v1898_v7, %v1900_v33  ;;  %v1903_v62 = vsel %vm240_vm1, %v1896_v44, %v1898_v7  ;;  %v4196_v12 = vadd.f32 %v1896_v44, %v4102_v23  ;;  %v1919_v60 = vpop.permute.xlu2 %1918  ;;  %v2284_v7 = vmul.f32 %v4208_v31, %v2279_v54 }
 0xe0d   :  { %v4198_v11 = vadd.f32 %v1904_v47, %v1820_v26  ;;  %v4201_v63 = vadd.f32 %v1903_v62, %v4099_v16  ;;  %v1925_v9 = vmul.f32 %v4173_v50, %v1919_v60  ;;  %v2286_v47 = vmul.f32 0.0, %v2279_v54 }
 0xe0f   :  { %1937 = vrot.lane.b32.xlu1 %v1925_v9, %s3033_s17 }
 0xe13   :  { %v2183_v46 = vpop.permute.xlu0 %2182  ;;  %v1923_v16 = vpop.permute.xlu1 %1922 }
 0xe14   :  { %v2188_v33 = vmul.f32 %v4208_v31, %v2183_v46  ;;  %v2190_v23 = vmul.f32 0.0, %v2183_v46  ;;  %v1928_v15 = vmul.f32 %v4208_v31, %v1923_v16  ;;  %v2189_v25 = vmul.f32 %v4188_v21, %v2183_v46 }
 0xe15   :  { %v1930_v26 = vmul.f32 0.0, %v1923_v16  ;;  %v1929_v44 = vmul.f32 %v4188_v21, %v1923_v16  ;;  %v2285_v46 = vmul.f32 %v4188_v21, %v2279_v54  ;;  %v2135_v16 = vpop.permute.xlu2 %2134 }
 0xe16   :  { %2203 = vrot.lane.b32.xlu0 %v2188_v33, %s3032_s12  ;;  %2207 = vrot.lane.b32.xlu2 %v2190_v23, %s3032_s12  ;;  %v1926_v33 = vmul.f32 %v4166_v59, %v1919_v60 }
 0xe17   :  { %2120 = vperm.xlu1 %2914, %v4144_v38  }
 0xe1c   :  { %v2179_v62 = vpop.permute.xlu1 %2178 }
 0xe1d   :  { %v2187_v9 = vmul.f32 0.0, %v2179_v62  ;;  %v2185_v23 = vmul.f32 %v4173_v50, %v2179_v62 }
 0xe1e   :  { %1970 = vperm.xlu0 %2916, %v4144_v38   ;;  %1943 = vrot.lane.b32.xlu2 %v1928_v15, %s3033_s17 }
 0xe1f   :  { %2205 = vrot.lane.b32.xlu1 %v2189_v25, %s3032_s12  ;;  %v2140_v25 = vmul.f32 0.0, %v2135_v16 }
 0xe20   :  { %2917 = vset.pattern.permute.xlu1 %v3081_v32 }
 0xe26   :  { %2299 = vrot.lane.b32.xlu0 %v2284_v7, %s3033_s17  ;;  %1947 = vrot.lane.b32.xlu2 %v1930_v26, %s3033_s17  ;;  %v3082_v26 = vmov 6  }
 0xe27   :  { %2326 = vperm.xlu1 %2917, %v4144_v38   ;;  %2918 = vset.pattern.permute.xlu0 %v3077_v53  ;;  %v2186_v53 = vmul.f32 %v4166_v59, %v2179_v62 }
 0xe2e   :  { %2130 = vperm.xlu0 %2918, %v4149_v5   ;;  %2303 = vrot.lane.b32.xlu2 %v2286_v47, %s3033_s17 }
 0xe2f   :  { %1945 = vrot.lane.b32.xlu1 %v1929_v44, %s3033_s17  ;;  %v1927_v44 = vmul.f32 0.0, %v1919_v60 }
 0xe30   :  { %2919 = vset.pattern.permute.xlu1 %v3079_v36  ;;  %v2275_v36 = vpop.permute.xlu0 %2274 }
 0xe31   :  { %v2282_v54 = vmul.f32 %v4166_v59, %v2275_v36  ;;  %v2281_v15 = vmul.f32 %v4173_v50, %v2275_v36  ;;  %v2283_v47 = vmul.f32 0.0, %v2275_v36 }
 0xe36   :  { %2201 = vrot.lane.b32.xlu0 %v2187_v9, %s3032_s12  ;;  %2226 = vperm.xlu2 %2915, %v4149_v5   ;;  %v2141_v9 = vmul.f32 %v4208_v31, %v2135_v16 }
 0xe37   :  { %2301 = vrot.lane.b32.xlu1 %v2285_v46, %s3033_s17  ;;  %2923 = vset.pattern.permute.xlu0 %v3082_v26 }
 0xe3e   :  { %1939 = vrot.lane.b32.xlu0 %v1926_v33, %s3033_s17  ;;  %2199 = vrot.lane.b32.xlu2 %v2186_v53, %s3032_s12  ;;  %v1767_v33 = vmul.f32 0.0, %v4061_v52 }
 0xe3f   :  { %2116 = vperm.xlu1 %2919, %v4149_v5   ;;  %2921 = vset.pattern.permute.xlu2 %v3081_v32  ;;  %v2231_v32 = vpop.permute.xlu2 %2230 }
 0xe40   :  { %v2236_v7 = vmul.f32 %v4208_v31, %v2231_v32  ;;  %v2238_v62 = vmul.f32 0.0, %v2231_v32  ;;  %v2237_v60 = vmul.f32 %v4188_v21, %v2231_v32  ;;  %v1863_v36 = vadd.f32 %v4116_v28, %v1767_v33 }
 0xe41   :  { %v3083_v32 = vmov 0  }
 0xe46   :  { %2295 = vrot.lane.b32.xlu0 %v2282_v54, %s3033_s17  ;;  %2322 = vperm.xlu2 %2921, %v4149_v5  }
 0xe47   :  { %2197 = vrot.lane.b32.xlu1 %v2185_v23, %s3032_s12 }
 0xe48   :  { %2920 = vset.pattern.permute.xlu1 %v3080_v40  ;;  %v2142_v40 = vmul.f32 %v4188_v21, %v2135_v16 }
 0xe4e   :  { %2293 = vrot.lane.b32.xlu2 %v2281_v15, %s3033_s17  ;;  %2155 = vrot.lane.b32.xlu0 %v2140_v25, %s3032_s12 }
 0xe4f   :  { %1966 = vperm.xlu1 %2920, %v4149_v5   ;;  %2922 = vset.pattern.permute.xlu2 %v3082_v26 }
 0xe56   :  { %2251 = vrot.lane.b32.xlu0 %v2236_v7, %s3033_s17  ;;  %2106 = vperm.xlu2 %2922, %v4144_v38  }
 0xe57   :  { %1941 = vrot.lane.b32.xlu1 %v1927_v44, %s3033_s17 }
 0xe58   :  { %2926 = vset.pattern.permute.xlu1 %v3083_v32 }
 0xe5e   :  { %2159 = vrot.lane.b32.xlu2 %v2142_v40, %s3032_s12 }
 0xe5f   :  { %2297 = vrot.lane.b32.xlu1 %v2283_v47, %s3033_s17  ;;  %2925 = vset.pattern.permute.xlu2 %v3083_v32 }
 0xe66   :  { %2255 = vrot.lane.b32.xlu2 %v2238_v62, %s3033_s17 }
 0xe67   :  { %2157 = vrot.lane.b32.xlu1 %v2141_v9, %s3032_s12 }
 0xe6f   :  { %2253 = vrot.lane.b32.xlu1 %v2237_v60, %s3033_s17 }
 0xe70   :  { %v4258_v46 = vpop.permute.xlu2 %2207 }
 0xe78   :  { %v1944_v53 = vpop.permute.xlu2 %1943 }
 0xe80   :  { %v1948_v54 = vpop.permute.xlu2 %1947 }
 0xe81   :  { %v1938_v23 = vpop.permute.xlu1 %1937 }
 0xe82   :  { %v4262_v15 = vadd.f32 %v1938_v23, %v1863_v36 }
 0xe88   :  { %v4264_v16 = vpop.permute.xlu2 %2303  ;;  %v4266_v25 = vpop.permute.xlu0 %2203 }
 0xe89   :  { %v4268_v26 = vpop.permute.xlu1 %2120 }
 0xe90   :  { %v4270_v7 = vpop.permute.xlu2 %2226  ;;  %v1971_v44 = vpop.permute.xlu0 %1970 }
 0xe91   :  { %v1976_v40 = vmul.f32 %v4208_v31, %v1971_v44  ;;  %v4273_v47 = vpop.permute.xlu1 %2205  ;;  %v1977_v28 = vmul.f32 %v4188_v21, %v1971_v44  ;;  %v1978_v62 = vmul.f32 0.0, %v1971_v44  ;;  %v1770_v44 = vmul.f32 0.0, %v4063_v19 }
 0xe93   :  { %1991 = vrot.lane.b32.xlu0 %v1976_v40, %s3035_s18  ;;  %1993 = vrot.lane.b32.xlu1 %v1977_v28, %s3035_s18  ;;  %v1771_v40 = vmul.f32 %v4208_v31, %v4063_v19  ;;  %v1866_v28 = vadd.f32 %v4118_v17, %v1770_v44  ;;  %v1772_v17 = vmul.f32 %v4188_v21, %v4063_v19 }
 0xe94   :  { %1995 = vrot.lane.b32.xlu2 %v1978_v62, %s3035_s18  ;;  %v1768_v19 = vmul.f32 %v4173_v50, %v4061_v52 }
 0xe95   :  { %v1867_v45 = vadd.f32 %v4134_v18, %v1771_v40 }
 0xe98   :  { %v4279_v9 = vpop.permute.xlu0 %2299  ;;  %v4281_v60 = vpop.permute.xlu2 %2199 }
 0xe99   :  { %v2327_v33 = vpop.permute.xlu1 %2326 }
 0xe9a   :  { %v2332_v36 = vmul.f32 %v4208_v31, %v2327_v33  ;;  %v2333_v56 = vmul.f32 %v4188_v21, %v2327_v33  ;;  %v2334_v57 = vmul.f32 0.0, %v2327_v33  ;;  %v1962_v33 = vadd.f32 %v1944_v53, %v1866_v28 }
 0xe9c   :  { %2349 = vrot.lane.b32.xlu1 %v2333_v56, %s3035_s18  ;;  %2347 = vrot.lane.b32.xlu0 %v2332_v36, %s3035_s18 }
 0xe9d   :  { %2351 = vrot.lane.b32.xlu2 %v2334_v57, %s3035_s18  ;;  %v1856_v57 = vsel %vm137_vm0, %v4127_v61, %v4154_v48  ;;  %v2126_v61 = vmul.f32 0.0, %v4268_v26  ;;  %v1864_v48 = vadd.f32 %v4122_v35, %v1768_v19  ;;  %v2212_v35 = vsel %vm137_vm0, %v4273_v47, %v4258_v46 }
 0xe9e   :  { %v1868_v36 = vadd.f32 %v1856_v57, %v1772_v17 }
 0xea0   :  { %v2131_v62 = vpop.permute.xlu0 %2130  ;;  %v4292_v51 = vpop.permute.xlu2 %2322 }
 0xea1   :  { %v1946_v8 = vpop.permute.xlu1 %1945 }
 0xea2   :  { %v1951_v56 = vsel %vm240_vm1, %v1944_v53, %v1946_v8  ;;  %v1952_v18 = vsel %vm240_vm1, %v1946_v8, %v1948_v54  ;;  %v2139_v8 = vmul.f32 %v4166_v59, %v2131_v62 }
 0xea3   :  { %v1963_v58 = vadd.f32 %v1951_v56, %v1867_v45  ;;  %v2137_v45 = vmul.f32 0.0, %v2131_v62  ;;  %v1964_v28 = vadd.f32 %v1952_v18, %v1868_v36  ;;  %v2048_v18 = vld [vmem:[#allocation6 + $0x5] ss:$8 sm:$0x3] }
 0xea4   :  { %2025 = vrot.lane.b32.xlu1 %v1962_v33, %s3042_s19  ;;  %2102 = vperm.xlu0 %2923, %v4149_v5   ;;  %v2222_v33 = vadd.f32 %v4266_v25, %v2126_v61  ;;  %v2138_v61 = vmul.f32 %v4173_v50, %v2131_v62  ;;  %v2050_v46 = vperm.slane %v2048_v18, 0 }
 0xea5   :  { %2027 = vrot.lane.b32.xlu2 %v1963_v58, %s3042_s19 }
 0xea6   :  { %v2318_v57 = vadd.f32 %v4279_v9, %v2222_v33 }
 0xea8   :  { %v4305_v44 = vpop.permute.xlu0 %2201  ;;  %v4307_v53 = vpop.permute.xlu2 %2293 }
 0xea9   :  { %v2302_v40 = vpop.permute.xlu1 %2301 }
 0xeaa   :  { %v2308_v36 = vsel %vm240_vm1, %v2302_v40, %v4264_v16  ;;  %v2127_v16 = vmul.f32 %v4208_v31, %v4268_v26  ;;  %v2307_v62 = vsel %vm240_vm1, %v4279_v9, %v2302_v40 }
 0xeac   :  { %2029 = vrot.lane.b32.xlu1 %v1964_v28, %s3042_s19  ;;  %2924 = vset.pattern.permute.xlu0 %v3083_v32 }
 0xead   :  { %77 = vperm.xlu0 %2924, %v4149_v5   ;;  %2149 = vrot.lane.b32.xlu2 %v2137_v45, %s3032_s12 }
 0xeb0   :  { %v4317_v58 = vpop.permute.xlu0 %1939  ;;  %v4319_v54 = vpop.permute.xlu2 %2106 }
 0xeb1   :  { %v1949_v32 = vsel %vm240_vm1, %v1938_v23, %v4317_v58  ;;  %v4324_v56 = vpop.permute.xlu1 %2116  ;;  %v2114_v17 = vmul.f32 %v4188_v21, %v4319_v54  ;;  %v2128_v23 = vmul.f32 %v4188_v21, %v4268_v26 }
 0xeb2   :  { %v4326_v5 = vadd.f32 %v1949_v32, %v1864_v48 }
 0xeb3   :  { %v2224_v45 = vadd.f32 %v2212_v35, %v2128_v23  ;;  %v2234_v35 = vmul.f32 %v4166_v59, %v4270_v7  ;;  %v2051_v23 = vperm.slane %v2048_v18, 1  ;;  %v2113_v18 = vmul.f32 %v4208_v31, %v4319_v54 }
 0xeb4   :  { %2153 = vrot.lane.b32.xlu1 %v2139_v8, %s3032_s12  ;;  %v2211_v8 = vsel %vm137_vm0, %v4266_v25, %v4273_v47  ;;  %v2404_v25 = vld [vmem:[#allocation6 + $0x6] ss:$8 sm:$0x3] }
 0xeb5   :  { %82 = vperm.xlu0 %2924, %v4144_v38   ;;  %2381 = vrot.lane.b32.xlu2 %v2318_v57, %s3042_s19  ;;  %v2320_v48 = vadd.f32 %v2308_v36, %v2224_v45  ;;  %v2223_v33 = vadd.f32 %v2211_v8, %v2127_v16  ;;  %v2233_v57 = vmul.f32 %v4173_v50, %v4270_v7  ;;  %v2406_v26 = vperm.slane %v2404_v25, 0 }
 0xeb6   :  { %v2407_v9 = vperm.slane %v2404_v25, 1  ;;  %v2330_v8 = vmul.f32 %v4166_v59, %v4292_v51  ;;  %v2331_v16 = vmul.f32 0.0, %v4292_v51 }
 0xeb8   :  { %v2160_v28 = vpop.permute.xlu2 %2159  ;;  %v2296_v40 = vpop.permute.xlu0 %2295 }
 0xeb9   :  { %v4342_v19 = vpop.permute.xlu1 %2197  ;;  %v2176_v38 = vadd.f32 %v2160_v28, %v2114_v17  ;;  %v2319_v17 = vadd.f32 %v2307_v62, %v2223_v33 }
 0xebc   :  { %2385 = vrot.lane.b32.xlu1 %v2320_v48, %s3042_s19 }
 0xebd   :  { %2151 = vrot.lane.b32.xlu0 %v2138_v61, %s3032_s12  ;;  %2052 = vrot.lane.b32.xlu2 %v2050_v46, %s3084_s16  ;;  %s3085_s12 = smov 83   ;;  %v2235_v46 = vmul.f32 0.0, %v4270_v7 }
 0xec0   :  { %v4365_v48 = vpop.permute.xlu0 %2155 }
 0xec1   :  { %v1967_v32 = vpop.permute.xlu1 %1966 }
 0xec2   :  { %v1974_v36 = vmul.f32 %v4166_v59, %v1967_v32  ;;  %v1975_v45 = vmul.f32 0.0, %v1967_v32  ;;  %v1973_v62 = vmul.f32 %v4173_v50, %v1967_v32 }
 0xec4   :  { %2245 = vrot.lane.b32.xlu1 %v2233_v57, %s3033_s17 }
 0xec5   :  { %2383 = vrot.lane.b32.xlu0 %v2319_v17, %s3042_s19  ;;  %2247 = vrot.lane.b32.xlu2 %v2234_v35, %s3033_s17  ;;  %v1769_v35 = vmul.f32 %v4166_v59, %v4061_v52  ;;  %v2256_v17 = vpop.permute.xlu2 %2255 }
 0xec8   :  { %v4382_v25 = vpop.permute.xlu0 %2251 }
 0xec9   :  { %v1942_v47 = vpop.permute.xlu1 %1941 }
 0xeca   :  { %v1950_v32 = vsel %vm240_vm1, %v4317_v58, %v1942_v47 }
 0xecc   :  { %2408 = vrot.lane.b32.xlu1 %v2406_v26, %s3085_s12  ;;  %v1865_v26 = vadd.f32 %v4125_v3, %v1769_v35  ;;  %v2210_v3 = vsel %vm137_vm0, %v4281_v60, %v4305_v44 }
 0xecd   :  { %2054 = vrot.lane.b32.xlu0 %v2051_v23, %s3084_s16  ;;  %2410 = vrot.lane.b32.xlu2 %v2407_v9, %s3085_s12  ;;  %v2124_v9 = vmul.f32 %v4173_v50, %v4324_v56 }
 0xed1   :  { %v2298_v61 = vpop.permute.xlu1 %2297 }
 0xed4   :  { %1987 = vrot.lane.b32.xlu1 %v1974_v36, %s3035_s18 }
 0xed5   :  { %2249 = vrot.lane.b32.xlu0 %v2235_v46, %s3033_s17  ;;  %1989 = vrot.lane.b32.xlu2 %v1975_v45, %s3035_s18  ;;  %v2209_v45 = vsel %vm137_vm0, %v4342_v19, %v4281_v60  ;;  %v1961_v46 = vadd.f32 %v1950_v32, %v1865_v26  ;;  %s3086_s17 = smov 127  }
 0xed9   :  { %v4373_v33 = vpop.permute.xlu1 %2157 }
 0xeda   :  { %v2164_v7 = vsel %vm137_vm0, %v4373_v33, %v2160_v28  ;;  %v2329_v28 = vmul.f32 %v4173_v50, %v4292_v51  ;;  %v2125_v51 = vmul.f32 %v4166_v59, %v4324_v56 }
 0xedb   :  { %v2175_v57 = vadd.f32 %v2164_v7, %v2113_v18  ;;  %v2220_v18 = vadd.f32 %v2209_v45, %v2124_v9 }
 0xedc   :  { %2343 = vrot.lane.b32.xlu1 %v2330_v8, %s3035_s18  ;;  %v2306_v8 = vsel %vm240_vm1, %v2296_v40, %v2298_v61 }
 0xedd   :  { %1985 = vrot.lane.b32.xlu0 %v1973_v62, %s3035_s18  ;;  %2345 = vrot.lane.b32.xlu2 %v2331_v16, %s3035_s18  ;;  %v2221_v16 = vadd.f32 %v2210_v3, %v2125_v51 }
 0xedf   :  { %v2317_v7 = vadd.f32 %v2306_v8, %v2221_v16  ;;  %v138_v8 = vsel %vm137_vm0, %v3305_v42, %v3241_v0 }
 0xee1   :  { %v2254_v23 = vpop.permute.xlu1 %2253 }
 0xee2   :  { %v2260_v36 = vsel %vm240_vm1, %v2254_v23, %v2256_v17  ;;  %v2259_v52 = vsel %vm240_vm1, %v4382_v25, %v2254_v23 }
 0xee3   :  { %v2272_v58 = vadd.f32 %v2260_v36, %v2176_v38  ;;  %v4397_v47 = vadd.f32 %v2259_v52, %v2175_v57  ;;  %v2305_v38 = vsel %vm240_vm1, %v4307_v53, %v2296_v40 }
 0xee4   :  { %2021 = vrot.lane.b32.xlu1 %v4326_v5, %s3042_s19  ;;  %v2316_v62 = vadd.f32 %v2305_v38, %v2220_v18  ;;  %v2123_v5 = vmul.f32 0.0, %v4324_v56  ;;  %v139_v38 = vsel %vm137_vm0, %v3241_v0, %v3224_v55  ;;  %v373_v0 = vsel %vm372_vm3, %v3431_v34, %v3433_v37 }
 0xee5   :  { %2341 = vrot.lane.b32.xlu0 %v2329_v28, %s3035_s18  ;;  %2023 = vrot.lane.b32.xlu2 %v1961_v46, %s3042_s19  ;;  %v1729_v34 = vsel %vm1728_vm6, %v4051_v49, %v4077_v1  ;;  %v2112_v49 = vmul.f32 0.0, %v4319_v54  ;;  %s3087_s18 = smov 126  }
 0xee6   :  { %v2219_v60 = vadd.f32 %v4342_v19, %v2123_v5  ;;  %v241_v5 = vsel %vm240_vm1, %v3246_v2, %v3261_v13 }
 0xee8   :  { %v2315_v44 = vadd.f32 %v4307_v53, %v2219_v60  ;;  %v338_v60 = vsel %vm337_vm2, %v3271_v20, %v3277_v24 }
 0xeec   :  { %2377 = vrot.lane.b32.xlu1 %v2316_v62, %s3042_s19 }
 0xeed   :  { %2019 = vrot.lane.b32.xlu0 %v4262_v15, %s3042_s19  ;;  %2379 = vrot.lane.b32.xlu2 %v2317_v7, %s3042_s19 }
 0xeee   :  { %v1996_v57 = vpop.permute.xlu2 %1995 }
 0xef5   :  { %2375 = vrot.lane.b32.xlu0 %v2315_v44, %s3042_s19 }
 0xef7   :  { %v2352_v40 = vpop.permute.xlu2 %2351 }
 0xeff   :  { %v4419_v61 = vpop.permute.xlu2 %2027 }
 0xf05   :  { %v1992_v35 = vpop.permute.xlu0 %1991  ;;  %v1994_v56 = vpop.permute.xlu1 %1993 }
 0xf06   :  { %v2000_v17 = vsel %vm337_vm2, %v1994_v56, %v1996_v57  ;;  %v2010_v9 = vadd.f32 %v1992_v35, %v4196_v12 }
 0xf07   :  { %v2150_v32 = vpop.permute.xlu2 %2149  ;;  %v4423_v26 = vadd.f32 %v2000_v17, %v4198_v11 }
 0xf0e   :  { %v4425_v15 = vpop.permute.xlu1 %2349  ;;  %v4427_v28 = vpop.permute.xlu0 %2347 }
 0xf0f   :  { %v2356_v53 = vsel %vm337_vm2, %v4425_v15, %v2352_v40  ;;  %v2382_v19 = vpop.permute.xlu2 %2381 }
 0xf10   :  { %v4431_v23 = vadd.f32 %v2356_v53, %v2272_v58 }
 0xf16   :  { %v2026_v36 = vpop.permute.xlu1 %2025  ;;  %v4434_v52 = vpop.permute.xlu0 %2102 }
 0xf17   :  { %v2033_v45 = vsel %vm372_vm3, %v2026_v36, %v4419_v61  ;;  %v4438_v46 = vpop.permute.xlu2 %2052 }
 0xf18   :  { %v2044_v11 = vadd.f32 %v2033_v45, %v2010_v9 }
 0xf1a   :  { %v2064_v51 = vmul.f32 %v4438_v46, %v2044_v11 }
 0xf1c   :  { %2079 = vrot.lane.b32.xlu0 %v2064_v51, %s3070_s8 }
 0xf1e   :  { %v2030_v3 = vpop.permute.xlu1 %2029 }
 0xf1f   :  { %v4442_v18 = vpop.permute.xlu0 %77  ;;  %v4471_v9 = vpop.permute.xlu2 %2247 }
 0xf20   :  { %v85_v58 = vmul.f32 0.0, %v4442_v18  ;;  %v86_v12 = vmul.f32 %v4173_v50, %v4442_v18 }
 0xf22   :  { %v148_v16 = vadd.f32 %v138_v8, %v85_v58  ;;  %v149_v62 = vadd.f32 %v139_v38, %v86_v12  ;;  %v2109_v38 = vmul.f32 0.0, %v4434_v52 }
 0xf24   :  { %v251_v7 = vadd.f32 %v3246_v2, %v148_v16  ;;  %v252_v57 = vadd.f32 %v241_v5, %v149_v62  ;;  %v374_v2 = vsel %vm372_vm3, %v3433_v37, %v3443_v14  ;;  %v1730_v37 = vsel %vm1728_vm6, %v4077_v1, %v4053_v10 }
 0xf25   :  { %v2163_v1 = vsel %vm137_vm0, %v4365_v48, %v4373_v33  ;;  %v2034_v48 = vsel %vm372_vm3, %v4419_v61, %v2030_v3  ;;  %v1081_v33 = vmul.f32 0.0, %v3719_v4 }
 0xf26   :  { %v348_v44 = vadd.f32 %v3271_v20, %v251_v7  ;;  %v349_v40 = vadd.f32 %v338_v60, %v252_v57  ;;  %v4461_v17 = vpop.permute.xlu1 %2153  ;;  %v4475_v20 = vsel %vm397_vm5, %v3303_v41, %v3283_v29  ;;  %v2174_v7 = vadd.f32 %v2163_v1, %v2112_v49  ;;  %v5116_v1 = vld [vmem:[#allocation91_spill] sm:$0xff] }
 0xf27   :  { %v4466_v42 = vpop.permute.xlu0 %82  ;;  %v4500_v5 = vpop.permute.xlu2 %2410 }
 0xf28   :  { %v383_v53 = vadd.f32 %v373_v0, %v348_v44  ;;  %v384_v36 = vadd.f32 %v374_v2, %v349_v40  ;;  %v2270_v44 = vadd.f32 %v4382_v25, %v2174_v7  ;;  %v1999_v40 = vsel %vm337_vm2, %v1992_v35, %v1994_v56  ;;  %v5117_v7 = vld [vmem:[#allocation89_spill] sm:$0xff] }
 0xf29   :  { %v1132_v0 = vsel %vm137_vm0, %v3727_v22, %v3725_v39  ;;  %v2011_v2 = vadd.f32 %v1999_v40, %v4201_v63  ;;  %v2046_v25 = vadd.f32 %v2030_v3, %v4423_v26  ;;  %v1083_v26 = vmul.f32 %v4188_v21, %v3719_v4 }
 0xf2a   :  { %v402_v45 = vmul.f32 %v3303_v41, %v383_v53  ;;  %v403_v11 = vmul.f32 %v4475_v20, %v384_v36  ;;  %v2366_v54 = vadd.f32 %v4427_v28, %v2270_v44  ;;  %v1143_v56 = vadd.f32 %v1132_v0, %v1081_v33  ;;  %v5120_v0 = vld [vmem:[#allocation96_spill] sm:$0xff]  ;;  %v5121_v33 = vld [vmem:[#allocation102_spill] sm:$0xff] }
 0xf2b   :  { %v1348_v3 = vsel %vm372_vm3, %v3875_v43, %v3847_v6  ;;  %v1219_v44 = vsel %vm240_vm1, %v5117_v7, %v5116_v1 }
 0xf2c   :  { %v4485_v51 = vadd.f32 %v1729_v34, %v402_v45  ;;  %v4487_v58 = vadd.f32 %v1730_v37, %v403_v11  ;;  %v1229_v63 = vadd.f32 %v3769_v27, %v1143_v56  ;;  %v2355_v37 = vsel %vm337_vm2, %v4427_v28, %v4425_v15 }
 0xf2d   :  { %v2367_v40 = vadd.f32 %v2355_v37, %v4397_v47 }
 0xf2e   :  { %v2386_v12 = vpop.permute.xlu1 %2385 }
 0xf2f   :  { %v4490_v8 = vpop.permute.xlu0 %2151  ;;  %v1990_v53 = vpop.permute.xlu2 %1989 }
 0xf30   :  { %v2161_v16 = vsel %vm137_vm0, %v2150_v32, %v4490_v8 }
 0xf31   :  { %v4495_v62 = vadd.f32 %v2161_v16, %v2109_v38  ;;  %v1325_v38 = vadd.f32 %v3871_v30, %v1229_v63  ;;  %v2402_v16 = vadd.f32 %v2386_v12, %v4431_v23  ;;  %v1314_v63 = vsel %vm337_vm2, %v3871_v30, %v5120_v0 }
 0xf33   :  { %v1359_v43 = vadd.f32 %v1348_v3, %v1325_v38 }
 0xf35   :  { %v1379_v47 = vmul.f32 %v5121_v33, %v1359_v43  ;;  %v5124_v43 = vld [vmem:[#allocation108_spill] sm:$0xff] }
 0xf36   :  { %v4502_v57 = vpop.permute.xlu1 %2245 }
 0xf37   :  { %v2384_v60 = vpop.permute.xlu0 %2383 }
 0xf38   :  { %v2389_v32 = vsel %vm372_vm3, %v2382_v19, %v2384_v60  ;;  %v2045_v19 = vadd.f32 %v2034_v48, %v2011_v2  ;;  %v2390_v49 = vsel %vm372_vm3, %v2384_v60, %v2386_v12  ;;  %v1082_v12 = vmul.f32 %v4208_v31, %v3719_v4  ;;  %v5119_v60 = vld [vmem:[#allocation95_spill] sm:$0xff]  ;;  %v2346_v2 = vpop.permute.xlu2 %2345 }
 0xf39   :  { %v2400_v36 = vadd.f32 %v2389_v32, %v2366_v54  ;;  %v5118_v32 = vld [vmem:[#allocation86_spill] sm:$0xff]  ;;  %v1315_v48 = vsel %vm337_vm2, %v5120_v0, %v5119_v60 }
 0xf3a   :  { %v1145_v15 = vadd.f32 %v5118_v32, %v1083_v26  ;;  %v1133_v28 = vsel %vm137_vm0, %v3725_v39, %v5118_v32  ;;  %v1218_v39 = vsel %vm240_vm1, %v3769_v27, %v5117_v7  ;;  %v5122_v27 = vld [vmem:[#allocation99_spill] sm:$0xff] }
 0xf3b   :  { %v1349_v26 = vsel %vm372_vm3, %v3847_v6, %v5122_v27  ;;  %v2111_v6 = vmul.f32 %v4166_v59, %v4434_v52 }
 0xf3c   :  { %v1231_v56 = vadd.f32 %v1219_v44, %v1145_v15 }
 0xf3e   :  { %v4516_v35 = vpop.permute.xlu1 %2408  ;;  %v1327_v4 = vadd.f32 %v1315_v48, %v1231_v56 }
 0xf3f   :  { %v2420_v45 = vmul.f32 %v4516_v35, %v2400_v36  ;;  %v4519_v34 = vpop.permute.xlu0 %2054  ;;  %v4552_v54 = vsel %vm2412_vm8, %v4516_v35, %v4500_v5  ;;  %v2401_v36 = vadd.f32 %v2390_v49, %v2367_v40 }
 0xf40   :  { %v4523_v22 = vsel %vm2056_vm7, %v4438_v46, %v4519_v34  ;;  %v2066_v61 = vmul.f32 %v4519_v34, %v2046_v25  ;;  %v1361_v38 = vadd.f32 %v5122_v27, %v1327_v4  ;;  %v2024_v15 = vpop.permute.xlu2 %2023  ;;  %v5126_v27 = vld [vmem:[#allocation78_spill] sm:$0xff] }
 0xf41   :  { %v2065_v11 = vmul.f32 %v4523_v22, %v2045_v19  ;;  %2435 = vrot.lane.b32.xlu0 %v2420_v45, %s3070_s8  ;;  %v2422_v19 = vmul.f32 %v4500_v5, %v2402_v16  ;;  %v1144_v45 = vadd.f32 %v1133_v28, %v1082_v12  ;;  %v5123_v16 = vld [vmem:[#allocation100_spill] sm:$0xff]  ;;  %v2173_v12 = vadd.f32 %v4461_v17, %v2111_v6  ;;  %v5133_v6 = vld [vmem:[#allocation106_spill] sm:$0xff] }
 0xf42   :  { %2083 = vrot.lane.b32.xlu2 %v2066_v61, %s3070_s8  ;;  %v2421_v61 = vmul.f32 %v4552_v54, %v2401_v36  ;;  %v4578_v49 = vsel %vm1371_vm9, %v5121_v33, %v5123_v16  ;;  %v1381_v44 = vmul.f32 %v5123_v16, %v1361_v38 }
 0xf43   :  { %2081 = vrot.lane.b32.xlu1 %v2065_v11, %s3070_s8  ;;  %v1230_v11 = vadd.f32 %v1218_v39, %v1144_v45  ;;  %v2162_v39 = vsel %vm137_vm0, %v4490_v8, %v4461_v17 }
 0xf45   :  { %v1326_v3 = vadd.f32 %v1314_v63, %v1230_v11 }
 0xf46   :  { %v1988_v23 = vpop.permute.xlu1 %1987 }
 0xf47   :  { %v2250_v25 = vpop.permute.xlu0 %2249  ;;  %v1998_v37 = vsel %vm337_vm2, %v1988_v23, %v1990_v53  ;;  %v1360_v1 = vadd.f32 %v1349_v26, %v1326_v3  ;;  %v1080_v26 = vmul.f32 %v4166_v59, %v5126_v27  ;;  %v5131_v59 = vld [vmem:[#allocation93_spill] sm:$0xff] }
 0xf48   :  { %v2009_v40 = vadd.f32 %v1998_v37, %v5124_v43  ;;  %v2258_v53 = vsel %vm240_vm1, %v4471_v9, %v2250_v25  ;;  %v2380_v17 = vpop.permute.xlu2 %2379  ;;  %v5128_v37 = vld [vmem:[#allocation87_spill] sm:$0xff] }
 0xf49   :  { %2504 = vrot.lane.b32.xlu0 %v1379_v47, %s3086_s17  ;;  %v1380_v32 = vmul.f32 %v4578_v49, %v1360_v1  ;;  %v2269_v48 = vadd.f32 %v2258_v53, %v2173_v12  ;;  %v5125_v47 = vld [vmem:[#allocation107_spill] sm:$0xff] }
 0xf4a   :  { %2439 = vrot.lane.b32.xlu2 %v2422_v19, %s3070_s8  ;;  %v2043_v60 = vadd.f32 %v2024_v15, %v2009_v40 }
 0xf4b   :  { %2437 = vrot.lane.b32.xlu1 %v2421_v61, %s3070_s8 }
 0xf4c   :  { %v2063_v45 = vmul.f32 %v4519_v34, %v2043_v60  ;;  %v5127_v34 = vld [vmem:[#allocation90_spill] sm:$0xff] }
 0xf4d   :  { %v1217_v38 = vsel %vm240_vm1, %v5128_v37, %v5127_v34 }
 0xf4e   :  { %v2344_v30 = vpop.permute.xlu1 %2343 }
 0xf4f   :  { %v1986_v7 = vpop.permute.xlu0 %1985  ;;  %v2354_v0 = vsel %vm337_vm2, %v2344_v30, %v2346_v2  ;;  %v2257_v2 = vsel %vm240_vm1, %v4502_v57, %v4471_v9  ;;  %v1079_v9 = vmul.f32 %v4173_v50, %v5126_v27 }
 0xf50   :  { %v1997_v28 = vsel %vm337_vm2, %v1986_v7, %v1988_v23  ;;  %v2110_v23 = vmul.f32 %v4173_v50, %v4434_v52  ;;  %v2365_v61 = vadd.f32 %v2354_v0, %v2269_v48  ;;  %v2007_v53 = vadd.f32 %v1986_v7, %v5133_v6  ;;  %v5135_v7 = vld [vmem:[#allocation92_spill] sm:$0xff]  ;;  %v5144_v6 = vld [vmem:[#allocation43_spill] sm:$0xff] }
 0xf51   :  { %v2008_v36 = vadd.f32 %v1997_v28, %v5125_v47  ;;  %v5134_v47 = vld [vmem:[#allocation88_spill] sm:$0xff] }
 0xf52   :  { %2508 = vrot.lane.b32.xlu2 %v1381_v44, %s3086_s17  ;;  %v2172_v63 = vadd.f32 %v2162_v39, %v2110_v23  ;;  %v2399_v3 = vadd.f32 %v2380_v17, %v2365_v61 }
 0xf53   :  { %2506 = vrot.lane.b32.xlu1 %v1380_v32, %s3086_s17  ;;  %v5132_v32 = vld [vmem:[#allocation94_spill] sm:$0xff] }
 0xf54   :  { %v2268_v52 = vadd.f32 %v2257_v2, %v2172_v63  ;;  %v2419_v50 = vmul.f32 %v4500_v5, %v2399_v3  ;;  %v1312_v61 = vsel %vm337_vm2, %v5135_v7, %v5132_v32  ;;  %v5137_v2 = vld [vmem:[#allocation98_spill] sm:$0xff] }
 0xf56   :  { %v2022_v56 = vpop.permute.xlu1 %2021 }
 0xf57   :  { %v2032_v19 = vsel %vm372_vm3, %v2022_v56, %v2024_v15  ;;  %v2342_v25 = vpop.permute.xlu0 %2341  ;;  %v1313_v15 = vsel %vm337_vm2, %v5132_v32, %v5131_v59  ;;  %v5143_v32 = vld [vmem:[#allocation33_spill] sm:$0xff] }
 0xf58   :  { %v2042_v4 = vadd.f32 %v2032_v19, %v2008_v36  ;;  %v2353_v8 = vsel %vm337_vm2, %v2342_v25, %v2344_v30  ;;  %v5130_v30 = vld [vmem:[#allocation83_spill] sm:$0xff]  ;;  %v1216_v36 = vsel %vm240_vm1, %v5134_v47, %v5128_v37 }
 0xf59   :  { %v2364_v44 = vadd.f32 %v2353_v8, %v2268_v52  ;;  %v5138_v52 = vld [vmem:[#allocation84_spill] sm:$0xff] }
 0xf5a   :  { %v2062_v11 = vmul.f32 %v4523_v22, %v2042_v4  ;;  %2077 = vrot.lane.b32.xlu2 %v2063_v45, %s3070_s8  ;;  %v5129_v22 = vld [vmem:[#allocation85_spill] sm:$0xff] }
 0xf5b   :  { %v1142_v1 = vadd.f32 %v5129_v22, %v1080_v26  ;;  %v1131_v40 = vsel %vm137_vm0, %v5130_v30, %v5129_v22 }
 0xf5c   :  { %2075 = vrot.lane.b32.xlu1 %v2062_v11, %s3070_s8  ;;  %v1141_v19 = vadd.f32 %v1131_v40, %v1079_v9  ;;  %v2267_v11 = vadd.f32 %v4502_v57, %v4495_v62  ;;  %v5142_v40 = vld [vmem:[#allocation30_spill] sm:$0xff] }
 0xf5d   :  { %v1228_v60 = vadd.f32 %v1217_v38, %v1142_v1  ;;  %v1078_v38 = vmul.f32 0.0, %v5126_v27 }
 0xf5e   :  { %v2378_v43 = vpop.permute.xlu1 %2377  ;;  %v1227_v4 = vadd.f32 %v1216_v36, %v1141_v19  ;;  %v2363_v8 = vadd.f32 %v2342_v25, %v2267_v11 }
 0xf5f   :  { %v2388_v28 = vsel %vm372_vm3, %v2378_v43, %v2380_v17  ;;  %v2020_v12 = vpop.permute.xlu0 %2019  ;;  %v1324_v23 = vadd.f32 %v1313_v15, %v1228_v60 }
 0xf60   :  { %v2398_v0 = vadd.f32 %v2388_v28, %v2364_v44  ;;  %v2031_v48 = vsel %vm372_vm3, %v2020_v12, %v2022_v56  ;;  %v5136_v56 = vld [vmem:[#allocation97_spill] sm:$0xff] }
 0xf61   :  { %v2041_v39 = vadd.f32 %v2031_v48, %v2007_v53  ;;  %v1347_v63 = vsel %vm372_vm3, %v5137_v2, %v5136_v56  ;;  %v1358_v17 = vadd.f32 %v5136_v56, %v1324_v23  ;;  %v5145_v53 = vld [vmem:[#allocation44_spill] sm:$0xff]  ;;  %v5149_v23 = vld [vmem:[#allocation67_spill] sm:$0xff] }
 0xf62   :  { %v2418_v45 = vmul.f32 %v4552_v54, %v2398_v0  ;;  %2433 = vrot.lane.b32.xlu2 %v2419_v50, %s3070_s8  ;;  %v1323_v54 = vadd.f32 %v1312_v61, %v1227_v4  ;;  %v669_v28 = vsel %vm337_vm2, %v5145_v53, %v5144_v6  ;;  %v5146_v50 = vld [vmem:[#allocation48_spill] sm:$0xff]  ;;  %v5152_v4 = vld [vmem:[#allocation71_spill] sm:$0xff]  ;;  %v5162_v6 = vld [vmem:[#allocation54_spill] sm:$0xff] }
 0xf63   :  { %v2061_v5 = vmul.f32 %v4438_v46, %v2041_v39  ;;  %v1130_v46 = vsel %vm137_vm0, %v5138_v52, %v5130_v30  ;;  %v1378_v34 = vmul.f32 %v5123_v16, %v1358_v17  ;;  %v5139_v16 = vld [vmem:[#allocation101_spill] sm:$0xff]  ;;  %v5141_v30 = vld [vmem:[#allocation36_spill] sm:$0xff]  ;;  %v5156_v52 = vld [vmem:[#allocation27_spill] sm:$0xff] }
 0xf64   :  { %2431 = vrot.lane.b32.xlu1 %v2418_v45, %s3070_s8  ;;  %v1357_v3 = vadd.f32 %v1347_v63, %v1323_v54  ;;  %v1140_v57 = vadd.f32 %v1130_v46, %v1078_v38  ;;  %v1346_v1 = vsel %vm372_vm3, %v5139_v16, %v5137_v2  ;;  %v573_v59 = vsel %vm240_vm1, %v5142_v40, %v5141_v30  ;;  %v5150_v45 = vld [vmem:[#allocation61_spill] sm:$0xff]  ;;  %v5151_v61 = vld [vmem:[#allocation64_spill] sm:$0xff] }
 0xf65   :  { %2073 = vrot.lane.b32.xlu0 %v2061_v5, %s3070_s8  ;;  %v5153_v56 = vld [vmem:[#allocation72_spill] sm:$0xff]  ;;  %v477_v46 = vsel %vm137_vm0, %v5156_v52, %v5143_v32  ;;  %v5161_v30 = vld [vmem:[#allocation53_spill] sm:$0xff] }
 0xf66   :  { %v1377_v62 = vmul.f32 %v4578_v49, %v1357_v3  ;;  %v1226_v22 = vadd.f32 %v5134_v47, %v1140_v57  ;;  %v5148_v47 = vld [vmem:[#allocation49_spill] sm:$0xff]  ;;  %v997_v2 = vsel %vm337_vm2, %v5153_v56, %v5152_v4  ;;  %v5157_v3 = vld [vmem:[#allocation28_spill] sm:$0xff] }
 0xf67   :  { %v2376_v26 = vpop.permute.xlu0 %2375 }
 0xf68   :  { %v2387_v37 = vsel %vm372_vm3, %v2376_v26, %v2378_v43  ;;  %v1322_v27 = vadd.f32 %v5135_v7, %v1226_v22  ;;  %v5140_v43 = vld [vmem:[#allocation24_spill] sm:$0xff]  ;;  %v901_v7 = vsel %vm240_vm1, %v5150_v45, %v5149_v23 }
 0xf69   :  { %v2397_v9 = vadd.f32 %v2387_v37, %v2363_v8  ;;  %v5155_v8 = vld [vmem:[#allocation77_spill] sm:$0xff]  ;;  %v426_v37 = vmul.f32 %v4208_v31, %v5140_v43  ;;  %v425_v38 = vmul.f32 0.0, %v5140_v43 }
 0xf6a   :  { %2502 = vrot.lane.b32.xlu2 %v1378_v34, %s3086_s17  ;;  %v1356_v44 = vadd.f32 %v1346_v1, %v1322_v27  ;;  %v476_v34 = vsel %vm137_vm0, %v5157_v3, %v5156_v52  ;;  %v5159_v27 = vld [vmem:[#allocation51_spill] sm:$0xff] }
 0xf6b   :  { %v2417_v25 = vmul.f32 %v4516_v35, %v2397_v9  ;;  %v427_v35 = vmul.f32 %v4188_v21, %v5140_v43  ;;  %v488_v22 = vadd.f32 %v477_v46, %v426_v37  ;;  %v487_v16 = vadd.f32 %v476_v34, %v425_v38  ;;  %v5160_v43 = vld [vmem:[#allocation47_spill] sm:$0xff] }
 0xf6c   :  { %2500 = vrot.lane.b32.xlu1 %v1377_v62, %s3086_s17  ;;  %v1376_v49 = vmul.f32 %v5121_v33, %v1356_v44  ;;  %v5147_v33 = vld [vmem:[#allocation55_spill] sm:$0xff]  ;;  %v668_v44 = vsel %vm337_vm2, %v5159_v27, %v5145_v53  ;;  %v726_v53 = vsel %vm725_vm10, %v5162_v6, %v5148_v47 }
 0xf6d   :  { %2429 = vrot.lane.b32.xlu0 %v2417_v25, %s3070_s8  ;;  %v489_v15 = vadd.f32 %v5143_v32, %v427_v35  ;;  %v755_v48 = vmul.f32 %v4188_v21, %v5147_v33  ;;  %v5154_v21 = vld [vmem:[#allocation76_spill] sm:$0xff]  ;;  %v5158_v62 = vld [vmem:[#allocation31_spill] sm:$0xff] }
 0xf6e   :  { %v572_v57 = vsel %vm240_vm1, %v5158_v62, %v5142_v40  ;;  %v702_v40 = vsel %vm372_vm3, %v5161_v30, %v5160_v43  ;;  %v5166_v3 = vld [vmem:[#allocation79_spill] sm:$0xff] }
 0xf6f   :  { %v585_v12 = vadd.f32 %v573_v59, %v489_v15  ;;  %v817_v5 = vadd.f32 %v5151_v61, %v755_v48  ;;  %v584_v35 = vadd.f32 %v572_v57, %v488_v22  ;;  %v703_v59 = vsel %vm372_vm3, %v5160_v43, %v5146_v50  ;;  %v5167_v38 = vld [vmem:[#allocation75_spill] sm:$0xff]  ;;  %v5171_v43 = vld [vmem:[#allocation25_spill] sm:$0xff] }
 0xf70   :  { %v996_v34 = vsel %vm337_vm2, %v5166_v3, %v5153_v56 }
 0xf71   :  { %v681_v60 = vadd.f32 %v669_v28, %v585_v12  ;;  %v913_v63 = vadd.f32 %v901_v7, %v817_v5  ;;  %v680_v15 = vadd.f32 %v668_v44, %v584_v35  ;;  %v5170_v35 = vld [vmem:[#allocation32_spill] sm:$0xff] }
 0xf73   :  { %v715_v0 = vadd.f32 %v5146_v50, %v681_v60  ;;  %v1009_v11 = vadd.f32 %v997_v2, %v913_v63  ;;  %v714_v12 = vadd.f32 %v703_v59, %v680_v15  ;;  %v5163_v50 = vld [vmem:[#allocation58_spill] sm:$0xff]  ;;  %v5164_v2 = vld [vmem:[#allocation59_spill] sm:$0xff]  ;;  %v2939_v59 = vld [vmem:[%s4947_s0] sm:$0xff] }
 0xf74   :  { %v805_v4 = vsel %vm137_vm0, %v5163_v50, %v5151_v61  ;;  %v804_v63 = vsel %vm137_vm0, %v5164_v2, %v5163_v50  ;;  %v5176_v50 = vld [vmem:[#allocation40_spill] sm:$0xff] }
 0xf75   :  { %2498 = vrot.lane.b32.xlu0 %v1376_v49, %s3086_s17  ;;  %v735_v36 = vmul.f32 %v5148_v47, %v715_v0  ;;  %v1043_v17 = vadd.f32 %v5154_v21, %v1009_v11  ;;  %v583_v49 = vadd.f32 %v5158_v62, %v487_v16  ;;  %v734_v48 = vmul.f32 %v726_v53, %v714_v12  ;;  %v5168_v62 = vld [vmem:[#allocation81_spill] sm:$0xff]  ;;  %v5169_v16 = vld [vmem:[#allocation82_spill] sm:$0xff] }
 0xf76   :  { %v754_v11 = vmul.f32 %v4208_v31, %v5147_v33  ;;  %v5174_v12 = vld [vmem:[#allocation34_spill] sm:$0xff] }
 0xf77   :  { %v1063_v26 = vmul.f32 %v5155_v8, %v1043_v17  ;;  %v679_v32 = vadd.f32 %v5159_v27, %v583_v49  ;;  %v753_v17 = vmul.f32 0.0, %v5147_v33 }
 0xf78   :  { %v816_v52 = vadd.f32 %v805_v4, %v754_v11 }
 0xf79   :  { %v713_v28 = vadd.f32 %v702_v40, %v679_v32  ;;  %v815_v46 = vadd.f32 %v804_v63, %v753_v17  ;;  %v5172_v32 = vld [vmem:[#allocation20_spill] sm:$0xff]  ;;  %v5177_v17 = vld [vmem:[#allocation45_spill] sm:$0xff] }
 0xf7a   :  { %v423_v15 = vmul.f32 %v2939_v59, %v5172_v32 }
 0xf7b   :  { %v733_v0 = vmul.f32 %v5162_v6, %v713_v28  ;;  %v5173_v28 = vld [vmem:[#allocation29_spill] sm:$0xff] }
 0xf8e   :  { %v2080_v60 = vpop.permute.xlu0 %2079 }
 0xf9c   :  { %v2084_v39 = vpop.permute.xlu2 %2083 }
 0xf9d   :  { %v2100_v19 = vadd.f32 %v2084_v39, %v735_v36 }
 0xf9f   :  { %2473 = vrot.lane.b32.xlu2 %v2100_v19, %s3086_s17 }
 0xfa4   :  { %v2440_v54 = vpop.permute.xlu2 %2439 }
 0xfa5   :  { %v2456_v9 = vadd.f32 %v2440_v54, %v1063_v26 }
 0xfac   :  { %v4695_v25 = vpop.permute.xlu2 %2508 }
 0xfad   :  { %v2525_v1 = vadd.f32 %v4695_v25, %v2456_v9  ;;  %v1031_v9 = vsel %vm372_vm3, %v5167_v38, %v5154_v21  ;;  %v475_v21 = vsel %vm137_vm0, %v5171_v43, %v5170_v35 }
 0xfaf   :  { %2542 = vrot.lane.b32.xlu2 %v2525_v1, %s3087_s18  ;;  %v4742_v1 = vsel %vm1053_vm11, %v5169_v16, %v5155_v8 }
 0xfb3   :  { %v2436_v61 = vpop.permute.xlu0 %2435 }
 0xfb5   :  { %v2082_v36 = vpop.permute.xlu1 %2081 }
 0xfb6   :  { %v2087_v19 = vsel %vm1728_vm6, %v2080_v60, %v2082_v36  ;;  %v2088_v23 = vsel %vm1728_vm6, %v2082_v36, %v2084_v39  ;;  %v5165_v39 = vld [vmem:[#allocation62_spill] sm:$0xff]  ;;  %v570_v60 = vsel %vm240_vm1, %v5174_v12, %v5173_v28 }
 0xfb7   :  { %v2098_v7 = vadd.f32 %v2087_v19, %v733_v0  ;;  %v2099_v5 = vadd.f32 %v2088_v23, %v734_v48  ;;  %v900_v26 = vsel %vm240_vm1, %v5165_v39, %v5150_v45  ;;  %v911_v37 = vadd.f32 %v5165_v39, %v815_v46  ;;  %v5178_v39 = vld [vmem:[#allocation46_spill] sm:$0xff]  ;;  %v2078_v46 = vpop.permute.xlu2 %2077 }
 0xfb8   :  { %v912_v31 = vadd.f32 %v900_v26, %v816_v52  ;;  %v1030_v45 = vsel %vm372_vm3, %v5168_v62, %v5167_v38  ;;  %v485_v19 = vadd.f32 %v475_v21, %v423_v15  ;;  %v701_v26 = vsel %vm372_vm3, %v5178_v39, %v5177_v17  ;;  %v5185_v15 = vld [vmem:[#allocation65_spill] sm:$0xff] }
 0xfb9   :  { %2471 = vrot.lane.b32.xlu1 %v2099_v5, %s3086_s17  ;;  %2469 = vrot.lane.b32.xlu0 %v2098_v7, %s3086_s17  ;;  %v1007_v57 = vadd.f32 %v5166_v3, %v911_v37  ;;  %v5175_v5 = vld [vmem:[#allocation42_spill] sm:$0xff] }
 0xfba   :  { %v1008_v22 = vadd.f32 %v996_v34, %v912_v31  ;;  %v666_v4 = vsel %vm337_vm2, %v5176_v50, %v5175_v5  ;;  %v581_v11 = vadd.f32 %v570_v60, %v485_v19  ;;  %v422_v34 = vmul.f32 0.0, %v5172_v32  ;;  %v5186_v60 = vld [vmem:[#allocation35_spill] sm:$0xff]  ;;  %v5187_v19 = vld [vmem:[#allocation70_spill] sm:$0xff] }
 0xfbb   :  { %v1041_v27 = vadd.f32 %v1030_v45, %v1007_v57  ;;  %v5180_v57 = vld [vmem:[#allocation63_spill] sm:$0xff] }
 0xfbc   :  { %v1042_v56 = vadd.f32 %v1031_v9, %v1008_v22  ;;  %v677_v52 = vadd.f32 %v666_v4, %v581_v11  ;;  %v5181_v22 = vld [vmem:[#allocation56_spill] sm:$0xff]  ;;  %v5190_v11 = vld [vmem:[#allocation73_spill] sm:$0xff] }
 0xfbd   :  { %v2438_v33 = vpop.permute.xlu1 %2437  ;;  %v1061_v30 = vmul.f32 %v5169_v16, %v1041_v27  ;;  %v5182_v27 = vld [vmem:[#allocation52_spill] sm:$0xff] }
 0xfbe   :  { %v2443_v44 = vsel %vm1728_vm6, %v2436_v61, %v2438_v33  ;;  %v2444_v49 = vsel %vm1728_vm6, %v2438_v33, %v2440_v54  ;;  %v1062_v40 = vmul.f32 %v4742_v1, %v1042_v56  ;;  %v2505_v54 = vpop.permute.xlu0 %2504  ;;  %v5179_v61 = vld [vmem:[#allocation26_spill] sm:$0xff]  ;;  %v711_v3 = vadd.f32 %v701_v26, %v677_v52  ;;  %v2562_v33 = vld [vmem:[%s4949_s2 + $0x8] sm:$0xff] }
 0xfbf   :  { %v2454_v0 = vadd.f32 %v2443_v44, %v1061_v30  ;;  %v803_v56 = vsel %vm137_vm0, %v5181_v22, %v5180_v57  ;;  %v5183_v44 = vld [vmem:[#allocation50_spill] sm:$0xff] }
 0xfc0   :  { %v2455_v48 = vadd.f32 %v2444_v49, %v1062_v40  ;;  %v731_v37 = vmul.f32 %v726_v53, %v711_v3  ;;  %v700_v53 = vsel %vm372_vm3, %v5182_v27, %v5178_v39  ;;  %v751_v49 = vmul.f32 %v2939_v59, %v5183_v44  ;;  %v5184_v40 = vld [vmem:[#allocation60_spill] sm:$0xff]  ;;  %v5191_v39 = vld [vmem:[#allocation74_spill] sm:$0xff] }
 0xfc1   :  { %v571_v59 = vsel %vm240_vm1, %v5173_v28, %v5186_v60  ;;  %v1029_v28 = vsel %vm372_vm3, %v5191_v39, %v5190_v11 }
 0xfc5   :  { %v2507_v36 = vpop.permute.xlu1 %2506 }
 0xfc6   :  { %v2512_v23 = vsel %vm2475_vm12, %v2505_v54, %v2507_v36  ;;  %v2513_v7 = vsel %vm2475_vm12, %v2507_v36, %v4695_v25  ;;  %v474_v25 = vsel %vm137_vm0, %v5179_v61, %v5171_v43  ;;  %v4789_v43 = vld [vmem:[%s4947_s0 + $0x8] sm:$0xff]  ;;  %v813_v54 = vadd.f32 %v803_v56, %v751_v49 }
 0xfc7   :  { %v2523_v2 = vadd.f32 %v2512_v23, %v2454_v0  ;;  %v2524_v63 = vadd.f32 %v2513_v7, %v2455_v48  ;;  %v484_v38 = vadd.f32 %v474_v25, %v422_v34  ;;  %v424_v21 = vmul.f32 %v4789_v43, %v5172_v32  ;;  %v2434_v0 = vpop.permute.xlu2 %2433  ;;  %v5188_v23 = vld [vmem:[#allocation68_spill] sm:$0xff]  ;;  %v5189_v32 = vld [vmem:[#allocation41_spill] sm:$0xff] }
 0xfc8   :  { %v994_v7 = vsel %vm337_vm2, %v5188_v23, %v5187_v19  ;;  %v752_v3 = vmul.f32 %v4789_v43, %v5183_v44 }
 0xfc9   :  { %2540 = vrot.lane.b32.xlu1 %v2524_v63, %s3087_s18  ;;  %2538 = vrot.lane.b32.xlu0 %v2523_v2, %s3087_s18  ;;  %v580_v45 = vadd.f32 %v5174_v12, %v484_v38  ;;  %v898_v12 = vsel %vm240_vm1, %v5185_v15, %v5184_v40  ;;  %v486_v48 = vadd.f32 %v5170_v35, %v424_v21 }
 0xfca   :  { %v909_v4 = vadd.f32 %v898_v12, %v813_v54  ;;  %v5195_v54 = vld [vmem:[#allocation80_spill] sm:$0xff] }
 0xfcb   :  { %v676_v30 = vadd.f32 %v5176_v50, %v580_v45  ;;  %v667_v50 = vsel %vm337_vm2, %v5175_v5, %v5189_v32  ;;  %v582_v63 = vadd.f32 %v571_v59, %v486_v48  ;;  %v5192_v5 = vld [vmem:[#allocation57_spill] sm:$0xff]  ;;  %v1028_v48 = vsel %vm372_vm3, %v5195_v54, %v5191_v39 }
 0xfcc   :  { %v1005_v35 = vadd.f32 %v994_v7, %v909_v4  ;;  %v5194_v45 = vld [vmem:[#allocation69_spill] sm:$0xff] }
 0xfcd   :  { %v710_v36 = vadd.f32 %v700_v53, %v676_v30  ;;  %v678_v25 = vadd.f32 %v667_v50, %v582_v63  ;;  %v995_v56 = vsel %vm337_vm2, %v5187_v19, %v5194_v45  ;;  %v5202_v45 = vld [vmem:[#allocation18_spill] sm:$0xff] }
 0xfce   :  { %v2076_v31 = vpop.permute.xlu1 %2075 }
 0xfcf   :  { %v2086_v9 = vsel %vm1728_vm6, %v2076_v31, %v2078_v46  ;;  %v730_v26 = vmul.f32 %v5162_v6, %v710_v36  ;;  %v814_v6 = vadd.f32 %v5180_v57, %v752_v3  ;;  %v712_v49 = vadd.f32 %v5177_v17, %v678_v25  ;;  %v2503_v21 = vpop.permute.xlu2 %2502 }
 0xfd0   :  { %v2096_v62 = vadd.f32 %v2086_v9, %v731_v37  ;;  %v802_v37 = vsel %vm137_vm0, %v5192_v5, %v5181_v22  ;;  %v1039_v9 = vadd.f32 %v1029_v28, %v1005_v35 }
 0xfd1   :  { %2570 = vperm.xlu0 %2924, %v2562_v33   ;;  %v5193_v33 = vld [vmem:[#allocation66_spill] sm:$0xff]  ;;  %v732_v12 = vmul.f32 %v5148_v47, %v712_v49 }
 0xfd2   :  { %2465 = vrot.lane.b32.xlu2 %v2096_v62, %s3086_s17  ;;  %v899_v38 = vsel %vm240_vm1, %v5184_v40, %v5193_v33  ;;  %v750_v62 = vmul.f32 0.0, %v5183_v44  ;;  %v1059_v27 = vmul.f32 %v4742_v1, %v1039_v9  ;;  %v5200_v33 = vld [vmem:[#allocation22_spill] sm:$0xff]  ;;  %v5201_v9 = vld [vmem:[#allocation15_spill] sm:$0xff] }
 0xfd3   :  { %v910_v53 = vadd.f32 %v899_v38, %v814_v6  ;;  %v2097_v19 = vadd.f32 %v2078_v46, %v732_v12  ;;  %v5206_v12 = vld [vmem:[#allocation37_spill] sm:$0xff] }
 0xfd4   :  { %v812_v22 = vadd.f32 %v802_v37, %v750_v62  ;;  %v5199_v37 = vld [vmem:[#allocation16_spill] sm:$0xff] }
 0xfd5   :  { %v1006_v44 = vadd.f32 %v995_v56, %v910_v53  ;;  %v243_v38 = vsel %vm240_vm1, %v5200_v33, %v5199_v37  ;;  %v5203_v56 = vld [vmem:[#allocation23_spill] sm:$0xff] }
 0xfd6   :  { %v2432_v2 = vpop.permute.xlu1 %2431  ;;  %v908_v57 = vadd.f32 %v5185_v15, %v812_v22  ;;  %v5204_v22 = vld [vmem:[#allocation19_spill] sm:$0xff] }
 0xfd7   :  { %v2074_v52 = vpop.permute.xlu0 %2073  ;;  %v1040_v17 = vadd.f32 %v5190_v11, %v1006_v44  ;;  %v2561_v11 = vld [vmem:[%s4949_s2] sm:$0xff]  ;;  %v341_v53 = vsel %vm337_vm2, %v5202_v45, %v5204_v22  ;;  %v5205_v44 = vld [vmem:[#allocation38_spill] sm:$0xff] }
 0xfd8   :  { %v2085_v61 = vsel %vm1728_vm6, %v2074_v52, %v2076_v31  ;;  %v2442_v31 = vsel %vm1728_vm6, %v2432_v2, %v2434_v0  ;;  %v1004_v36 = vadd.f32 %v5188_v23, %v908_v57  ;;  %v5197_v52 = vld [vmem:[#allocation13_spill] sm:$0xff] }
 0xfd9   :  { %v2095_v34 = vadd.f32 %v2085_v61, %v730_v26  ;;  %v2452_v30 = vadd.f32 %v2442_v31, %v1059_v27  ;;  %v1060_v15 = vmul.f32 %v5155_v8, %v1040_v17  ;;  %v88_v8 = vmul.f32 0.0, %v4466_v42  ;;  %v5196_v26 = vld [vmem:[#allocation12_spill] sm:$0xff]  ;;  %v5198_v61 = vld [vmem:[#allocation21_spill] sm:$0xff] }
 0xfda   :  { %v1038_v7 = vadd.f32 %v1028_v48, %v1004_v36  ;;  %v141_v35 = vsel %vm137_vm0, %v5197_v52, %v5196_v26  ;;  %v140_v25 = vsel %vm137_vm0, %v5198_v61, %v5197_v52  ;;  %v340_v27 = vsel %vm337_vm2, %v5203_v56, %v5202_v45  ;;  %v5211_v45 = vld [vmem:[#allocation14_spill] sm:$0xff] }
 0xfdb   :  { %2463 = vrot.lane.b32.xlu1 %v2095_v34, %s3086_s17  ;;  %v2453_v50 = vadd.f32 %v2434_v0, %v1060_v15  ;;  %v151_v3 = vadd.f32 %v140_v25, %v88_v8  ;;  %vm2625_vm0 = vcmask 64512  }
 0xfdc   :  { %v1058_v32 = vmul.f32 %v5169_v16, %v1038_v7  ;;  %v2941_v16 = vld [vmem:[%s4947_s0 + $0x10] sm:$0xff] }
 0xfdd   :  { %v2522_v23 = vadd.f32 %v2503_v21, %v2453_v50  ;;  %v89_v0 = vmul.f32 %v2941_v16, %v4466_v42  ;;  %v254_v6 = vadd.f32 %v5200_v33, %v151_v3  ;;  %v5208_v50 = vld [vmem:[#allocation105_spill] sm:$0xff] }
 0xfde   :  { %v2501_v40 = vpop.permute.xlu1 %2500 }
 0xfdf   :  { %v2511_v60 = vsel %vm2475_vm12, %v2501_v40, %v2503_v21  ;;  %v2430_v59 = vpop.permute.xlu0 %2429  ;;  %v152_v34 = vadd.f32 %v141_v35, %v89_v0  ;;  %v351_v49 = vadd.f32 %v5203_v56, %v254_v6  ;;  %v87_v35 = vmul.f32 %v4789_v43, %v4442_v18 }
 0xfe0   :  { %v2521_v1 = vadd.f32 %v2511_v60, %v2452_v30  ;;  %v2441_v47 = vsel %vm1728_vm6, %v2430_v59, %v2432_v2  ;;  %v2942_v2 = vld [vmem:[%s4947_s0 + $0x18] sm:$0xff]  ;;  %v375_v60 = vsel %vm372_vm3, %v5206_v12, %v5205_v44  ;;  %v242_v56 = vsel %vm240_vm1, %v3261_v13, %v5211_v45  ;;  %s3088_s0 = smov 51  }
 0xfe1   :  { %v2451_v4 = vadd.f32 %v2441_v47, %v1058_v32  ;;  %v90_v28 = vmul.f32 %v2942_v2, %v4466_v42  ;;  %v244_v42 = vsel %vm240_vm1, %v5199_v37, %v5201_v9  ;;  %v255_v62 = vadd.f32 %v243_v38, %v152_v34  ;;  %v5207_v59 = vld [vmem:[#allocation39_spill] sm:$0xff] }
 0xfe2   :  { %2534 = vrot.lane.b32.xlu0 %v2521_v1, %s3087_s18  ;;  %v376_v54 = vsel %vm372_vm3, %v5205_v44, %v5207_v59  ;;  %v150_v38 = vadd.f32 %v3224_v55, %v87_v35 }
 0xfe3   :  { %2467 = vrot.lane.b32.xlu1 %v2097_v19, %s3086_s17  ;;  %v153_v5 = vadd.f32 %v5196_v26, %v90_v28  ;;  %v352_v21 = vadd.f32 %v340_v27, %v255_v62  ;;  %v386_v19 = vadd.f32 %v375_v60, %v351_v49 }
 0xfe4   :  { %v253_v27 = vadd.f32 %v242_v56, %v150_v38 }
 0xfe5   :  { %v256_v31 = vadd.f32 %v244_v42, %v153_v5  ;;  %v387_v36 = vadd.f32 %v376_v54, %v352_v21  ;;  %v405_v47 = vmul.f32 %v3303_v41, %v386_v19 }
 0xfe7   :  { %v2499_v63 = vpop.permute.xlu0 %2498  ;;  %v353_v30 = vadd.f32 %v341_v53, %v256_v31  ;;  %v406_v7 = vmul.f32 %v4475_v20, %v387_v36 }
 0xfe8   :  { %v2510_v39 = vsel %vm2475_vm12, %v2499_v63, %v2501_v40 }
 0xfe9   :  { %v2520_v46 = vadd.f32 %v2510_v39, %v2451_v4  ;;  %v388_v48 = vadd.f32 %v5207_v59, %v353_v30  ;;  %v5209_v4 = vld [vmem:[#allocation103_spill] sm:$0xff]  ;;  %v5210_v39 = vld [vmem:[#allocation104_spill] sm:$0xff] }
 0xfea   :  { %v1731_v63 = vsel %vm1728_vm6, %v5209_v4, %v5208_v50 }
 0xfeb   :  { %2536 = vrot.lane.b32.xlu1 %v2522_v23, %s3087_s18  ;;  %2532 = vrot.lane.b32.xlu2 %v2520_v46, %s3087_s18  ;;  %v407_v17 = vmul.f32 %v3283_v29, %v388_v48  ;;  %v1732_v23 = vsel %vm1728_vm6, %v5208_v50, %v5210_v39  ;;  %v1742_v41 = vadd.f32 %v1731_v63, %v405_v47 }
 0xfec   :  { %v1743_v16 = vadd.f32 %v1732_v23, %v406_v7 }
 0xfed   :  { %v1744_v8 = vadd.f32 %v5210_v39, %v407_v17 }
 0xff3   :  { %2565 = vperm.xlu2 %2925, %v2561_v11  }
 0xff9   :  { %v2474_v1 = vpop.permute.xlu2 %2473 }
 0xffa   :  { %v2491_v28 = vadd.f32 %v2474_v1, %v1744_v8 }
0x1009   :  { %v2543_v20 = vpop.permute.xlu2 %2542 }
0x100a   :  { %v2560_v61 = vadd.f32 %v2543_v20, %v2491_v28 }
0x102b   :  { %v2470_v40 = vpop.permute.xlu0 %2469  ;;  %v2472_v57 = vpop.permute.xlu1 %2471 }
0x102c   :  { %v2479_v46 = vsel %vm2475_vm12, %v2472_v57, %v2474_v1  ;;  %v2478_v11 = vsel %vm2475_vm12, %v2470_v40, %v2472_v57  ;;  %v2466_v53 = vpop.permute.xlu2 %2465  ;;  %v5212_v40 = vld [vmem:[#allocation17_spill] sm:$0xff] }
0x102d   :  { %v2490_v26 = vadd.f32 %v2479_v46, %v1743_v16  ;;  %v2489_v52 = vadd.f32 %v2478_v11, %v1742_v41  ;;  %v339_v55 = vsel %vm337_vm2, %v3277_v24, %v5212_v40 }
0x102e   :  { %v350_v44 = vadd.f32 %v339_v55, %v253_v27 }
0x1030   :  { %v385_v13 = vadd.f32 %v3443_v14, %v350_v44 }
0x1032   :  { %v404_v48 = vmul.f32 %v3283_v29, %v385_v13 }
0x1034   :  { %v1741_v36 = vadd.f32 %v4053_v10, %v404_v48 }
0x103b   :  { %v2539_v15 = vpop.permute.xlu0 %2538  ;;  %v2541_v32 = vpop.permute.xlu1 %2540 }
0x103c   :  { %v2548_v0 = vsel %vm2544_vm13, %v2541_v32, %v2543_v20  ;;  %v2547_v2 = vsel %vm2544_vm13, %v2539_v15, %v2541_v32 }
0x103d   :  { %v2559_v25 = vadd.f32 %v2548_v0, %v2490_v26  ;;  %v2558_v3 = vadd.f32 %v2547_v2, %v2489_v52 }
0x1043   :  { %v2571_v34 = vpop.permute.xlu0 %2570 }
0x1044   :  { %v2576_v5 = vadd.f32 %v2571_v34, %v2558_v3  ;;  %v2577_v37 = vadd.f32 %v2571_v34, %v2559_v25  ;;  %v2578_v33 = vadd.f32 %v2571_v34, %v2560_v61  ;;  %v2759_v3 = vld [vmem:[%s4950_s3] sm:$0xff]  ;;  %s3089_s3 = smov [#allocation8]  }
0x1045   :  { %v2533_v12 = vpop.permute.xlu2 %2532 }
0x1046   :  { %v2582_v9 = vmax.f32 %v2576_v5, 0.0  ;;  %v2583_v42 = vmax.f32 %v2577_v37, 0.0  ;;  %v2584_v6 = vmax.f32 %v2578_v33, 0.0  ;;  %v2592_v5 = vld [vmem:[%s4951_s4 + $0x8] sm:$0xff] }
0x1048   :  { %v2587_v62 = vpack.c.bf16 %v2583_v42, %v2582_v9  ;;  %v2588_v31 = vpack.c.bf16 %v2584_v6, %v2584_v6 }
0x104a   :  { %v2676_v18 = vunpack.c.l.b16 %v2588_v31  ;;  %v2675_v43 = vunpack.c.h.b16 %v2587_v62  ;;  %v2674_v22 = vunpack.c.l.b16 %v2587_v62 }
0x104c   :  { %v2679_v49 = vpack.c.b16 %v2676_v18, %v2676_v18  ;;  %v2678_v21 = vpack.c.b16 %v2675_v43, %v2675_v43  ;;  %v2677_v30 = vpack.c.b16 %v2674_v22, %v2674_v22 }
0x104d   :  { %v2464_v57 = vpop.permute.xlu1 %2463  ;;  %v2566_v47 = vpop.permute.xlu2 %2565 }
0x104e   :  { %2684 = vrot.lane.b32.xlu2 %v2679_v49, %s3088_s0  ;;  %2682 = vrot.lane.b32.xlu1 %v2678_v21, %s3088_s0  ;;  %v2476_v54 = vsel %vm2475_vm12, %v2464_v57, %v2466_v53 }
0x104f   :  { %2680 = vrot.lane.b32.xlu0 %v2677_v30, %s3088_s0  ;;  %v2486_v1 = vadd.f32 %v2476_v54, %v4485_v51 }
0x1054   :  { %v2535_v60 = vpop.permute.xlu0 %2534 }
0x1055   :  { %v2468_v59 = vpop.permute.xlu1 %2467  ;;  %v2545_v24 = vsel %vm2544_vm13, %v2533_v12, %v2535_v60 }
0x1056   :  { %v2477_v19 = vsel %vm2475_vm12, %v2466_v53, %v2468_v59  ;;  %v2555_v17 = vadd.f32 %v2545_v24, %v2486_v1  ;;  %v2488_v7 = vadd.f32 %v2468_v59, %v1741_v36 }
0x1057   :  { %v2487_v14 = vadd.f32 %v2477_v19, %v4487_v58  ;;  %v2591_v58 = vld [vmem:[%s4951_s4] sm:$0xff]  ;;  %s2735_s4 = sshll.u32 %s3089_s3, 4  ;;  %s2736_s4 = int_to_ptr.vmem [resolvable:$true] %s2735_s4 }
0x1058   :  { %v2573_v4 = vadd.f32 %v2566_v47, %v2555_v17 }
0x105a   :  { %v2579_v46 = vmax.f32 %v2573_v4, 0.0 }
0x105d   :  { %v2537_v15 = vpop.permute.xlu1 %2536 }
0x105e   :  { %v2546_v32 = vsel %vm2544_vm13, %v2535_v60, %v2537_v15  ;;  %v2557_v50 = vadd.f32 %v2537_v15, %v2488_v7 }
0x105f   :  { %v2556_v63 = vadd.f32 %v2546_v32, %v2487_v14 }
0x1060   :  { %v2575_v29 = vadd.f32 %v2566_v47, %v2557_v50 }
0x1061   :  { %v2574_v39 = vadd.f32 %v2566_v47, %v2556_v63 }
0x1062   :  { %v2581_v23 = vmax.f32 %v2575_v29, 0.0 }
0x1063   :  { %v2580_v51 = vmax.f32 %v2574_v39, 0.0 }
0x1064   :  { %v2586_v11 = vpack.c.bf16 %v2581_v23, %v2581_v23 }
0x1065   :  { %v2585_v10 = vpack.c.bf16 %v2580_v51, %v2579_v46 }
0x1066   :  { %v2612_v8 = vunpack.c.l.b16 %v2586_v11 }
0x1067   :  { %v2611_v20 = vunpack.c.h.b16 %v2585_v10  ;;  %v2610_v16 = vunpack.c.l.b16 %v2585_v10 }
0x1068   :  { %v2615_v41 = vpack.c.b16 %v2612_v8, %v2612_v8 }
0x1069   :  { %v2614_v0 = vpack.c.b16 %v2611_v20, %v2611_v20  ;;  %v2613_v2 = vpack.c.b16 %v2610_v16, %v2610_v16 }
0x106a   :  { %2620 = vrot.lane.b32.xlu2 %v2615_v41, %s3088_s0 }
0x106b   :  { %2618 = vrot.lane.b32.xlu1 %v2614_v0, %s3088_s0  ;;  %2616 = vrot.lane.b32.xlu0 %v2613_v2, %s3088_s0 }
0x1073   :  { %2595 = vperm.xlu0 %2924, %v2591_v58   ;;  %2600 = vperm.xlu1 %2926, %v2592_v5  }
0x10a8   :  { %v2685_v28 = vpop.permute.xlu2 %2684 }
0x10c0   :  { %v2683_v26 = vpop.permute.xlu1 %2682 }
0x10c1   :  { %v2681_v52 = vpop.permute.xlu0 %2680  ;;  %v2687_v35 = vsel %vm2622_vm14, %v2683_v26, %v2685_v28 }
0x10c2   :  { %v2686_v61 = vsel %vm2622_vm14, %v2681_v52, %v2683_v26  ;;  %v2692_v25 = vsel %vm2629_vm15, %v2687_v35, 0 }
0x10c3   :  { %v2689_v34 = vsel %vm2629_vm15, %v2686_v61, 0  ;;  %2715 = vmatpush.bf16.msra.mxu3 %v2692_v25 }
0x10c4   :  { %2701 = vmatpush.bf16.msra.mxu2 %v2689_v34  ;;  %v2621_v37 = vpop.permute.xlu2 %2620 }
0x10c6   :  { %2758 = vmatmul.msk.bf16.vlgmr.msra.gmra.mxu3 %vm2625_vm0, %v2759_v3 }
0x10c7   :  { %2757 = vmatmul.msk.bf16.vlgmr.msra.gmra.mxu2 %vm2625_vm0, %v2759_v3 }
0x10dd   :  { %v2619_v33 = vpop.permute.xlu1 %2618  ;;  %v2617_v38 = vpop.permute.xlu0 %2616 }
0x10de   :  { %v2623_v9 = vsel %vm2622_vm14, %v2617_v38, %v2619_v33  ;;  %v2624_v42 = vsel %vm2622_vm14, %v2619_v33, %v2621_v37 }
0x10df   :  { %v2631_v6 = vsel %vm2629_vm15, %v2623_v9, 0  ;;  %v2634_v62 = vsel %vm2629_vm15, %v2624_v42, 0 }
0x10e0   :  { %2643 = vmatpush.bf16.msra.mxu0 %v2631_v6  ;;  %2657 = vmatpush.bf16.msra.mxu1 %v2634_v62 }
0x10e3   :  { %2755 = vmatmul.msk.bf16.vlgmr.msra.gmra.mxu0 %vm2625_vm0, %v2759_v3  ;;  %2756 = vmatmul.msk.bf16.vlgmr.msra.gmra.mxu1 %vm2625_vm0, %v2759_v3 }
0x10e5   :  { %v2596_v31 = vpop.permute.xlu0 %2595  ;;  %v2601_v53 = vpop.permute.xlu1 %2600 }
0x1149   :  { %v2717_v45 = vpop.f32.mrf.mxu3 }
0x114a   :  { %v2703_v56 = vpop.f32.mrf.mxu2  ;;  %v2718_v27 = vadd.f32 %v2717_v45, %v2596_v31 }
0x114b   :  { %v2704_v18 = vadd.f32 %v2703_v56, %v2596_v31 }
0x114c   :  { %v2723_v43 = vmax.f32 %v2718_v27, 0.0 }
0x114d   :  { %v2722_v22 = vmax.f32 %v2704_v18, 0.0 }
0x114e   :  { %2728 = vst [vmem:[#allocation8 + $0x28] sm:$0xff] %v2723_v43 }
0x114f   :  { %2727 = vst [vmem:[#allocation8 + $0x20] sm:$0xff] %v2722_v22 }
0x1151   :  { %v2719_v49 = vpop.f32.mrf.mxu3 }
0x1152   :  { %v2720_v21 = vadd.f32 %v2719_v49, %v2601_v53  ;;  %v2705_v30 = vpop.f32.mrf.mxu2 }
0x1153   :  { %v2706_v40 = vadd.f32 %v2705_v30, %v2601_v53 }
0x1154   :  { %v2725_v55 = vmax.f32 %v2720_v21, 0.0 }
0x1155   :  { %v2724_v57 = vmax.f32 %v2706_v40, 0.0 }
0x1156   :  { %2730 = vst [vmem:[#allocation8 + $0x38] sm:$0xff] %v2725_v55 }
0x1157   :  { %2729 = vst [vmem:[#allocation8 + $0x30] sm:$0xff] %v2724_v57 }
0x1160   :  { %v2659_v44 = vpop.f32.mrf.mxu1  ;;  %v2645_v13 = vpop.f32.mrf.mxu0 }
0x1161   :  { %v2660_v12 = vadd.f32 %v2659_v44, %v2596_v31  ;;  %v2646_v60 = vadd.f32 %v2645_v13, %v2596_v31 }
0x1163   :  { %v2665_v59 = vmax.f32 %v2660_v12, 0.0  ;;  %v2664_v54 = vmax.f32 %v2646_v60, 0.0 }
0x1165   :  { %2669 = vst [vmem:[#allocation8 + $0x8] sm:$0xff] %v2665_v59 }
0x1166   :  { %2668 = vst [vmem:[#allocation8] sm:$0xff] %v2664_v54 }
0x1168   :  { %v2647_v48 = vpop.f32.mrf.mxu0  ;;  %v2661_v24 = vpop.f32.mrf.mxu1 }
0x1169   :  { %v2648_v1 = vadd.f32 %v2647_v48, %v2601_v53  ;;  %v2662_v36 = vadd.f32 %v2661_v24, %v2601_v53 }
0x116b   :  { %v2666_v19 = vmax.f32 %v2648_v1, 0.0  ;;  %v2667_v17 = vmax.f32 %v2662_v36, 0.0 }
0x116d   :  { %2670 = vst [vmem:[#allocation8 + $0x10] sm:$0xff] %v2666_v19 }
0x116e   :  { %2671 = vst [vmem:[#allocation8 + $0x18] sm:$0xff] %v2667_v17 }
0x116f   :  { %2743 = dma.vmem_to_hbm [thread:$0]  %s2736_s4, 1024, %s2738_s13, [#allocation5], %s3090_s14, %s3090_s14, %s3091_s15  }
0x1170   :  { %3019 = dma.done.wait [#allocation5], 1024  }
0x1171   :  { %3020 = vsyncadd [#allocation5], 4294966272 }
0x1172   :  { %2748 = vsyncpa [#allocation4], 1 }
0x1173   :  { %2749 = vsyncpa [#allocation7], 1 }
0x1174   :  { %2750 = vsyncpa [#allocation5], 1 }

</bundles_post_ra>
